<compile_context>
chip_gen: v7x
topology: tpu7x:2x2x1
jax: 0.10.0
libtpu: 0.0.40
codegen_flags: <defaults>
</compile_context>

<pallas_src>
import functools

import jax
import jax.numpy as jnp
from jax import lax
from jax.experimental import pallas as pl
from jax.experimental.pallas import tpu as pltpu

P = 2            # padding of every conv layer
C1, C2 = 96, 48  # channels of conv1 / conv2
K1, K3 = 9, 5    # kernel sizes of conv1 / conv3 (conv2 is 1x1)


def _fused_cnn_kernel(x_ref, u1_ref, b1t_ref, w2bd_ref, b2t_ref, v3_ref,
                      b3m_ref, o_ref, im2col_ref, *, H, W):
    """Whole 3-layer CNN for one image.

    x_ref    : (1, H, W)                input image
    u1_ref   : (K1*W, W1*C1)            conv1 im2col weight (col-pad folded in)
    b1t_ref  : (1, W1*C1)               conv1 bias tiled along width
    w2bd_ref : (W1*C1, W1*C2)           conv2 1x1 weight, block-diagonal
    b2t_ref  : (1, W1*C2)               conv2 bias tiled along width
    v3_ref   : (K3, W1*C2, W)           conv3 banded weights (interior cols only)
    b3m_ref  : (H, W)                   conv3 bias + folded constant (ring/pad)
    o_ref    : (1, H, W)
    im2col_ref: VMEM (H1, K1*W)         conv1 im2col staging buffer
    """
    f32 = jnp.float32
    H1 = H + 2 * P - K1 + 1             # conv1 output height (= H - 4)
    W1 = W + 2 * P - K1 + 1             # conv1 output width  (= W - 4)

    # ---------------- conv1 (1->96, k=9, p=2) + ReLU: one matmul ------------
    # im2col[i, kh*W + j] = x_rowpadded[i + kh, j]; zero cells are the row pad.
    im2col_ref[...] = jnp.zeros((H1, K1 * W), f32)
    for kh in range(K1):
        lo = max(0, P - kh)                       # first valid output row
        hi = min(H1, H + P - kh)                  # one past last valid row
        if hi > lo:
            im2col_ref[lo:hi, kh * W:(kh + 1) * W] = \
                x_ref[0, lo + kh - P:hi + kh - P, :]
    a1 = jnp.dot(im2col_ref[...], u1_ref[...], preferred_element_type=f32)
    a1 = jnp.maximum(a1 + b1t_ref[...], 0.0)      # (H1, W1*C1), lanes = (w, c)

    # -------- conv2 (96->48, 1x1, p=2) + ReLU: one block-diagonal matmul ----
    z2 = jnp.dot(a1, w2bd_ref[...], preferred_element_type=f32)
    z2 = jnp.maximum(z2 + b2t_ref[...], 0.0)      # (H1, W1*C2)  interior only

    # ---- conv3 (48->1, k=5, p=2): 5 banded matmuls + folded-constant bias --
    # Constant border of conv2's output (relu(b2) ring + conv3 zero padding)
    # is already inside b3m; only the data-dependent interior contributes here.
    acc = b3m_ref[...]                            # (H, W)
    for kh in range(K3):
        contrib = jnp.dot(z2, v3_ref[kh], preferred_element_type=f32)  # (H1, W)
        top, bot = 2 * P - kh, kh                 # shift interior rows into place
        parts = []
        if top > 0:
            parts.append(jnp.zeros((top, W), f32))
        parts.append(contrib)
        if bot > 0:
            parts.append(jnp.zeros((bot, W), f32))
        shifted = parts[0] if len(parts) == 1 else jnp.concatenate(parts, axis=0)
        acc = acc + shifted
    o_ref[0] = acc


def init_params(key, c_in=1, channel=(96, 48, 1), kernel_size=(9, 1, 5)):
    """PyTorch-style init; weights stored HWIO (KH, KW, Cin, Cout)."""
    params = []
    cin = c_in
    for cout, k in zip(channel, kernel_size):
        key, kw_key, kb_key = jax.random.split(key, 3)
        fan_in = cin * k * k
        bound = 1.0 / jnp.sqrt(fan_in)
        w = jax.random.uniform(kw_key, (k, k, cin, cout), jnp.float32,
                               minval=-bound, maxval=bound)
        b = jax.random.uniform(kb_key, (cout,), jnp.float32,
                               minval=-bound, maxval=bound)
        params.append((w, b))
        cin = cout
    return params


def prepare_params(params, height, width):
    """One-time repack of the raw conv weights into the kernel's layouts."""
    (w1, b1), (w2, b2), (w3, b3) = params
    H, W = height, width
    H1 = H + 2 * P - K1 + 1
    W1 = W + 2 * P - K1 + 1

    # conv1 im2col weight: U1[kh*W + j, w*C1 + c] = w1[kh, j - w + P, 0, c]
    j = jnp.arange(W)
    wo = jnp.arange(W1)
    kw = j[:, None] - wo[None, :] + P                       # (W, W1)
    valid = (kw >= 0) & (kw < K1)
    w1_sq = w1[:, :, 0, :]                                  # (K1, K1, C1)
    u1 = jnp.take(w1_sq, jnp.clip(kw, 0, K1 - 1), axis=1)   # (K1, W, W1, C1)
    u1 = jnp.where(valid[None, :, :, None], u1, 0.0)
    u1 = u1.reshape(K1 * W, W1 * C1)
    b1t = jnp.tile(b1, W1).reshape(1, W1 * C1)

    # conv2 block-diagonal weight: W1 copies of (C1, C2) on the diagonal.
    w2_sq = w2[0, 0]                                        # (C1, C2)
    w2_bd = jnp.einsum('wv,io->wivo', jnp.eye(W1, dtype=jnp.float32), w2_sq)
    w2_bd = w2_bd.reshape(W1 * C1, W1 * C2)
    b2t = jnp.tile(b2, W1).reshape(1, W1 * C2)

    # conv3 banded weight over interior columns only:
    #   V3[kh, w1*C2 + c, w] = w3[kh, (w1 + 2P) - w, c, 0]
    jp = jnp.arange(W1) + 2 * P                             # padded col of interior
    wo3 = jnp.arange(W)
    kw3 = jp[:, None] - wo3[None, :]                        # (W1, W)
    valid3 = (kw3 >= 0) & (kw3 < K3)
    w3_sq = w3[:, :, :, 0]                                  # (K3, K3, C2)
    v3 = jnp.take(w3_sq, jnp.clip(kw3, 0, K3 - 1), axis=1)  # (K3, W1, W, C2)
    v3 = jnp.where(valid3[None, :, :, None], v3, 0.0)
    v3 = jnp.transpose(v3, (0, 1, 3, 2)).reshape(K3, W1 * C2, W)

    # conv3 bias map: b3 + conv3 applied to the constant part of conv2's
    # padded output (zeros outside, relu(b2) on the 2-wide ring, 0 interior).
    ring_val = jnp.maximum(b2, 0.0)                         # (C2,)
    Hp, Wp = H + 2 * P, W + 2 * P
    rr = jnp.arange(Hp)[:, None]
    cc = jnp.arange(Wp)[None, :]
    in_conv2 = (rr >= P) & (rr < P + H) & (cc >= P) & (cc < P + W)
    in_inter = ((rr >= 2 * P) & (rr < 2 * P + H1) &
                (cc >= 2 * P) & (cc < 2 * P + W1))
    ring_mask = (in_conv2 & (~in_inter)).astype(jnp.float32)        # (Hp, Wp)
    z_img = ring_mask[None, None] * ring_val[None, :, None, None]   # (1,C2,Hp,Wp)
    z_conv = lax.conv_general_dilated(
        z_img, w3, window_strides=(1, 1), padding='VALID',
        dimension_numbers=("NCHW", "HWIO", "NCHW"))                 # (1,1,H,W)
    b3_map = z_conv[0, 0] + b3[0]

    return dict(u1=u1, b1t=b1t, w2bd=w2_bd, b2t=b2t, v3=v3, b3m=b3_map)


@jax.jit
def cnn_forward(x_nchw, prep):
    """Matches CNN.forward: NCHW in, NCHW out."""
    N, _, H, W = x_nchw.shape
    H1 = H + 2 * P - K1 + 1
    W1 = W + 2 * P - K1 + 1
    x = x_nchw.reshape(N, H, W).astype(jnp.float32)          # free (c_in == 1)
    kernel = functools.partial(_fused_cnn_kernel, H=H, W=W)
    out = pl.pallas_call(
        kernel,
        out_shape=jax.ShapeDtypeStruct((N, H, W), jnp.float32),
        grid_spec=pltpu.PrefetchScalarGridSpec(
            num_scalar_prefetch=0,
            grid=(N,),
            in_specs=[
                pl.BlockSpec((1, H, W), lambda n: (n, 0, 0)),
                pl.BlockSpec((K1 * W, W1 * C1), lambda n: (0, 0)),
                pl.BlockSpec((1, W1 * C1), lambda n: (0, 0)),
                pl.BlockSpec((W1 * C1, W1 * C2), lambda n: (0, 0)),
                pl.BlockSpec((1, W1 * C2), lambda n: (0, 0)),
                pl.BlockSpec((K3, W1 * C2, W), lambda n: (0, 0, 0)),
                pl.BlockSpec((H, W), lambda n: (0, 0)),
            ],
            out_specs=pl.BlockSpec((1, H, W), lambda n: (n, 0, 0)),
            scratch_shapes=[
                pltpu.VMEM((H1, K1 * W), jnp.float32),       # conv1 im2col
            ]),
        compiler_params=pltpu.CompilerParams(
            dimension_semantics=("parallel",)),
    )(x, prep["u1"], prep["b1t"], prep["w2bd"], prep["b2t"], prep["v3"],
      prep["b3m"])
    return out.reshape(N, 1, H, W)                           # free (c_out == 1)


def _reference_forward(x_nchw, params, paddings=(2, 2, 2)):
    """Pure-JAX reference (lax.conv_general_dilated) for correctness check."""
    x = x_nchw.astype(jnp.float32)
    n_layers = len(params)
    for i, ((w, b), pad) in enumerate(zip(params, paddings)):
        y = lax.conv_general_dilated(
            x, w, window_strides=(1, 1),
            padding=((pad, pad), (pad, pad)),
            dimension_numbers=("NCHW", "HWIO", "NCHW"))
        y = y + b[None, :, None, None]
        if i != n_layers - 1:
            y = jnp.maximum(y, 0.0)
        x = y
    return x


if __name__ == "__main__":
    key = jax.random.PRNGKey(0)
    key, xk = jax.random.split(key)
    # small shapes consistent with the module: batch=2, c_in=1, spatial=16
    x = jax.random.normal(xk, (2, 1, 16, 16), jnp.float32)

    params = init_params(key)
    prep = prepare_params(params, height=16, width=16)

    out = jax.block_until_ready(cnn_forward(x, prep))

    ref = jax.block_until_ready(_reference_forward(x, params))
    assert out.shape == ref.shape == (2, 1, 16, 16), out.shape
    max_err = float(jnp.max(jnp.abs(out - ref)))
    assert jnp.allclose(out, ref, atol=2e-3, rtol=2e-3), max_err

    print("KERNEL_OK")
</pallas_src>

<mosaic_0001>
module attributes {stable_mosaic.version = 11 : i64} {
  func.func @_fused_cnn_kernel(%arg0: i32, %arg1: memref<1x16x16xf32, #tpu.memory_space<vmem>>, %arg2: memref<144x1152xf32, #tpu.memory_space<vmem>>, %arg3: memref<1x1152xf32, #tpu.memory_space<vmem>>, %arg4: memref<1152x576xf32, #tpu.memory_space<vmem>>, %arg5: memref<1x576xf32, #tpu.memory_space<vmem>>, %arg6: memref<5x576x16xf32, #tpu.memory_space<vmem>>, %arg7: memref<16x16xf32, #tpu.memory_space<vmem>>, %arg8: memref<1x16x16xf32, #tpu.memory_space<vmem>>, %arg9: memref<12x144xf32, #tpu.memory_space<vmem>>) attributes {dimension_semantics = [#tpu.dimension_semantics<parallel>], iteration_bounds = array<i64: 2>, scalar_prefetch = 0 : i64, scratch_operands = 1 : i64, tpu.core_type = #tpu.core_type<tc>, window_params = [{transform_indices = @transform_0, window_bounds = array<i64: 1, 16, 16>}, {pipeline_mode = #tpu.pipeline_mode<synchronous>, transform_indices = @transform_1, window_bounds = array<i64: 144, 1152>}, {pipeline_mode = #tpu.pipeline_mode<synchronous>, transform_indices = @transform_2, window_bounds = array<i64: 1, 1152>}, {pipeline_mode = #tpu.pipeline_mode<synchronous>, transform_indices = @transform_3, window_bounds = array<i64: 1152, 576>}, {pipeline_mode = #tpu.pipeline_mode<synchronous>, transform_indices = @transform_4, window_bounds = array<i64: 1, 576>}, {pipeline_mode = #tpu.pipeline_mode<synchronous>, transform_indices = @transform_5, window_bounds = array<i64: 5, 576, 16>}, {pipeline_mode = #tpu.pipeline_mode<synchronous>, transform_indices = @transform_6, window_bounds = array<i64: 16, 16>}, {transform_indices = @transform_7, window_bounds = array<i64: 1, 16, 16>}]} {
    %cst = arith.constant 0.000000e+00 : f32
    %0 = vector.broadcast %cst : f32 to vector<12x144xf32>
    %c0 = arith.constant 0 : index
    %c0_0 = arith.constant 0 : index
    %1 = vector.load %arg9[%c0, %c0_0] : memref<12x144xf32, #tpu.memory_space<vmem>>, vector<12x144xf32>
    tpu.vector_store %arg9[%c0, %c0_0], %0 {strides = array<i32>} : memref<12x144xf32, #tpu.memory_space<vmem>>, vector<12x144xf32>,
    %c0_1 = arith.constant 0 : index
    %c0_2 = arith.constant 0 : index
    %c0_3 = arith.constant 0 : index
    %2 = vector.load %arg1[%c0_1, %c0_2, %c0_3] : memref<1x16x16xf32, #tpu.memory_space<vmem>>, vector<1x10x16xf32>
    %3 = vector.shape_cast %2 : vector<1x10x16xf32> to vector<10x16xf32>
    %c2 = arith.constant 2 : index
    %c0_4 = arith.constant 0 : index
    %4 = vector.load %arg9[%c2, %c0_4] : memref<12x144xf32, #tpu.memory_space<vmem>>, vector<10x16xf32>
    tpu.vector_store %arg9[%c2, %c0_4], %3 {strides = array<i32>} : memref<12x144xf32, #tpu.memory_space<vmem>>, vector<10x16xf32>,
    %c0_5 = arith.constant 0 : index
    %c0_6 = arith.constant 0 : index
    %c0_7 = arith.constant 0 : index
    %5 = vector.load %arg1[%c0_5, %c0_6, %c0_7] : memref<1x16x16xf32, #tpu.memory_space<vmem>>, vector<1x11x16xf32>
    %6 = vector.shape_cast %5 : vector<1x11x16xf32> to vector<11x16xf32>
    %c1 = arith.constant 1 : index
    %c16 = arith.constant 16 : index
    %7 = vector.load %arg9[%c1, %c16] : memref<12x144xf32, #tpu.memory_space<vmem>>, vector<11x16xf32>
    tpu.vector_store %arg9[%c1, %c16], %6 {strides = array<i32>} : memref<12x144xf32, #tpu.memory_space<vmem>>, vector<11x16xf32>,
    %c0_8 = arith.constant 0 : index
    %c0_9 = arith.constant 0 : index
    %c0_10 = arith.constant 0 : index
    %8 = vector.load %arg1[%c0_8, %c0_9, %c0_10] : memref<1x16x16xf32, #tpu.memory_space<vmem>>, vector<1x12x16xf32>
    %9 = vector.shape_cast %8 : vector<1x12x16xf32> to vector<12x16xf32>
    %c0_11 = arith.constant 0 : index
    %c32 = arith.constant 32 : index
    %10 = vector.load %arg9[%c0_11, %c32] : memref<12x144xf32, #tpu.memory_space<vmem>>, vector<12x16xf32>
    tpu.vector_store %arg9[%c0_11, %c32], %9 {strides = array<i32>} : memref<12x144xf32, #tpu.memory_space<vmem>>, vector<12x16xf32>,
    %c0_12 = arith.constant 0 : index
    %c1_13 = arith.constant 1 : index
    %c0_14 = arith.constant 0 : index
    %11 = vector.load %arg1[%c0_12, %c1_13, %c0_14] : memref<1x16x16xf32, #tpu.memory_space<vmem>>, vector<1x12x16xf32>
    %12 = vector.shape_cast %11 : vector<1x12x16xf32> to vector<12x16xf32>
    %c0_15 = arith.constant 0 : index
    %c48 = arith.constant 48 : index
    %13 = vector.load %arg9[%c0_15, %c48] : memref<12x144xf32, #tpu.memory_space<vmem>>, vector<12x16xf32>
    tpu.vector_store %arg9[%c0_15, %c48], %12 {strides = array<i32>} : memref<12x144xf32, #tpu.memory_space<vmem>>, vector<12x16xf32>,
    %c0_16 = arith.constant 0 : index
    %c2_17 = arith.constant 2 : index
    %c0_18 = arith.constant 0 : index
    %14 = vector.load %arg1[%c0_16, %c2_17, %c0_18] : memref<1x16x16xf32, #tpu.memory_space<vmem>>, vector<1x12x16xf32>
    %15 = vector.shape_cast %14 : vector<1x12x16xf32> to vector<12x16xf32>
    %c0_19 = arith.constant 0 : index
    %c64 = arith.constant 64 : index
    %16 = vector.load %arg9[%c0_19, %c64] : memref<12x144xf32, #tpu.memory_space<vmem>>, vector<12x16xf32>
    tpu.vector_store %arg9[%c0_19, %c64], %15 {strides = array<i32>} : memref<12x144xf32, #tpu.memory_space<vmem>>, vector<12x16xf32>,
    %c0_20 = arith.constant 0 : index
    %c3 = arith.constant 3 : index
    %c0_21 = arith.constant 0 : index
    %17 = vector.load %arg1[%c0_20, %c3, %c0_21] : memref<1x16x16xf32, #tpu.memory_space<vmem>>, vector<1x12x16xf32>
    %18 = vector.shape_cast %17 : vector<1x12x16xf32> to vector<12x16xf32>
    %c0_22 = arith.constant 0 : index
    %c80 = arith.constant 80 : index
    %19 = vector.load %arg9[%c0_22, %c80] : memref<12x144xf32, #tpu.memory_space<vmem>>, vector<12x16xf32>
    tpu.vector_store %arg9[%c0_22, %c80], %18 {strides = array<i32>} : memref<12x144xf32, #tpu.memory_space<vmem>>, vector<12x16xf32>,
    %c0_23 = arith.constant 0 : index
    %c4 = arith.constant 4 : index
    %c0_24 = arith.constant 0 : index
    %20 = vector.load %arg1[%c0_23, %c4, %c0_24] : memref<1x16x16xf32, #tpu.memory_space<vmem>>, vector<1x12x16xf32>
    %21 = vector.shape_cast %20 : vector<1x12x16xf32> to vector<12x16xf32>
    %c0_25 = arith.constant 0 : index
    %c96 = arith.constant 96 : index
    %22 = vector.load %arg9[%c0_25, %c96] : memref<12x144xf32, #tpu.memory_space<vmem>>, vector<12x16xf32>
    tpu.vector_store %arg9[%c0_25, %c96], %21 {strides = array<i32>} : memref<12x144xf32, #tpu.memory_space<vmem>>, vector<12x16xf32>,
    %c0_26 = arith.constant 0 : index
    %c5 = arith.constant 5 : index
    %c0_27 = arith.constant 0 : index
    %23 = vector.load %arg1[%c0_26, %c5, %c0_27] : memref<1x16x16xf32, #tpu.memory_space<vmem>>, vector<1x11x16xf32>
    %24 = vector.shape_cast %23 : vector<1x11x16xf32> to vector<11x16xf32>
    %c0_28 = arith.constant 0 : index
    %c112 = arith.constant 112 : index
    %25 = vector.load %arg9[%c0_28, %c112] : memref<12x144xf32, #tpu.memory_space<vmem>>, vector<11x16xf32>
    tpu.vector_store %arg9[%c0_28, %c112], %24 {strides = array<i32>} : memref<12x144xf32, #tpu.memory_space<vmem>>, vector<11x16xf32>,
    %c0_29 = arith.constant 0 : index
    %c6 = arith.constant 6 : index
    %c0_30 = arith.constant 0 : index
    %26 = vector.load %arg1[%c0_29, %c6, %c0_30] : memref<1x16x16xf32, #tpu.memory_space<vmem>>, vector<1x10x16xf32>
    %27 = vector.shape_cast %26 : vector<1x10x16xf32> to vector<10x16xf32>
    %c0_31 = arith.constant 0 : index
    %c128 = arith.constant 128 : index
    %28 = vector.load %arg9[%c0_31, %c128] : memref<12x144xf32, #tpu.memory_space<vmem>>, vector<10x16xf32>
    tpu.vector_store %arg9[%c0_31, %c128], %27 {strides = array<i32>} : memref<12x144xf32, #tpu.memory_space<vmem>>, vector<10x16xf32>,
    %c0_32 = arith.constant 0 : index
    %c0_33 = arith.constant 0 : index
    %29 = vector.load %arg9[%c0_32, %c0_33] : memref<12x144xf32, #tpu.memory_space<vmem>>, vector<12x144xf32>
    %c0_34 = arith.constant 0 : index
    %c0_35 = arith.constant 0 : index
    %30 = vector.load %arg2[%c0_34, %c0_35] : memref<144x1152xf32, #tpu.memory_space<vmem>>, vector<144x1152xf32>
    %cst_36 = arith.constant dense<0.000000e+00> : vector<12x1152xf32>
    %31 = tpu.matmul %29, %30, %cst_36 {dimension_numbers = #tpu.dot_dimension_numbers<[1], [0], [0], [1], [0, 0, 1, 1], [], []>} : vector<12x144xf32>, vector<144x1152xf32>, vector<12x1152xf32> -> vector<12x1152xf32>
    %c0_37 = arith.constant 0 : index
    %c0_38 = arith.constant 0 : index
    %32 = vector.load %arg3[%c0_37, %c0_38] : memref<1x1152xf32, #tpu.memory_space<vmem>>, vector<1x1152xf32>
    %33 = vector.broadcast %32 : vector<1x1152xf32> to vector<12x1152xf32>
    %34 = arith.addf %31, %33 : vector<12x1152xf32>
    %cst_39 = arith.constant 0.000000e+00 : f32
    %35 = vector.broadcast %cst_39 : f32 to vector<12x1152xf32>
    %36 = arith.maximumf %34, %35 : vector<12x1152xf32>
    %c0_40 = arith.constant 0 : index
    %c0_41 = arith.constant 0 : index
    %37 = vector.load %arg4[%c0_40, %c0_41] : memref<1152x576xf32, #tpu.memory_space<vmem>>, vector<1152x576xf32>
    %cst_42 = arith.constant dense<0.000000e+00> : vector<12x576xf32>
    %38 = tpu.matmul %36, %37, %cst_42 {dimension_numbers = #tpu.dot_dimension_numbers<[1], [0], [0], [1], [0, 0, 1, 1], [], []>} : vector<12x1152xf32>, vector<1152x576xf32>, vector<12x576xf32> -> vector<12x576xf32>
    %c0_43 = arith.constant 0 : index
    %c0_44 = arith.constant 0 : index
    %39 = vector.load %arg5[%c0_43, %c0_44] : memref<1x576xf32, #tpu.memory_space<vmem>>, vector<1x576xf32>
    %40 = vector.broadcast %39 : vector<1x576xf32> to vector<12x576xf32>
    %41 = arith.addf %38, %40 : vector<12x576xf32>
    %cst_45 = arith.constant 0.000000e+00 : f32
    %42 = vector.broadcast %cst_45 : f32 to vector<12x576xf32>
    %43 = arith.maximumf %41, %42 : vector<12x576xf32>
    %c0_46 = arith.constant 0 : index
    %c0_47 = arith.constant 0 : index
    %44 = vector.load %arg7[%c0_46, %c0_47] : memref<16x16xf32, #tpu.memory_space<vmem>>, vector<16x16xf32>
    %c0_48 = arith.constant 0 : index
    %c0_49 = arith.constant 0 : index
    %c0_50 = arith.constant 0 : index
    %45 = vector.load %arg6[%c0_48, %c0_49, %c0_50] : memref<5x576x16xf32, #tpu.memory_space<vmem>>, vector<1x576x16xf32>
    %46 = vector.shape_cast %45 : vector<1x576x16xf32> to vector<576x16xf32>
    %cst_51 = arith.constant dense<0.000000e+00> : vector<12x16xf32>
    %47 = tpu.matmul %43, %46, %cst_51 {dimension_numbers = #tpu.dot_dimension_numbers<[1], [0], [0], [1], [0, 0, 1, 1], [], []>} : vector<12x576xf32>, vector<576x16xf32>, vector<12x16xf32> -> vector<12x16xf32>
    %cst_52 = arith.constant 0.000000e+00 : f32
    %48 = vector.broadcast %cst_52 : f32 to vector<4x16xf32>
    %49 = tpu.concatenate %48, %47 in 0 : vector<4x16xf32>, vector<12x16xf32> -> vector<16x16xf32>
    %50 = arith.addf %44, %49 : vector<16x16xf32>
    %c1_53 = arith.constant 1 : index
    %c0_54 = arith.constant 0 : index
    %c0_55 = arith.constant 0 : index
    %51 = vector.load %arg6[%c1_53, %c0_54, %c0_55] : memref<5x576x16xf32, #tpu.memory_space<vmem>>, vector<1x576x16xf32>
    %52 = vector.shape_cast %51 : vector<1x576x16xf32> to vector<576x16xf32>
    %cst_56 = arith.constant dense<0.000000e+00> : vector<12x16xf32>
    %53 = tpu.matmul %43, %52, %cst_56 {dimension_numbers = #tpu.dot_dimension_numbers<[1], [0], [0], [1], [0, 0, 1, 1], [], []>} : vector<12x576xf32>, vector<576x16xf32>, vector<12x16xf32> -> vector<12x16xf32>
    %cst_57 = arith.constant 0.000000e+00 : f32
    %54 = vector.broadcast %cst_57 : f32 to vector<3x16xf32>
    %cst_58 = arith.constant 0.000000e+00 : f32
    %55 = vector.broadcast %cst_58 : f32 to vector<1x16xf32>
    %56 = tpu.concatenate %54, %53, %55 in 0 : vector<3x16xf32>, vector<12x16xf32>, vector<1x16xf32> -> vector<16x16xf32>
    %57 = arith.addf %50, %56 : vector<16x16xf32>
    %c2_59 = arith.constant 2 : index
    %c0_60 = arith.constant 0 : index
    %c0_61 = arith.constant 0 : index
    %58 = vector.load %arg6[%c2_59, %c0_60, %c0_61] : memref<5x576x16xf32, #tpu.memory_space<vmem>>, vector<1x576x16xf32>
    %59 = vector.shape_cast %58 : vector<1x576x16xf32> to vector<576x16xf32>
    %cst_62 = arith.constant dense<0.000000e+00> : vector<12x16xf32>
    %60 = tpu.matmul %43, %59, %cst_62 {dimension_numbers = #tpu.dot_dimension_numbers<[1], [0], [0], [1], [0, 0, 1, 1], [], []>} : vector<12x576xf32>, vector<576x16xf32>, vector<12x16xf32> -> vector<12x16xf32>
    %cst_63 = arith.constant 0.000000e+00 : f32
    %61 = vector.broadcast %cst_63 : f32 to vector<2x16xf32>
    %cst_64 = arith.constant 0.000000e+00 : f32
    %62 = vector.broadcast %cst_64 : f32 to vector<2x16xf32>
    %63 = tpu.concatenate %61, %60, %62 in 0 : vector<2x16xf32>, vector<12x16xf32>, vector<2x16xf32> -> vector<16x16xf32>
    %64 = arith.addf %57, %63 : vector<16x16xf32>
    %c3_65 = arith.constant 3 : index
    %c0_66 = arith.constant 0 : index
    %c0_67 = arith.constant 0 : index
    %65 = vector.load %arg6[%c3_65, %c0_66, %c0_67] : memref<5x576x16xf32, #tpu.memory_space<vmem>>, vector<1x576x16xf32>
    %66 = vector.shape_cast %65 : vector<1x576x16xf32> to vector<576x16xf32>
    %cst_68 = arith.constant dense<0.000000e+00> : vector<12x16xf32>
    %67 = tpu.matmul %43, %66, %cst_68 {dimension_numbers = #tpu.dot_dimension_numbers<[1], [0], [0], [1], [0, 0, 1, 1], [], []>} : vector<12x576xf32>, vector<576x16xf32>, vector<12x16xf32> -> vector<12x16xf32>
    %cst_69 = arith.constant 0.000000e+00 : f32
    %68 = vector.broadcast %cst_69 : f32 to vector<1x16xf32>
    %cst_70 = arith.constant 0.000000e+00 : f32
    %69 = vector.broadcast %cst_70 : f32 to vector<3x16xf32>
    %70 = tpu.concatenate %68, %67, %69 in 0 : vector<1x16xf32>, vector<12x16xf32>, vector<3x16xf32> -> vector<16x16xf32>
    %71 = arith.addf %64, %70 : vector<16x16xf32>
    %c4_71 = arith.constant 4 : index
    %c0_72 = arith.constant 0 : index
    %c0_73 = arith.constant 0 : index
    %72 = vector.load %arg6[%c4_71, %c0_72, %c0_73] : memref<5x576x16xf32, #tpu.memory_space<vmem>>, vector<1x576x16xf32>
    %73 = vector.shape_cast %72 : vector<1x576x16xf32> to vector<576x16xf32>
    %cst_74 = arith.constant dense<0.000000e+00> : vector<12x16xf32>
    %74 = tpu.matmul %43, %73, %cst_74 {dimension_numbers = #tpu.dot_dimension_numbers<[1], [0], [0], [1], [0, 0, 1, 1], [], []>} : vector<12x576xf32>, vector<576x16xf32>, vector<12x16xf32> -> vector<12x16xf32>
    %cst_75 = arith.constant 0.000000e+00 : f32
    %75 = vector.broadcast %cst_75 : f32 to vector<4x16xf32>
    %76 = tpu.concatenate %74, %75 in 0 : vector<12x16xf32>, vector<4x16xf32> -> vector<16x16xf32>
    %77 = arith.addf %71, %76 : vector<16x16xf32>
    %c0_76 = arith.constant 0 : index
    %c0_77 = arith.constant 0 : index
    %c0_78 = arith.constant 0 : index
    %78 = vector.load %arg8[%c0_76, %c0_77, %c0_78] : memref<1x16x16xf32, #tpu.memory_space<vmem>>, vector<1x16x16xf32>
    %79 = vector.shape_cast %78 : vector<1x16x16xf32> to vector<16x16xf32>
    %80 = vector.shape_cast %77 : vector<16x16xf32> to vector<1x16x16xf32>
    tpu.vector_store %arg8[%c0_76, %c0_77, %c0_78], %80 {strides = array<i32>} : memref<1x16x16xf32, #tpu.memory_space<vmem>>, vector<1x16x16xf32>,
    return
  }
  func.func @transform_0(%arg0: i32) -> (i32, i32, i32) {
    %c0_i32 = arith.constant 0 : i32
    %c0_i32_0 = arith.constant 0 : i32
    %c0_i32_1 = arith.constant 0 : i32
    return %arg0, %c0_i32, %c0_i32_0 : i32, i32, i32
  }
  func.func @transform_1(%arg0: i32) -> (i32, i32) {
    %c0_i32 = arith.constant 0 : i32
    %c0_i32_0 = arith.constant 0 : i32
    %c0_i32_1 = arith.constant 0 : i32
    return %c0_i32, %c0_i32_0 : i32, i32
  }
  func.func @transform_2(%arg0: i32) -> (i32, i32) {
    %c0_i32 = arith.constant 0 : i32
    %c0_i32_0 = arith.constant 0 : i32
    %c0_i32_1 = arith.constant 0 : i32
    return %c0_i32, %c0_i32_0 : i32, i32
  }
  func.func @transform_3(%arg0: i32) -> (i32, i32) {
    %c0_i32 = arith.constant 0 : i32
    %c0_i32_0 = arith.constant 0 : i32
    %c0_i32_1 = arith.constant 0 : i32
    return %c0_i32, %c0_i32_0 : i32, i32
  }
  func.func @transform_4(%arg0: i32) -> (i32, i32) {
    %c0_i32 = arith.constant 0 : i32
    %c0_i32_0 = arith.constant 0 : i32
    %c0_i32_1 = arith.constant 0 : i32
    return %c0_i32, %c0_i32_0 : i32, i32
  }
  func.func @transform_5(%arg0: i32) -> (i32, i32, i32) {
    %c0_i32 = arith.constant 0 : i32
    %c0_i32_0 = arith.constant 0 : i32
    %c0_i32_1 = arith.constant 0 : i32
    %c0_i32_2 = arith.constant 0 : i32
    return %c0_i32, %c0_i32_0, %c0_i32_1 : i32, i32, i32
  }
  func.func @transform_6(%arg0: i32) -> (i32, i32) {
    %c0_i32 = arith.constant 0 : i32
    %c0_i32_0 = arith.constant 0 : i32
    %c0_i32_1 = arith.constant 0 : i32
    return %c0_i32, %c0_i32_0 : i32, i32
  }
  func.func @transform_7(%arg0: i32) -> (i32, i32, i32) {
    %c0_i32 = arith.constant 0 : i32
    %c0_i32_0 = arith.constant 0 : i32
    %c0_i32_1 = arith.constant 0 : i32
    return %arg0, %c0_i32, %c0_i32_0 : i32, i32, i32
  }
}

</mosaic_0001>

<bundles_post_ra>
// kernel: cnn_forward.1
= control target key start
LH: loop header
LB: loop body
LE: loop exit
PB: predicated region body
PF: predicated region fallthrough
CT: control target
= control target key end

     0   :  { %12 = vsyncpa [#allocation4], 0  ;;  %s11369_s0 = inlined_call_operand.vmem [shape: f32[2,16,16], index: 0, kind: input, shape index: {}]   ;;  %s11370_s1 = inlined_call_operand.vmem [shape: f32[144,1152], index: 1, kind: input, shape index: {}]   ;;  %s11371_s2 = inlined_call_operand.vmem [shape: f32[1,1152], index: 2, kind: input, shape index: {}]   ;;  %s11372_s3 = inlined_call_operand.vmem [shape: f32[1152,576], index: 3, kind: input, shape index: {}]   ;;  %s11373_s4 = inlined_call_operand.vmem [shape: f32[1,576], index: 4, kind: input, shape index: {}]   ;;  %s11374_s5 = inlined_call_operand.vmem [shape: f32[5,576,16], index: 5, kind: input, shape index: {}]   ;;  %s11375_s6 = inlined_call_operand.vmem [shape: f32[16,16], index: 6, kind: input, shape index: {}]   ;;  %s11376_s7 = inlined_call_operand.hbm [shape: f32[2,16,16], index: 7, kind: output, shape index: {}]  }
   0x1   :  { %14 = vsyncpa [#allocation4 + $0x1], 0  ;;  %s7121_s24 = smov 0   ;;  %s7123_s25 = smov 0  }
   0x2   :  { %s7125_s26 = smov 0   ;;  %s7127_s27 = smov 0  }
   0x3 LB: > { %s7142_s28 = sadd.s32 4294967295, %s7067_s27   ;;  %s4554_s29 = sadd.s32 4294967294, %s7067_s27   ;;  %s7067_s27 = sphi %s7127_s27, %s11392_s27   ;;  %s7063_s26 = sphi %s7125_s26, %s11391_s26   ;;  %s7059_s25 = sphi %s7123_s25, %s11390_s25   ;;  %s7055_s24 = sphi %s7121_s24, %s11389_s24  }
   0x4   : > { %s7146_s30 = sadd.s32 1, %s7067_s27   ;;  %s179_s8 = sadd.s32 1, %s7063_s26 }
   0x5   : > { %s176_s9 = ssub.s32 %s7067_s27, %s7146_s30  ;;  %p189_p0 = scmp.ne.s32.totalorder %s7063_s26, %s7059_s25 }
   0x6   : > { %p177_p1 = scmp.eq.s32.totalorder %s176_s9, 0  ;;  %p190_p2 = scmp.eq.s32.totalorder %s7142_s28, 1 }
   0x7   : > { %p195_p3 = scmp.ne.s32.totalorder %s7059_s25, %s7055_s24  ;;  %p196_p4 = scmp.eq.s32.totalorder %s4554_s29, 1 }
   0x8   : > { %s7157_s10 = scalar_select %p177_p1, %s7063_s26, %s179_s8  }
   0x9   : > { %p7159_p5 = por %p190_p2, %p189_p0  ;;  %p7163_p6 = por %p196_p4, %p195_p3 }
   0xa   : > { %p4557_p7 = scmp.ge.s32.totalorder %s7067_s27, 1  ;;  %p240_p8 = scmp.lt.s32.totalorder %s7067_s27, 3 }
   0xc   : > { %p241_p9 = pnand %p4557_p7, %p240_p8 }
   0xd   : > { %p272_p10 = scmp.lt.s32.totalorder (!%p241_p9), %s7142_s28, 1  ;;  %v408_v0 = vld [vmem:[%s11370_s1 + $0x8] sm:$0xff] (!%p241_p9)  ;;  %v417_v1 = vld [vmem:[%s11370_s1 + $0x50] sm:$0xff] (!%p241_p9)  ;;  %v410_v2 = vld [vmem:[%s11370_s1 + $0x18] sm:$0xff] (!%p241_p9)  ;;  %v7069_v12 = vmov (!%p241_p9), 0.0   ;;  %vm278_vm0 = vcmask (!%p241_p9), 130048  }
   0xe   : > { %244 = sbr.rel (%p241_p9) target bundleno = 1323 (0x52b), region = 48  ;;  %v5607_v3 = vpack.c.bf16 (!%p241_p9), %v417_v1, %v408_v0  ;;  %v419_v4 = vld [vmem:[%s11370_s1 + $0x60] sm:$0xff] (!%p241_p9)  ;;  %v416_v6 = vld [vmem:[%s11370_s1 + $0x48] sm:$0xff] (!%p241_p9)  ;;  %v409_v9 = vld [vmem:[%s11370_s1 + $0x10] sm:$0xff] (!%p241_p9)  ;;  %277 = vst [vmem:[#allocation2] sm:$0xff] (!%p241_p9), %v7069_v12  ;;  %vm293_vm1 = vcmask (!%p241_p9), 130050  }
   0xf   : > { %v407_v5 = vld [vmem:[%s11370_s1] sm:$0xff] (!%p241_p9)  ;;  %v5643_v7 = vpack.c.bf16 (!%p241_p9), %v419_v4, %v410_v2  ;;  %v418_v10 = vld [vmem:[%s11370_s1 + $0x58] sm:$0xff] (!%p241_p9)  ;;  %280 = vst [vmem:[#allocation2 + $0x10] sm:$0xf] (!%p241_p9), %v7069_v12  ;;  %v428_v15 = vld [vmem:[%s11370_s1 + $0xa8] sm:$0xff] (!%p241_p9)  ;;  %s11381_s14 = smov (!%p241_p9), 48  }
  0x10   : > { %v5609_v8 = vpack.c.bf16 (!%p241_p9), %v416_v6, %v407_v5  ;;  %v426_v11 = vld [vmem:[%s11370_s1 + $0x98] sm:$0xff] (!%p241_p9)  ;;  %5608 = vmatprep.subr.bf16.mxu0 (!%p241_p9), %v5607_v3  ;;  %v5645_v13 = vpack.c.bf16 (!%p241_p9), %v418_v10, %v409_v9  ;;  %v435_v14 = vld [vmem:[%s11370_s1 + $0xe0] sm:$0xff] (!%p241_p9)  ;;  %v437_v16 = vld [vmem:[%s11370_s1 + $0xf0] sm:$0xff] (!%p241_p9)  ;;  %279 = vst.msk [vmem:[#allocation2 + $0x8] sm:$0xff] (!%p241_p9), %vm278_vm0, %v7069_v12  ;;  %vm281_vm2 = vcmask (!%p241_p9), 125952   ;;  %s7072_s17 = smov (!%p241_p9), 16  }
  0x11   : > { %5644 = vmatprep.subr.bf16.mxu1 (!%p241_p9), %v5643_v7  ;;  %v5611_v17 = vpack.c.bf16 (!%p241_p9), %v435_v14, %v426_v11  ;;  %v5647_v18 = vpack.c.bf16 (!%p241_p9), %v437_v16, %v428_v15  ;;  %v425_v19 = vld [vmem:[%s11370_s1 + $0x90] sm:$0xff] (!%p241_p9)  ;;  %v434_v20 = vld [vmem:[%s11370_s1 + $0xd8] sm:$0xff] (!%p241_p9)  ;;  %v427_v21 = vld [vmem:[%s11370_s1 + $0xa0] sm:$0xff] (!%p241_p9)  ;;  %282 = vst.msk [vmem:[#allocation2 + $0x18] sm:$0xf] (!%p241_p9), %vm281_vm2, %v7069_v12  ;;  %s11377_s18 = smov (!%p241_p9), 64  }
  0x12   : > { %5610 = vmatpush1.bf16.msra.mxu0 (!%p241_p9), %v5609_v8  ;;  %5646 = vmatpush1.bf16.msra.mxu1 (!%p241_p9), %v5645_v13  ;;  %v5613_v22 = vpack.c.bf16 (!%p241_p9), %v434_v20, %v425_v19  ;;  %v436_v23 = vld [vmem:[%s11370_s1 + $0xe8] sm:$0xff] (!%p241_p9)  ;;  %v453_v25 = vld [vmem:[%s11370_s1 + $0x170] sm:$0xff] (!%p241_p9)  ;;  %v446_v34 = vld [vmem:[%s11370_s1 + $0x138] sm:$0xff] (!%p241_p9)  ;;  %vm300_vm3 = vcmask (!%p241_p9), 1040384   ;;  %s11379_s21 = smov (!%p241_p9), 80   ;;  %s11378_s22 = smov (!%p241_p9), 96  }
  0x13   : > { %v444_v24 = vld [vmem:[%s11370_s1 + $0x128] sm:$0xff] (!%p241_p9)  ;;  %5612 = vmatprep.subr.bf16.mxu0 (!%p241_p9), %v5611_v17  ;;  %5648 = vmatprep.subr.bf16.mxu1 (!%p241_p9), %v5647_v18  ;;  %v5649_v28 = vpack.c.bf16 (!%p241_p9), %v436_v23, %v427_v21  ;;  %v455_v37 = vld [vmem:[%s11370_s1 + $0x180] sm:$0xff] (!%p241_p9)  ;;  %v445_v42 = vld [vmem:[%s11370_s1 + $0x130] sm:$0xff] (!%p241_p9)  ;;  %vm401_vm4 = vcmask (!%p241_p9), 123904   ;;  %s11385_s20 = smov (!%p241_p9), 64   ;;  %vm287_vm5 = vcmask (!%p241_p9), 1041408  }
  0x14   : > { %v5615_v29 = vpack.c.bf16 (!%p241_p9), %v453_v25, %v444_v24  ;;  %v443_v38 = vld [vmem:[%s11370_s1 + $0x120] sm:$0xff] (!%p241_p9)  ;;  %v5651_v40 = vpack.c.bf16 (!%p241_p9), %v455_v37, %v446_v34  ;;  %v452_v41 = vld [vmem:[%s11370_s1 + $0x168] sm:$0xff] (!%p241_p9)  ;;  %v454_v43 = vld [vmem:[%s11370_s1 + $0x178] sm:$0xff] (!%p241_p9)  ;;  %s11387_s9 = smov (!%p241_p9), 96   ;;  %vm310_vm6 = vcmask (!%p241_p9), 261249   ;;  %vm324_vm7 = vcmask (!%p241_p9), 392448  }
  0x15   : > { %s273_s8 = scalar_select %p272_p10, %s7142_s28, 1  ;;  %v5617_v44 = vpack.c.bf16 %v452_v41, %v443_v38  ;;  %v5653_v45 = vpack.c.bf16 %v454_v43, %v445_v42  ;;  %v462_v46 = vld [vmem:[%s11370_s1 + $0x1b8] sm:$0xff]  ;;  %v471_v47 = vld [vmem:[%s11370_s1 + $0x200] sm:$0xff]  ;;  %v464_v48 = vld [vmem:[%s11370_s1 + $0x1c8] sm:$0xff]  ;;  %vm338_vm8 = vcmask 523648   ;;  %vm352_vm9 = vcmask 654848  }
  0x16   : > { %5614 = vmatpush1.bf16.msra.mxu0 %v5613_v22  ;;  %5650 = vmatpush1.bf16.msra.mxu1 %v5649_v28  ;;  %v5619_v50 = vpack.c.bf16 %v471_v47, %v462_v46  ;;  %v473_v51 = vld [vmem:[%s11370_s1 + $0x210] sm:$0xff]  ;;  %v470_v53 = vld [vmem:[%s11370_s1 + $0x1f8] sm:$0xff]  ;;  %v463_v55 = vld [vmem:[%s11370_s1 + $0x1c0] sm:$0xff]  ;;  %vm366_vm10 = vcmask 786048   ;;  %vm380_vm11 = vcmask 917248   ;;  %vm394_vm12 = vcmask 1048448  }
  0x17   : > { %s4875_s29 = sshll.u32 %s273_s8, 4  ;;  %5616 = vmatprep.subr.bf16.mxu0 %v5615_v29  ;;  %5652 = vmatprep.subr.bf16.mxu1 %v5651_v40  ;;  %v461_v52 = vld [vmem:[%s11370_s1 + $0x1b0] sm:$0xff]  ;;  %v5655_v54 = vpack.c.bf16 %v473_v51, %v464_v48  ;;  %v472_v56 = vld [vmem:[%s11370_s1 + $0x208] sm:$0xff]  ;;  %v482_v62 = vld [vmem:[%s11370_s1 + $0x258] sm:$0xff]  ;;  %vm312_vm13 = vcmask 257152   ;;  %vm326_vm14 = vcmask 388352  }
  0x18   : > { %s7223_s8 = scalar_lea.vmem %s11369_s0, %s4875_s29  ;;  %s7070_s29 = smov 32   ;;  %v5621_v58 = vpack.c.bf16 %v470_v53, %v461_v52  ;;  %v5657_v59 = vpack.c.bf16 %v472_v56, %v463_v55  ;;  %v480_v60 = vld [vmem:[%s11370_s1 + $0x248] sm:$0xff]  ;;  %v489_v61 = vld [vmem:[%s11370_s1 + $0x290] sm:$0xff]  ;;  %v491_v0 = vld [vmem:[%s11370_s1 + $0x2a0] sm:$0xff]  ;;  %vm340_vm15 = vcmask 519552  }
  0x19   : > { %v7235_v26 = vld [vmem:[%s7223_s8] sm:$0xff]  ;;  %v297_v33 = vld [vmem:[%s7223_s8 + $0x8] sm:$0x7]  ;;  %v5623_v63 = vpack.c.bf16 %v489_v61, %v480_v60  ;;  %v5659_v5 = vpack.c.bf16 %v491_v0, %v482_v62  ;;  %v481_v6 = vld [vmem:[%s11370_s1 + $0x250] sm:$0xff]  ;;  %s7078_s15 = smov [#allocation3]  }
  0x1a   : > { %v328_v27 = vld [vmem:[%s7223_s8 + $0x1] sm:$0xff]  ;;  %318 = vrot.lane.b32.xlu0 %v7235_v26, %s7070_s29  ;;  %v301_v30 = vrot.slane %v7235_v26, 7  ;;  %v288_v31 = vrot.slane %v7235_v26, 6  ;;  %v302_v39 = vrot.slane %v297_v33, 7  ;;  %5618 = vmatpush1.bf16.msra.mxu0 %v5617_v44  ;;  %v329_v4 = vld [vmem:[%s7223_s8 + $0x9] sm:$0xf] }
  0x1b   : > { %332 = vrot.lane.b32.xlu1 %v328_v27, %s11381_s14  ;;  %v342_v32 = vld [vmem:[%s7223_s8 + $0x2] sm:$0xff]  ;;  %5654 = vmatpush1.bf16.msra.mxu1 %v5653_v45  ;;  %v490_v7 = vld [vmem:[%s11370_s1 + $0x298] sm:$0xff]  ;;  %v509_v14 = vld [vmem:[%s11370_s1 + $0x330] sm:$0xff] }
  0x1c   : > { %294 = vst.msk [vmem:[#allocation2] sm:$0xfc] %vm293_vm1, %v288_v31  ;;  %v356_v35 = vld [vmem:[%s7223_s8 + $0x3] sm:$0xff]  ;;  %v303_v57 = vsel %vm300_vm3, %v301_v30, %v302_v39  ;;  %5620 = vmatprep.subr.bf16.mxu0 %v5619_v50  ;;  %5656 = vmatprep.subr.bf16.mxu1 %v5655_v54  ;;  %v498_v8 = vld [vmem:[%s11370_s1 + $0x2d8] sm:$0xff]  ;;  %v5661_v13 = vpack.c.bf16 %v490_v7, %v481_v6  ;;  %v497_v15 = vld [vmem:[%s11370_s1 + $0x2d0] sm:$0xff]  ;;  %vm354_vm1 = vcmask 650752  }
  0x1d   : > { %v370_v36 = vld [vmem:[%s7223_s8 + $0x4] sm:$0xff]  ;;  %v506_v16 = vld [vmem:[%s11370_s1 + $0x318] sm:$0xff]  ;;  %v525_v22 = vld [vmem:[%s11370_s1 + $0x3b0] sm:$0xff] }
  0x1e   : > { %304 = vrot.lane.b32.xlu0 %v301_v30, %s7072_s17  ;;  %v384_v49 = vld [vmem:[%s7223_s8 + $0x5] sm:$0xff]  ;;  %5622 = vmatpush1.bf16.msra.mxu0 %v5621_v58  ;;  %v518_v23 = vld [vmem:[%s11370_s1 + $0x378] sm:$0xff]  ;;  %v5629_v28 = vpack.c.bf16 %v506_v16, %v497_v15  ;;  %v545_v41 = vld [vmem:[%s11370_s1 + $0x450] sm:$0xff] }
  0x1f   : > { %346 = vrot.lane.b32.xlu1 %v342_v32, %s11377_s18  ;;  %v479_v1 = vld [vmem:[%s11370_s1 + $0x240] sm:$0xff]  ;;  %v488_v2 = vld [vmem:[%s11370_s1 + $0x288] sm:$0xff]  ;;  %5658 = vmatpush1.bf16.msra.mxu1 %v5657_v59  ;;  %v534_v37 = vld [vmem:[%s11370_s1 + $0x3f8] sm:$0xff]  ;;  %s11388_s18 = smov 112  }
  0x20   : > { %v315_v3 = vld [vmem:[%s7223_s8 + $0x8] sm:$0xf]  ;;  %v507_v9 = vld [vmem:[%s11370_s1 + $0x320] sm:$0xff]  ;;  %v5625_v11 = vpack.c.bf16 %v488_v2, %v479_v1  ;;  %5624 = vmatprep.subr.bf16.mxu0 %v5623_v63  ;;  %5660 = vmatprep.subr.bf16.mxu1 %v5659_v5  ;;  %v371_v38 = vld [vmem:[%s7223_s8 + $0xc] sm:$0xf] }
  0x21   : > { %v500_v10 = vld [vmem:[%s11370_s1 + $0x2e8] sm:$0xff]  ;;  %v5627_v17 = vpack.c.bf16 %v507_v9, %v498_v8  ;;  %v499_v19 = vld [vmem:[%s11370_s1 + $0x2e0] sm:$0xff]  ;;  %v533_v46 = vld [vmem:[%s11370_s1 + $0x3f0] sm:$0xff] }
  0x22   : > { %360 = vrot.lane.b32.xlu0 %v356_v35, %s11379_s21  ;;  %s11380_s21 = smov 112   ;;  %v5663_v18 = vpack.c.bf16 %v509_v14, %v500_v10  ;;  %v508_v20 = vld [vmem:[%s11370_s1 + $0x328] sm:$0xff]  ;;  %v527_v24 = vld [vmem:[%s11370_s1 + $0x3c0] sm:$0xff]  ;;  %5626 = vmatpush1.bf16.msra.mxu0 %v5625_v11  ;;  %v517_v35 = vld [vmem:[%s11370_s1 + $0x370] sm:$0xff] }
  0x23   : > { %374 = vrot.lane.b32.xlu1 %v370_v36, %s11378_s22  ;;  %v516_v21 = vld [vmem:[%s11370_s1 + $0x368] sm:$0xff]  ;;  %s11384_s22 = smov 48   ;;  %5662 = vmatpush1.bf16.msra.mxu1 %v5661_v13  ;;  %v5665_v29 = vpack.c.bf16 %v508_v20, %v499_v19  ;;  %v515_v30 = vld [vmem:[%s11370_s1 + $0x360] sm:$0xff]  ;;  %v5667_v34 = vpack.c.bf16 %v527_v24, %v518_v23  ;;  %v526_v36 = vld [vmem:[%s11370_s1 + $0x3b8] sm:$0xff] }
  0x24   : > { %v343_v25 = vld [vmem:[%s7223_s8 + $0xa] sm:$0xf]  ;;  %5628 = vmatprep.subr.bf16.mxu0 %v5627_v17  ;;  %5664 = vmatprep.subr.bf16.mxu1 %v5663_v18  ;;  %v5631_v33 = vpack.c.bf16 %v525_v22, %v516_v21  ;;  %v543_v39 = vld [vmem:[%s11370_s1 + $0x440] sm:$0xff]  ;;  %v399_v43 = vld [vmem:[%s7223_s8 + $0xe] sm:$0x3]  ;;  %v5669_v45 = vpack.c.bf16 %v526_v36, %v517_v35 }
  0x25   : > { %v357_v27 = vld [vmem:[%s7223_s8 + $0xb] sm:$0xf]  ;;  %v542_v47 = vld [vmem:[%s11370_s1 + $0x438] sm:$0xff]  ;;  %402 = vst.msk [vmem:[#allocation2 + $0x18] sm:$0x3] %vm401_vm4, %v399_v43  ;;  %v535_v51 = vld [vmem:[%s11370_s1 + $0x400] sm:$0xff] }
  0x26   : > { %388 = vrot.lane.b32.xlu0 %v384_v49, %s11380_s21  ;;  %v524_v32 = vld [vmem:[%s11370_s1 + $0x3a8] sm:$0xff]  ;;  %5630 = vmatpush1.bf16.msra.mxu0 %v5629_v28  ;;  %v5635_v49 = vpack.c.bf16 %v543_v39, %v534_v37  ;;  %v561_v55 = vld [vmem:[%s11370_s1 + $0x4d0] sm:$0xff]  ;;  %v554_v56 = vld [vmem:[%s11370_s1 + $0x498] sm:$0xff]  ;;  %v5637_v60 = vpack.c.bf16 %v542_v47, %v533_v46  ;;  %vm382_vm4 = vcmask 913152   ;;  %s4876_s21 = sshll.u32 %s7142_s28, 8 }
  0x27   : > { %306 = vrot.lane.b32.xlu1 %v303_v57, %s7072_s17  ;;  %v536_v40 = vld [vmem:[%s11370_s1 + $0x408] sm:$0xff]  ;;  %5666 = vmatpush1.bf16.msra.mxu1 %v5665_v29  ;;  %v5633_v44 = vpack.c.bf16 %v524_v32, %v515_v30  ;;  %v563_v57 = vld [vmem:[%s11370_s1 + $0x4e0] sm:$0xff]  ;;  %v562_v1 = vld [vmem:[%s11370_s1 + $0x4d8] sm:$0xff]  ;;  %s11322_s13 = scalar_lea.hbm %s11376_s7, %s4876_s21 }
  0x28   : > { %v385_v42 = vld [vmem:[%s7223_s8 + $0xd] sm:$0x7]  ;;  %v284_v48 = vld [vmem:[%s7223_s8 + $0x8] sm:$0x3]  ;;  %5632 = vmatprep.subr.bf16.mxu0 %v5631_v33  ;;  %5668 = vmatprep.subr.bf16.mxu1 %v5667_v34  ;;  %v5671_v50 = vpack.c.bf16 %v545_v41, %v536_v40  ;;  %v551_v62 = vld [vmem:[%s11370_s1 + $0x480] sm:$0xff]  ;;  %v5675_v0 = vpack.c.bf16 %v563_v57, %v554_v56 }
  0x29   : > { %v544_v52 = vld [vmem:[%s11370_s1 + $0x448] sm:$0xff]  ;;  %v289_v53 = vrot.slane %v284_v48, 6  ;;  %v423_v5 = vld [vmem:[%s11370_s1 + $0x80] sm:$0xff]  ;;  %v413_v22 = vld [vmem:[%s11370_s1 + $0x30] sm:$0xff] }
  0x2a   : > { %320 = vrot.lane.b32.xlu0 %v315_v3, %s7070_s29  ;;  %s11386_s29 = smov 80   ;;  %v552_v54 = vld [vmem:[%s11370_s1 + $0x488] sm:$0xff]  ;;  %5634 = vmatpush1.bf16.msra.mxu0 %v5633_v44  ;;  %v5673_v61 = vpack.c.bf16 %v544_v52, %v535_v51  ;;  %v421_v3 = vld [vmem:[%s11370_s1 + $0x70] sm:$0xff]  ;;  %v411_v20 = vld [vmem:[%s11370_s1 + $0x20] sm:$0xff] }
  0x2b   : > { %334 = vrot.lane.b32.xlu1 %v329_v4, %s11384_s22  ;;  %v290_v58 = vsel %vm287_vm5, %v288_v31, %v289_v53  ;;  %v398_v59 = vld [vmem:[%s7223_s8 + $0x6] sm:$0xff]  ;;  %5670 = vmatpush1.bf16.msra.mxu1 %v5669_v45  ;;  %v5639_v63 = vpack.c.bf16 %v561_v55, %v552_v54  ;;  %v553_v31 = vld [vmem:[%s11370_s1 + $0x490] sm:$0xff]  ;;  %v414_v4 = vld [vmem:[%s11370_s1 + $0x38] sm:$0xff]  ;;  %s7009_s8 = sshll.u32 %s7078_s15, 4  ;;  %s7010_s8 = int_to_ptr.vmem [resolvable:$false] %s7009_s8 }
  0x2c   : > { %295 = vst.msk [vmem:[#allocation2 + $0x10] sm:$0xf] %vm281_vm2, %v290_v58  ;;  %5636 = vmatprep.subr.bf16.mxu0 %v5635_v49  ;;  %5672 = vmatprep.subr.bf16.mxu1 %v5671_v50  ;;  %v560_v26 = vld [vmem:[%s11370_s1 + $0x4c8] sm:$0xff]  ;;  %v5677_v7 = vpack.c.bf16 %v562_v1, %v553_v31  ;;  %v5715_v9 = vpack.c.bf16 %v423_v5, %v414_v4  ;;  %v422_v23 = vld [vmem:[%s11370_s1 + $0x78] sm:$0xff]  ;;  %v439_v28 = vld [vmem:[%s11370_s1 + $0x100] sm:$0xff]  ;;  %vm368_vm2 = vcmask 781952  }
  0x2d   : > { %400 = vst.msk [vmem:[#allocation2 + $0x8] sm:$0xff] %vm278_vm0, %v398_v59  ;;  %v412_v2 = vld [vmem:[%s11370_s1 + $0x28] sm:$0xff]  ;;  %v5641_v6 = vpack.c.bf16 %v560_v26, %v551_v62  ;;  %v430_v24 = vld [vmem:[%s11370_s1 + $0xb8] sm:$0xff]  ;;  %v441_v30 = vld [vmem:[%s11370_s1 + $0x110] sm:$0xff]  ;;  %v5717_v33 = vpack.c.bf16 %v422_v23, %v413_v22  ;;  %s7011_s16 = scalar_lea.vmem %s7010_s8, 512 }
  0x2e   : > { %348 = vrot.lane.b32.xlu0 %v343_v25, %s11385_s20  ;;  %5638 = vmatpush1.bf16.msra.mxu0 %v5637_v60  ;;  %v5679_v8 = vpack.c.bf16 %v421_v3, %v412_v2  ;;  %v420_v21 = vld [vmem:[%s11370_s1 + $0x68] sm:$0xff]  ;;  %v429_v34 = vld [vmem:[%s11370_s1 + $0xb0] sm:$0xff]  ;;  %v438_v35 = vld [vmem:[%s11370_s1 + $0xf8] sm:$0xff]  ;;  %v5683_v37 = vpack.c.bf16 %v439_v28, %v430_v24 }
  0x2f   : > { %362 = vrot.lane.b32.xlu1 %v357_v27, %s11386_s29  ;;  %5674 = vmatpush1.bf16.msra.mxu1 %v5673_v61  ;;  %v432_v29 = vld [vmem:[%s11370_s1 + $0xc8] sm:$0xff]  ;;  %v5681_v32 = vpack.c.bf16 %v420_v21, %v411_v20  ;;  %v431_v36 = vld [vmem:[%s11370_s1 + $0xc0] sm:$0xff]  ;;  %v457_v41 = vld [vmem:[%s11370_s1 + $0x190] sm:$0xff]  ;;  %v5685_v48 = vpack.c.bf16 %v438_v35, %v429_v34  ;;  %s269_s29 = sand.u32 1, %s7059_s25  }
  0x30   : > { %5640 = vmatprep.subr.bf16.mxu0 %v5639_v63  ;;  %5676 = vmatprep.subr.bf16.mxu1 %v5675_v0  ;;  %v440_v39 = vld [vmem:[%s11370_s1 + $0x108] sm:$0xff]  ;;  %v450_v45 = vld [vmem:[%s11370_s1 + $0x158] sm:$0xff]  ;;  %v459_v46 = vld [vmem:[%s11370_s1 + $0x1a0] sm:$0xff]  ;;  %s4558_s14 = sshll.u32 %s269_s29, 4  ;;  %s11328_s28 = scalar_lea.sflag [#allocation4], %s269_s29 }
  0x31   : > { %v448_v40 = vld [vmem:[%s11370_s1 + $0x148] sm:$0xff]  ;;  %v7513_v47 = vld [vmem:[#allocation2 + $0x18] sm:$0xf]  ;;  %v5721_v49 = vpack.c.bf16 %v440_v39, %v431_v36  ;;  %v447_v50 = vld [vmem:[%s11370_s1 + $0x140] sm:$0xff]  ;;  %v5723_v53 = vpack.c.bf16 %v459_v46, %v450_v45  ;;  %s271_s23 = scalar_lea.vmem [#allocation3], %s4558_s14 }
  0x32   : > { %376 = vrot.lane.b32.xlu0 %v371_v38, %s11387_s9  ;;  %5642 = vmatpush1.bf16.msra.mxu0 %v5641_v6  ;;  %v5719_v38 = vpack.c.bf16 %v441_v30, %v432_v29  ;;  %v456_v51 = vld [vmem:[%s11370_s1 + $0x188] sm:$0xff]  ;;  %v5687_v52 = vpack.c.bf16 %v457_v41, %v448_v40  ;;  %v449_v54 = vld [vmem:[%s11370_s1 + $0x150] sm:$0xff]  ;;  %v458_v55 = vld [vmem:[%s11370_s1 + $0x198] sm:$0xff]  ;;  %s4492_s9 = sshll.u32 %s271_s23, 4  ;;  %s11324_s9 = int_to_ptr.vmem [resolvable:$true] %s4492_s9 }
  0x33   : > { %390 = vrot.lane.b32.xlu1 %v385_v42, %s11388_s18  ;;  %5678 = vmatpush1.bf16.msra.mxu1 %v5677_v7  ;;  %v466_v56 = vld [vmem:[%s11370_s1 + $0x1d8] sm:$0xff]  ;;  %v475_v59 = vld [vmem:[%s11370_s1 + $0x220] sm:$0xff]  ;;  %v468_v60 = vld [vmem:[%s11370_s1 + $0x1e8] sm:$0xff]  ;;  %v5689_v62 = vpack.c.bf16 %v456_v51, %v447_v50  ;;  %v5725_v63 = vpack.c.bf16 %v458_v55, %v449_v54  ;;  %s7005_s22 = scalar_lea.vmem %s11324_s9, 256  ;;  %p7012_p0 = scmp.lt.s32.totalorder %s11324_s9, %s7010_s8 }
  0x34   : > { %v7454_v10 = vld [vmem:[#allocation2 + $0x8] sm:$0xff]  ;;  %5680 = vmatprep.subr.bf16.mxu0 %v5679_v8  ;;  %5716 = vmatprep.subr.bf16.mxu1 %v5715_v9  ;;  %v477_v61 = vld [vmem:[%s11370_s1 + $0x230] sm:$0xff]  ;;  %v5691_v26 = vpack.c.bf16 %v475_v59, %v466_v56  ;;  %v474_v1 = vld [vmem:[%s11370_s1 + $0x218] sm:$0xff]  ;;  %p7006_p11 = scmp.ne.s32.totalorder %s11324_s9, %s7005_s22  ;;  %p7013_p1 = scmp.lt.s32.totalorder %s7011_s16, %s7005_s22 }
  0x35   : > { %4562 = vmatprep.mubr.msk.f32.mxu0 %vm278_vm0, %v7454_v10  ;;  %4564 = vmatprep.mubr.msk.f32.mxu1 %vm278_vm0, %v7454_v10  ;;  %v465_v0 = vld [vmem:[%s11370_s1 + $0x1d0] sm:$0xff]  ;;  %v5727_v31 = vpack.c.bf16 %v477_v61, %v468_v60  ;;  %v467_v2 = vld [vmem:[%s11370_s1 + $0x1e0] sm:$0xff]  ;;  %v476_v3 = vld [vmem:[%s11370_s1 + $0x228] sm:$0xff] }
  0x36   : > { %v484_v4 = vld [vmem:[%s11370_s1 + $0x268] sm:$0xff]  ;;  %v493_v5 = vld [vmem:[%s11370_s1 + $0x2b0] sm:$0xff]  ;;  %v486_v6 = vld [vmem:[%s11370_s1 + $0x278] sm:$0xff]  ;;  %v5693_v8 = vpack.c.bf16 %v474_v1, %v465_v0  ;;  %v5729_v9 = vpack.c.bf16 %v476_v3, %v467_v2  ;;  %p7007_p12 = pnand %p7006_p11, %p7159_p5  ;;  %p7014_p2 = por %p7013_p1, %p7012_p0 }
  0x37   : > { %v495_v7 = vld [vmem:[%s11370_s1 + $0x2c0] sm:$0xff]  ;;  %v504_v20 = vld [vmem:[%s11370_s1 + $0x308] sm:$0xff]  ;;  %v513_v21 = vld [vmem:[%s11370_s1 + $0x350] sm:$0xff] }
  0x38   : > { %v5735_v29 = vpack.c.bf16 %v513_v21, %v504_v20  ;;  %v503_v30 = vld [vmem:[%s11370_s1 + $0x300] sm:$0xff]  ;;  %v529_v34 = vld [vmem:[%s11370_s1 + $0x3d0] sm:$0xff]  ;;  %v522_v35 = vld [vmem:[%s11370_s1 + $0x398] sm:$0xff]  ;;  %p7008_p13 = pneg %p7007_p12 }
  0x39   : > { %v531_v36 = vld [vmem:[%s11370_s1 + $0x3e0] sm:$0xff]  ;;  %v528_v40 = vld [vmem:[%s11370_s1 + $0x3c8] sm:$0xff]  ;;  %v530_v45 = vld [vmem:[%s11370_s1 + $0x3d8] sm:$0xff] }
  0x3a   : > { %v519_v39 = vld [vmem:[%s11370_s1 + $0x380] sm:$0xff]  ;;  %v538_v46 = vld [vmem:[%s11370_s1 + $0x418] sm:$0xff]  ;;  %v549_v50 = vld [vmem:[%s11370_s1 + $0x470] sm:$0xff]  ;;  %p7015_p3 = pnand %p7014_p2, %p7008_p13 }
  0x3b   : > { %v5705_v51 = vpack.c.bf16 %v528_v40, %v519_v39  ;;  %v546_v54 = vld [vmem:[%s11370_s1 + $0x458] sm:$0xff]  ;;  %v556_v59 = vld [vmem:[%s11370_s1 + $0x4a8] sm:$0xff]  ;;  %v565_v60 = vld [vmem:[%s11370_s1 + $0x4f0] sm:$0xff] }
  0x3c   : > { %v558_v61 = vld [vmem:[%s11370_s1 + $0x4b8] sm:$0xff]  ;;  %v564_v2 = vld [vmem:[%s11370_s1 + $0x4e8] sm:$0xff]  ;;  %v557_v3 = vld [vmem:[%s11370_s1 + $0x4b0] sm:$0xff] }
  0x3d   : > { %v1036_v21 = vld [vmem:[%s11372_s3 + $0x58] sm:$0xff]  ;;  %v1061_v40 = vld [vmem:[%s11372_s3 + $0x120] sm:$0xff] }
  0x3e   : > { %v1056_v39 = vld [vmem:[%s11372_s3 + $0xf8] sm:$0xff] }
  0x8c   : > { %v319_v11 = vpop.permute.xlu0 %318 }
  0x8d   : > { %v333_v13 = vpop.permute.xlu1 %332 }
  0x90   : > { %v305_v14 = vpop.permute.xlu0 %304 }
  0x91   : > { %v347_v15 = vpop.permute.xlu1 %346  ;;  %311 = vst.msk [vmem:[#allocation2] sm:$0xfe] %vm310_vm6, %v305_v14  ;;  %vm396_vm6 = vcmask 1043328   ;;  %v5695_v14 = vpack.c.bf16 %v493_v5, %v484_v4  ;;  %v566_v4 = vld [vmem:[%s11370_s1 + $0x4f8] sm:$0xff]  ;;  %v1026_v5 = vld [vmem:[%s11372_s3 + $0x8] sm:$0xff] }
  0x92   : > { %325 = vst.msk [vmem:[#allocation2] sm:$0xff] %vm324_vm7, %v319_v11  ;;  %v483_v11 = vld [vmem:[%s11370_s1 + $0x260] sm:$0xff]  ;;  %vm3001_vm7 = vcmask 523264  }
  0x93   : > { %339 = vst.msk [vmem:[#allocation2] sm:$0xff] %vm338_vm8, %v333_v13  ;;  %v492_v13 = vld [vmem:[%s11370_s1 + $0x2a8] sm:$0xff]  ;;  %vm3235_vm8 = vcmask 1043456  }
  0x94   : > { %353 = vst.msk [vmem:[#allocation2] sm:$0xff] %vm352_vm9, %v347_v15  ;;  %v361_v16 = vpop.permute.xlu0 %360  ;;  %v485_v15 = vld [vmem:[%s11370_s1 + $0x270] sm:$0xff]  ;;  %v5697_v23 = vpack.c.bf16 %v492_v13, %v483_v11  ;;  %v424_v11 = vld [vmem:[%s11370_s1 + $0x88] sm:$0xff]  ;;  %vm3544_vm9 = vcmask 1042432  }
  0x95   : > { %v375_v17 = vpop.permute.xlu1 %374  ;;  %367 = vst.msk [vmem:[#allocation2] sm:$0xff] %vm366_vm10, %v361_v16  ;;  %v494_v16 = vld [vmem:[%s11370_s1 + $0x2b8] sm:$0xff]  ;;  %vm3551_vm10 = vcmask 1046528  }
  0x96   : > { %381 = vst.msk [vmem:[#allocation2] sm:$0xff] %vm380_vm11, %v375_v17  ;;  %v502_v17 = vld [vmem:[%s11370_s1 + $0x2f8] sm:$0xff]  ;;  %v5733_v24 = vpack.c.bf16 %v494_v16, %v485_v15  ;;  %v1030_v15 = vld [vmem:[%s11372_s3 + $0x28] sm:$0xff]  ;;  %vm3861_vm11 = vcmask 1045504  }
  0x98   : > { %v389_v18 = vpop.permute.xlu0 %388 }
  0x99   : > { %v307_v19 = vpop.permute.xlu1 %306  ;;  %395 = vst.msk [vmem:[#allocation2] sm:$0xff] %vm394_vm12, %v389_v18  ;;  %v5731_v18 = vpack.c.bf16 %v495_v7, %v486_v6  ;;  %v1031_v6 = vld [vmem:[%s11372_s3 + $0x30] sm:$0xff] }
  0x9a   : > { %313 = vst.msk [vmem:[#allocation2 + $0x10] sm:$0xf] %vm312_vm13, %v307_v19  ;;  %v511_v19 = vld [vmem:[%s11370_s1 + $0x340] sm:$0xff]  ;;  %v5778_v13 = vpack.c.bf16 %v1031_v6, %v1026_v5 }
  0x9b   : > { %v5699_v28 = vpack.c.bf16 %v511_v19, %v502_v17  ;;  %v7077_v17 = vmov 0.0|0.0   ;;  %v442_v19 = vld [vmem:[%s11370_s1 + $0x118] sm:$0xff] }
  0x9c   : > { %v321_v25 = vpop.permute.xlu0 %320 }
  0x9d   : > { %v335_v27 = vpop.permute.xlu1 %334  ;;  %327 = vst.msk [vmem:[#allocation2 + $0x10] sm:$0xf] %vm326_vm14, %v321_v25  ;;  %v501_v25 = vld [vmem:[%s11370_s1 + $0x2f0] sm:$0xff] }
  0x9e   : > { %341 = vst.msk [vmem:[#allocation2 + $0x10] sm:$0xf] %vm340_vm15, %v335_v27  ;;  %v510_v27 = vld [vmem:[%s11370_s1 + $0x338] sm:$0xff] }
  0xa0   : > { %v349_v42 = vpop.permute.xlu0 %348  ;;  %v7502_v44 = vld [vmem:[#allocation2] sm:$0xff] }
  0xa1   : > { %v363_v43 = vpop.permute.xlu1 %362  ;;  %355 = vst.msk [vmem:[#allocation2 + $0x10] sm:$0xf] %vm354_vm1, %v349_v42  ;;  %689 = vmatmul.mubr.f32.vlgmr.msra.gmra.mrb[0].mxu0 %v7502_v44  ;;  %766 = vmatmul.mubr.f32.vlgmr.msra.gmra.mrb[0].mxu1 %v7502_v44  ;;  %v5739_v42 = vpack.c.bf16 %v531_v36, %v522_v35  ;;  %v1045_v36 = vld [vmem:[%s11372_s3 + $0xa0] sm:$0xff] }
  0xa2   : > { %369 = vst.msk [vmem:[#allocation2 + $0x10] sm:$0xf] %vm368_vm2, %v363_v43  ;;  %5682 = vmatpush1.bf16.msra.mxu0 %v5681_v32  ;;  %5718 = vmatpush1.bf16.msra.mxu1 %v5717_v33  ;;  %v512_v32 = vld [vmem:[%s11370_s1 + $0x348] sm:$0xff]  ;;  %v521_v43 = vld [vmem:[%s11370_s1 + $0x390] sm:$0xff] }
  0xa3   : > { %5684 = vmatprep.subr.bf16.mxu0 %v5683_v37  ;;  %5720 = vmatprep.subr.bf16.mxu1 %v5719_v38  ;;  %v520_v33 = vld [vmem:[%s11370_s1 + $0x388] sm:$0xff]  ;;  %v5701_v37 = vpack.c.bf16 %v510_v27, %v501_v25  ;;  %v5737_v38 = vpack.c.bf16 %v512_v32, %v503_v30  ;;  %v1040_v25 = vld [vmem:[%s11372_s3 + $0x78] sm:$0xff]  ;;  %v451_v30 = vld [vmem:[%s11370_s1 + $0x160] sm:$0xff] }
  0xa4   : > { %v377_v57 = vpop.permute.xlu0 %376  ;;  %4563 = vmatprep.mubr.msk.f32.mxu0 %vm278_vm0, %v7513_v47  ;;  %4565 = vmatprep.mubr.msk.f32.mxu1 %vm278_vm0, %v7513_v47  ;;  %v5703_v41 = vpack.c.bf16 %v529_v34, %v520_v33  ;;  %v460_v32 = vld [vmem:[%s11370_s1 + $0x1a8] sm:$0xff] }
  0xa5   : > { %v391_v58 = vpop.permute.xlu1 %390  ;;  %383 = vst.msk [vmem:[#allocation2 + $0x10] sm:$0xf] %vm382_vm4, %v377_v57  ;;  %v539_v57 = vld [vmem:[%s11370_s1 + $0x420] sm:$0xff] }
  0xa6   : > { %397 = vst.msk [vmem:[#allocation2 + $0x10] sm:$0x7] %vm396_vm6, %v391_v58  ;;  %5686 = vmatpush1.bf16.msra.mxu0 %v5685_v48  ;;  %5722 = vmatpush1.bf16.msra.mxu1 %v5721_v49  ;;  %v547_v48 = vld [vmem:[%s11370_s1 + $0x460] sm:$0xff]  ;;  %v540_v49 = vld [vmem:[%s11370_s1 + $0x428] sm:$0xff] }
  0xa7   : > { %5688 = vmatprep.subr.bf16.mxu0 %v5687_v52  ;;  %5724 = vmatprep.subr.bf16.mxu1 %v5723_v53  ;;  %v5741_v52 = vpack.c.bf16 %v530_v45, %v521_v43  ;;  %v537_v53 = vld [vmem:[%s11370_s1 + $0x410] sm:$0xff]  ;;  %v5707_v55 = vpack.c.bf16 %v547_v48, %v538_v46  ;;  %v5743_v56 = vpack.c.bf16 %v549_v50, %v540_v49  ;;  %v548_v58 = vld [vmem:[%s11370_s1 + $0x468] sm:$0xff]  ;;  %v1060_v46 = vld [vmem:[%s11372_s3 + $0x118] sm:$0xff] }
  0xa8   : > { %v5745_v0 = vpack.c.bf16 %v548_v58, %v539_v57  ;;  %v5790_v43 = vpack.c.bf16 %v1061_v40, %v1056_v39  ;;  %v1055_v45 = vld [vmem:[%s11372_s3 + $0xf0] sm:$0xff]  ;;  %v1066_v49 = vld [vmem:[%s11372_s3 + $0x148] sm:$0xff]  ;;  %v1076_v58 = vld [vmem:[%s11372_s3 + $0x198] sm:$0xff] }
  0xa9   : > { %v1071_v50 = vld [vmem:[%s11372_s3 + $0x170] sm:$0xff]  ;;  %v1032_v40 = vld [vmem:[%s11372_s3 + $0x38] sm:$0xff] }
  0xaa   : > { %5690 = vmatpush1.bf16.msra.mxu0 %v5689_v62  ;;  %5726 = vmatpush1.bf16.msra.mxu1 %v5725_v63  ;;  %v567_v62 = vld [vmem:[%s11370_s1 + $0x500] sm:$0xff]  ;;  %v5709_v63 = vpack.c.bf16 %v546_v54, %v537_v53  ;;  %v5792_v53 = vpack.c.bf16 %v1060_v46, %v1055_v45  ;;  %v5794_v54 = vpack.c.bf16 %v1071_v50, %v1066_v49  ;;  %v1027_v39 = vld [vmem:[%s11372_s3 + $0x10] sm:$0xff]  ;;  %v1120_v45 = vld [vmem:[%s11372_s3 + $0x2f8] sm:$0xff] }
  0xab   : > { %5692 = vmatprep.subr.bf16.mxu0 %v5691_v26  ;;  %5728 = vmatprep.subr.bf16.mxu1 %v5727_v31  ;;  %v555_v26 = vld [vmem:[%s11370_s1 + $0x4a0] sm:$0xff]  ;;  %v5711_v31 = vpack.c.bf16 %v565_v60, %v556_v59  ;;  %v5747_v1 = vpack.c.bf16 %v567_v62, %v558_v61  ;;  %v505_v60 = vld [vmem:[%s11370_s1 + $0x310] sm:$0xff]  ;;  %v514_v61 = vld [vmem:[%s11370_s1 + $0x358] sm:$0xff]  ;;  %v6068_v46 = vpack.c.bf16 %v1032_v40, %v1027_v39 }
  0xac   : > { %v5713_v7 = vpack.c.bf16 %v564_v2, %v555_v26  ;;  %v1081_v59 = vld [vmem:[%s11372_s3 + $0x1c0] sm:$0xff]  ;;  %v1080_v26 = vld [vmem:[%s11372_s3 + $0x1b8] sm:$0xff]  ;;  %v1091_v2 = vld [vmem:[%s11372_s3 + $0x210] sm:$0xff] }
  0xad   : > { %v7592_v22 = vld [vmem:[#allocation2 + $0x10] sm:$0xf]  ;;  %v1093_v39 = vld [vmem:[%s11372_s3 + $0x220] sm:$0xff] }
  0xae   : > { %5694 = vmatpush1.bf16.msra.mxu0 %v5693_v8  ;;  %5730 = vmatpush1.bf16.msra.mxu1 %v5729_v9  ;;  %v5749_v8 = vpack.c.bf16 %v566_v4, %v557_v3  ;;  %v415_v9 = vld [vmem:[%s11370_s1 + $0x40] sm:$0xff]  ;;  %v532_v4 = vld [vmem:[%s11370_s1 + $0x3e8] sm:$0xff]  ;;  %v1131_v49 = vld [vmem:[%s11372_s3 + $0x350] sm:$0xff] }
  0xaf   : > { %695 = vmatmul.mubr.f32.gmra.mrb[2].mxu0 %v7592_v22  ;;  %5696 = vmatprep.subr.bf16.mxu0 %v5695_v14  ;;  %v1025_v14 = vld [vmem:[%s11372_s3] sm:$0xff]  ;;  %v5752_v16 = vpack.c.bf16 %v424_v11, %v415_v9  ;;  %v1096_v11 = vld [vmem:[%s11372_s3 + $0x238] sm:$0xff] }
  0xb0   : > { %5732 = vmatprep.subr.bf16.mxu1 %v5731_v18  ;;  %772 = vmatmul.mubr.f32.gmra.mrb[2].mxu1 %v7592_v22  ;;  %v433_v18 = vld [vmem:[%s11370_s1 + $0xd0] sm:$0xff]  ;;  %v5780_v20 = vpack.c.bf16 %v1030_v15, %v1025_v14  ;;  %v523_v3 = vld [vmem:[%s11370_s1 + $0x3a0] sm:$0xff]  ;;  %v550_v15 = vld [vmem:[%s11370_s1 + $0x478] sm:$0xff] }
  0xb1   : > { %4566 = vmatprep.mubr.msk.f32.mxu0 %vm278_vm0, %v7454_v10  ;;  %4568 = vmatprep.mubr.msk.f32.mxu1 %vm278_vm0, %v7454_v10  ;;  %v5755_v27 = vpack.c.bf16 %v442_v19, %v433_v18  ;;  %v5770_v9 = vpack.c.bf16 %v532_v4, %v523_v3  ;;  %v541_v14 = vld [vmem:[%s11370_s1 + $0x430] sm:$0xff]  ;;  %v1146_v4 = vld [vmem:[%s11372_s3 + $0x3c8] sm:$0xff] }
  0xb2   : > { %5698 = vmatpush1.bf16.msra.mxu0 %v5697_v23  ;;  %5734 = vmatpush1.bf16.msra.mxu1 %v5733_v24  ;;  %v1041_v23 = vld [vmem:[%s11372_s3 + $0x80] sm:$0xff]  ;;  %v1035_v24 = vld [vmem:[%s11372_s3 + $0x50] sm:$0xff] }
  0xb3   : > { %5700 = vmatprep.subr.bf16.mxu0 %v5699_v28  ;;  %5736 = vmatprep.subr.bf16.mxu1 %v5735_v29  ;;  %v1046_v28 = vld [vmem:[%s11372_s3 + $0xa8] sm:$0xff]  ;;  %v1051_v29 = vld [vmem:[%s11372_s3 + $0xd0] sm:$0xff]  ;;  %v5782_v33 = vpack.c.bf16 %v1041_v23, %v1036_v21  ;;  %v5784_v34 = vpack.c.bf16 %v1040_v25, %v1035_v24  ;;  %v5773_v21 = vpack.c.bf16 %v550_v15, %v541_v14  ;;  %v559_v25 = vld [vmem:[%s11370_s1 + $0x4c0] sm:$0xff] }
  0xb4   : > { %v5786_v35 = vpack.c.bf16 %v1051_v29, %v1046_v28  ;;  %v1095_v19 = vld [vmem:[%s11372_s3 + $0x230] sm:$0xff]  ;;  %v1106_v23 = vld [vmem:[%s11372_s3 + $0x288] sm:$0xff]  ;;  %v1028_v28 = vld [vmem:[%s11372_s3 + $0x18] sm:$0xff] }
  0xb5   : > { %v1111_v24 = vld [vmem:[%s11372_s3 + $0x2b0] sm:$0xff]  ;;  %v1033_v29 = vld [vmem:[%s11372_s3 + $0x40] sm:$0xff]  ;;  %v1150_v15 = vld [vmem:[%s11372_s3 + $0x3e8] sm:$0xff] }
  0xb6   : > { %5702 = vmatpush1.bf16.msra.mxu0 %v5701_v37  ;;  %5738 = vmatpush1.bf16.msra.mxu1 %v5737_v38  ;;  %v1050_v37 = vld [vmem:[%s11372_s3 + $0xc8] sm:$0xff]  ;;  %v5758_v38 = vpack.c.bf16 %v460_v32, %v451_v30  ;;  %v5810_v32 = vpack.c.bf16 %v1111_v24, %v1106_v23  ;;  %v1145_v14 = vld [vmem:[%s11372_s3 + $0x3c0] sm:$0xff]  ;;  %v1072_v23 = vld [vmem:[%s11372_s3 + $0x178] sm:$0xff] }
  0xb7   : > { %5704 = vmatprep.subr.bf16.mxu0 %v5703_v41  ;;  %5740 = vmatprep.subr.bf16.mxu1 %v5739_v42  ;;  %v469_v41 = vld [vmem:[%s11370_s1 + $0x1f0] sm:$0xff]  ;;  %v478_v42 = vld [vmem:[%s11370_s1 + $0x238] sm:$0xff]  ;;  %v1078_v24 = vld [vmem:[%s11372_s3 + $0x1a8] sm:$0xff] }
  0xb8   : > { %v5761_v48 = vpack.c.bf16 %v478_v42, %v469_v41  ;;  %v1038_v41 = vld [vmem:[%s11372_s3 + $0x68] sm:$0xff]  ;;  %v1043_v42 = vld [vmem:[%s11372_s3 + $0x90] sm:$0xff] }
  0xb9   : > { %v6070_v50 = vpack.c.bf16 %v1043_v42, %v1038_v41  ;;  %v1165_v42 = vld [vmem:[%s11372_s3 + $0x460] sm:$0xff] }
  0xba   : > { %5706 = vmatpush1.bf16.msra.mxu0 %v5705_v51  ;;  %5742 = vmatpush1.bf16.msra.mxu1 %v5741_v52  ;;  %v487_v51 = vld [vmem:[%s11370_s1 + $0x280] sm:$0xff]  ;;  %v496_v52 = vld [vmem:[%s11370_s1 + $0x2c8] sm:$0xff] }
  0xbb   : > { %5708 = vmatprep.subr.bf16.mxu0 %v5707_v55  ;;  %5744 = vmatprep.subr.bf16.mxu1 %v5743_v56  ;;  %v1065_v55 = vld [vmem:[%s11372_s3 + $0x140] sm:$0xff]  ;;  %v1070_v56 = vld [vmem:[%s11372_s3 + $0x168] sm:$0xff]  ;;  %v5764_v57 = vpack.c.bf16 %v496_v52, %v487_v51 }
  0xbc   : > { %v5796_v62 = vpack.c.bf16 %v1070_v56, %v1065_v55  ;;  %v1037_v51 = vld [vmem:[%s11372_s3 + $0x60] sm:$0xff]  ;;  %v1042_v52 = vld [vmem:[%s11372_s3 + $0x88] sm:$0xff] }
  0xbe   : > { %5710 = vmatpush1.bf16.msra.mxu0 %v5709_v63  ;;  %5746 = vmatpush1.bf16.msra.mxu1 %v5745_v0  ;;  %v5798_v63 = vpack.c.bf16 %v1081_v59, %v1076_v58  ;;  %v1075_v0 = vld [vmem:[%s11372_s3 + $0x190] sm:$0xff]  ;;  %v1130_v58 = vld [vmem:[%s11372_s3 + $0x348] sm:$0xff]  ;;  %v6072_v59 = vpack.c.bf16 %v1042_v52, %v1037_v51 }
  0xbf   : > { %5712 = vmatprep.subr.bf16.mxu0 %v5711_v31  ;;  %5748 = vmatprep.subr.bf16.mxu1 %v5747_v1  ;;  %v5767_v31 = vpack.c.bf16 %v514_v61, %v505_v60  ;;  %v1086_v1 = vld [vmem:[%s11372_s3 + $0x1e8] sm:$0xff]  ;;  %v5800_v5 = vpack.c.bf16 %v1080_v26, %v1075_v0  ;;  %v1136_v60 = vld [vmem:[%s11372_s3 + $0x378] sm:$0xff]  ;;  %v1063_v0 = vld [vmem:[%s11372_s3 + $0x130] sm:$0xff] }
  0xc0   : > { %v5802_v6 = vpack.c.bf16 %v1091_v2, %v1086_v1  ;;  %v1135_v1 = vld [vmem:[%s11372_s3 + $0x370] sm:$0xff]  ;;  %v1140_v2 = vld [vmem:[%s11372_s3 + $0x398] sm:$0xff] }
  0xc1   : > { %v1103_v51 = vld [vmem:[%s11372_s3 + $0x270] sm:$0xff] }
  0xc2   : > { %5714 = vmatpush1.bf16.msra.mxu0 %v5713_v7  ;;  %5750 = vmatpush1.bf16.msra.mxu1 %v5749_v8  ;;  %v1085_v7 = vld [vmem:[%s11372_s3 + $0x1e0] sm:$0xff]  ;;  %v1090_v8 = vld [vmem:[%s11372_s3 + $0x208] sm:$0xff] }
  0xc3   : > { %5751 = vmatprep.subr.bf16.mxu0 %v7077_v17  ;;  %5779 = vmatprep.subr.bf16.mxu1 %v5778_v13  ;;  %v1101_v13 = vld [vmem:[%s11372_s3 + $0x260] sm:$0xff] }
  0xc4   : > { %v5806_v18 = vpack.c.bf16 %v1101_v13, %v1096_v11  ;;  %v5824_v11 = vpack.c.bf16 %v1140_v2, %v1135_v1  ;;  %v1112_v1 = vld [vmem:[%s11372_s3 + $0x2b8] sm:$0xff]  ;;  %v1118_v2 = vld [vmem:[%s11372_s3 + $0x2e8] sm:$0xff] }
  0xc5   : > { %843 = vmatmul.mubr.f32.vlgmr.msra.gmra.mrb[4].mxu0 %v7502_v44  ;;  %920 = vmatmul.mubr.f32.vlgmr.msra.gmra.mrb[4].mxu1 %v7502_v44 }
  0xc6   : > { %5753 = vmatpush1.bf16.msra.mxu0 %v5752_v16  ;;  %4567 = vmatprep.mubr.msk.f32.mxu0 %vm278_vm0, %v7513_v47  ;;  %v5804_v16 = vpack.c.bf16 %v1090_v8, %v1085_v7  ;;  %v1062_v7 = vld [vmem:[%s11372_s3 + $0x128] sm:$0xff]  ;;  %v1068_v8 = vld [vmem:[%s11372_s3 + $0x158] sm:$0xff] }
  0xc7   : > { %5754 = vmatprep.subr.bf16.mxu0 %v7077_v17  ;;  %4569 = vmatprep.mubr.msk.f32.mxu1 %vm278_vm0, %v7513_v47 }
  0xc8   : > { %5781 = vmatpush1.bf16.msra.mxu1 %v5780_v20  ;;  %v1100_v20 = vld [vmem:[%s11372_s3 + $0x258] sm:$0xff] }
  0xc9   : > { %849 = vmatmul.mubr.f32.gmra.mrb[6].mxu0 %v7592_v22  ;;  %926 = vmatmul.mubr.f32.gmra.mrb[6].mxu1 %v7592_v22  ;;  %v5808_v30 = vpack.c.bf16 %v1100_v20, %v1095_v19  ;;  %v1161_v19 = vld [vmem:[%s11372_s3 + $0x440] sm:$0xff] }
  0xca   : > { %5756 = vmatpush1.bf16.msra.mxu0 %v5755_v27  ;;  %4570 = vmatprep.mubr.msk.f32.mxu0 %vm278_vm0, %v7454_v10  ;;  %v5788_v10 = vpack.c.bf16 %v1050_v37, %v1045_v36  ;;  %v568_v27 = vld [vmem:[%s11370_s1 + $0x508] sm:$0xff]  ;;  %v1116_v36 = vld [vmem:[%s11372_s3 + $0x2d8] sm:$0xff]  ;;  %v1121_v37 = vld [vmem:[%s11372_s3 + $0x300] sm:$0xff] }
  0xcb   : > { %5757 = vmatprep.subr.bf16.mxu0 %v7077_v17  ;;  %5783 = vmatprep.subr.bf16.mxu1 %v5782_v33  ;;  %v1105_v33 = vld [vmem:[%s11372_s3 + $0x280] sm:$0xff] }
  0xcc   : > { %5785 = vmatpush1.bf16.msra.mxu1 %v5784_v34  ;;  %v1110_v34 = vld [vmem:[%s11372_s3 + $0x2a8] sm:$0xff] }
  0xcd   : > { %5787 = vmatprep.subr.bf16.mxu1 %v5786_v35  ;;  %v5776_v35 = vpack.c.bf16 %v568_v27, %v559_v25  ;;  %v1083_v25 = vld [vmem:[%s11372_s3 + $0x1d0] sm:$0xff]  ;;  %v5828_v27 = vpack.c.bf16 %v1150_v15, %v1145_v14  ;;  %v1132_v14 = vld [vmem:[%s11372_s3 + $0x358] sm:$0xff]  ;;  %v1138_v15 = vld [vmem:[%s11372_s3 + $0x388] sm:$0xff] }
  0xce   : > { %5759 = vmatpush1.bf16.msra.mxu0 %v5758_v38  ;;  %v6066_v38 = vpack.c.bf16 %v1033_v29, %v1028_v28  ;;  %v1155_v29 = vld [vmem:[%s11372_s3 + $0x410] sm:$0xff] }
  0xcf   : > { %5760 = vmatprep.subr.bf16.mxu0 %v7077_v17 }
  0xd0   : > { %5789 = vmatpush1.bf16.msra.mxu1 %v5788_v10  ;;  %v5812_v10 = vpack.c.bf16 %v1110_v34, %v1105_v33  ;;  %v1166_v33 = vld [vmem:[%s11372_s3 + $0x468] sm:$0xff]  ;;  %v1171_v34 = vld [vmem:[%s11372_s3 + $0x490] sm:$0xff] }
  0xd1   : > { %5791 = vmatprep.subr.bf16.mxu1 %v5790_v43  ;;  %v1115_v43 = vld [vmem:[%s11372_s3 + $0x2d0] sm:$0xff]  ;;  %v5834_v41 = vpack.c.bf16 %v1171_v34, %v1166_v33 }
  0xd2   : > { %5762 = vmatpush1.bf16.msra.mxu0 %v5761_v48  ;;  %v1126_v48 = vld [vmem:[%s11372_s3 + $0x328] sm:$0xff]  ;;  %v5816_v55 = vpack.c.bf16 %v1120_v45, %v1115_v43  ;;  %v1176_v43 = vld [vmem:[%s11372_s3 + $0x4b8] sm:$0xff]  ;;  %v1181_v45 = vld [vmem:[%s11372_s3 + $0x4e0] sm:$0xff] }
  0xd3   : > { %5763 = vmatprep.subr.bf16.mxu0 %v7077_v17  ;;  %v5818_v56 = vpack.c.bf16 %v1131_v49, %v1126_v48  ;;  %v1087_v48 = vld [vmem:[%s11372_s3 + $0x1f0] sm:$0xff]  ;;  %v1092_v49 = vld [vmem:[%s11372_s3 + $0x218] sm:$0xff] }
  0xd4   : > { %5793 = vmatpush1.bf16.msra.mxu1 %v5792_v53  ;;  %v1048_v53 = vld [vmem:[%s11372_s3 + $0xb8] sm:$0xff] }
  0xd5   : > { %5795 = vmatprep.subr.bf16.mxu1 %v5794_v54  ;;  %v1053_v54 = vld [vmem:[%s11372_s3 + $0xe0] sm:$0xff] }
  0xd6   : > { %5765 = vmatpush1.bf16.msra.mxu0 %v5764_v57  ;;  %v1125_v57 = vld [vmem:[%s11372_s3 + $0x320] sm:$0xff]  ;;  %v6074_v61 = vpack.c.bf16 %v1053_v54, %v1048_v53  ;;  %v5838_v53 = vpack.c.bf16 %v1181_v45, %v1176_v43  ;;  %v1175_v54 = vld [vmem:[%s11372_s3 + $0x4b0] sm:$0xff] }
  0xd7   : > { %5766 = vmatprep.subr.bf16.mxu0 %v7077_v17  ;;  %v5820_v26 = vpack.c.bf16 %v1130_v58, %v1125_v57  ;;  %v1186_v57 = vld [vmem:[%s11372_s3 + $0x508] sm:$0xff]  ;;  %v1191_v58 = vld [vmem:[%s11372_s3 + $0x530] sm:$0xff] }
  0xd8   : > { %5797 = vmatpush1.bf16.msra.mxu1 %v5796_v62  ;;  %v1047_v62 = vld [vmem:[%s11372_s3 + $0xb0] sm:$0xff] }
  0xd9   : > { %5799 = vmatprep.subr.bf16.mxu1 %v5798_v63  ;;  %v1058_v63 = vld [vmem:[%s11372_s3 + $0x108] sm:$0xff] }
  0xda   : > { %5768 = vmatpush1.bf16.msra.mxu0 %v5767_v31 }
  0xdb   : > { %5769 = vmatprep.subr.bf16.mxu0 %v7077_v17 }
  0xdc   : > { %5801 = vmatpush1.bf16.msra.mxu1 %v5800_v5  ;;  %v6078_v5 = vpack.c.bf16 %v1063_v0, %v1058_v63  ;;  %v5842_v63 = vpack.c.bf16 %v1191_v58, %v1186_v57 }
  0xdd   : > { %5803 = vmatprep.subr.bf16.mxu1 %v5802_v6  ;;  %v1057_v6 = vld [vmem:[%s11372_s3 + $0x100] sm:$0xff] }
  0xde   : > { %5771 = vmatpush1.bf16.msra.mxu0 %v5770_v9  ;;  %v1073_v9 = vld [vmem:[%s11372_s3 + $0x180] sm:$0xff] }
  0xdf   : > { %5772 = vmatprep.subr.bf16.mxu0 %v7077_v17  ;;  %v6082_v20 = vpack.c.bf16 %v1073_v9, %v1068_v8  ;;  %v1133_v8 = vld [vmem:[%s11372_s3 + $0x360] sm:$0xff] }
  0xe0   : > { %5805 = vmatpush1.bf16.msra.mxu1 %v5804_v16  ;;  %v6080_v16 = vpack.c.bf16 %v1062_v7, %v1057_v6  ;;  %v1122_v6 = vld [vmem:[%s11372_s3 + $0x308] sm:$0xff]  ;;  %v1128_v7 = vld [vmem:[%s11372_s3 + $0x338] sm:$0xff] }
  0xe1   : > { %5807 = vmatprep.subr.bf16.mxu1 %v5806_v18  ;;  %v1156_v18 = vld [vmem:[%s11372_s3 + $0x418] sm:$0xff] }
  0xe2   : > { %5774 = vmatpush1.bf16.msra.mxu0 %v5773_v21  ;;  %v1067_v21 = vld [vmem:[%s11372_s3 + $0x150] sm:$0xff]  ;;  %v5830_v28 = vpack.c.bf16 %v1161_v19, %v1156_v18 }
  0xe3   : > { %5775 = vmatprep.subr.bf16.mxu0 %v7077_v17  ;;  %v5814_v17 = vpack.c.bf16 %v1121_v37, %v1116_v36  ;;  %v1077_v36 = vld [vmem:[%s11372_s3 + $0x1a0] sm:$0xff]  ;;  %v1082_v37 = vld [vmem:[%s11372_s3 + $0x1c8] sm:$0xff] }
  0xe4   : > { %5809 = vmatpush1.bf16.msra.mxu1 %v5808_v30  ;;  %v1160_v30 = vld [vmem:[%s11372_s3 + $0x438] sm:$0xff] }
  0xe5   : > { %5811 = vmatprep.subr.bf16.mxu1 %v5810_v32  ;;  %v6084_v32 = vpack.c.bf16 %v1072_v23, %v1067_v21  ;;  %v5832_v40 = vpack.c.bf16 %v1160_v30, %v1155_v29  ;;  %v1142_v21 = vld [vmem:[%s11372_s3 + $0x3a8] sm:$0xff]  ;;  %v1148_v23 = vld [vmem:[%s11372_s3 + $0x3d8] sm:$0xff] }
  0xe6   : > { %5777 = vmatpush1.bf16.msra.mxu0 %v5776_v35  ;;  %v6086_v35 = vpack.c.bf16 %v1083_v25, %v1078_v24  ;;  %v1153_v24 = vld [vmem:[%s11372_s3 + $0x400] sm:$0xff]  ;;  %v1152_v29 = vld [vmem:[%s11372_s3 + $0x3f8] sm:$0xff]  ;;  %v1158_v30 = vld [vmem:[%s11372_s3 + $0x428] sm:$0xff] }
  0xe7   : > { %6067 = vmatprep.subr.bf16.mxu0 %v6066_v38  ;;  %v1088_v38 = vld [vmem:[%s11372_s3 + $0x1f8] sm:$0xff] }
  0xe8   : > { %5813 = vmatpush1.bf16.msra.mxu1 %v5812_v10  ;;  %v1170_v10 = vld [vmem:[%s11372_s3 + $0x488] sm:$0xff] }
  0xe9   : > { %997 = vmatmul.mubr.f32.vlgmr.msra.gmra.mrb[8].mxu0 %v7502_v44  ;;  %5815 = vmatprep.subr.bf16.mxu1 %v5814_v17  ;;  %v1141_v44 = vld [vmem:[%s11372_s3 + $0x3a0] sm:$0xff]  ;;  %v6088_v17 = vpack.c.bf16 %v1082_v37, %v1077_v36  ;;  %v5836_v52 = vpack.c.bf16 %v1170_v10, %v1165_v42  ;;  %v1162_v36 = vld [vmem:[%s11372_s3 + $0x448] sm:$0xff]  ;;  %v1168_v37 = vld [vmem:[%s11372_s3 + $0x478] sm:$0xff] }
  0xea   : > { %4571 = vmatprep.mubr.msk.f32.mxu0 %vm278_vm0, %v7513_v47  ;;  %6069 = vmatpush1.bf16.msra.mxu0 %v6068_v46  ;;  %v1052_v47 = vld [vmem:[%s11372_s3 + $0xd8] sm:$0xff]  ;;  %v5822_v31 = vpack.c.bf16 %v1141_v44, %v1136_v60  ;;  %v6090_v46 = vpack.c.bf16 %v1093_v39, %v1088_v38  ;;  %v1097_v60 = vld [vmem:[%s11372_s3 + $0x240] sm:$0xff]  ;;  %v1102_v44 = vld [vmem:[%s11372_s3 + $0x268] sm:$0xff] }
  0xeb   : > { %6071 = vmatprep.subr.bf16.mxu0 %v6070_v50  ;;  %v6076_v3 = vpack.c.bf16 %v1052_v47, %v1047_v62  ;;  %v1098_v50 = vld [vmem:[%s11372_s3 + $0x248] sm:$0xff]  ;;  %v1113_v62 = vld [vmem:[%s11372_s3 + $0x2c0] sm:$0xff]  ;;  %v6096_v0 = vpack.c.bf16 %v1102_v44, %v1097_v60  ;;  %v1172_v42 = vld [vmem:[%s11372_s3 + $0x498] sm:$0xff] }
  0xec   : > { %5817 = vmatpush1.bf16.msra.mxu1 %v5816_v55  ;;  %v1180_v55 = vld [vmem:[%s11372_s3 + $0x4d8] sm:$0xff]  ;;  %v1173_v38 = vld [vmem:[%s11372_s3 + $0x4a0] sm:$0xff]  ;;  %v1178_v10 = vld [vmem:[%s11372_s3 + $0x4c8] sm:$0xff] }
  0xed   : > { %1002 = vmatmul.mubr.f32.gmra.mrb[10].mxu0 %v7592_v22  ;;  %5819 = vmatprep.subr.bf16.mxu1 %v5818_v56  ;;  %v1151_v22 = vld [vmem:[%s11372_s3 + $0x3f0] sm:$0xff]  ;;  %v6092_v56 = vpack.c.bf16 %v1092_v49, %v1087_v48  ;;  %v5840_v47 = vpack.c.bf16 %v1180_v55, %v1175_v54  ;;  %v1182_v48 = vld [vmem:[%s11372_s3 + $0x4e8] sm:$0xff]  ;;  %v1188_v49 = vld [vmem:[%s11372_s3 + $0x518] sm:$0xff] }
  0xee   : > { %6073 = vmatpush1.bf16.msra.mxu0 %v6072_v59  ;;  %v5826_v13 = vpack.c.bf16 %v1151_v22, %v1146_v4  ;;  %v6094_v59 = vpack.c.bf16 %v1103_v51, %v1098_v50  ;;  %v1193_v50 = vld [vmem:[%s11372_s3 + $0x540] sm:$0xff] }
  0xef   : > { %6075 = vmatprep.subr.bf16.mxu0 %v6074_v61  ;;  %v1108_v61 = vld [vmem:[%s11372_s3 + $0x298] sm:$0xff] }
  0xf0   : > { %5821 = vmatpush1.bf16.msra.mxu1 %v5820_v26  ;;  %v6098_v26 = vpack.c.bf16 %v1113_v62, %v1108_v61  ;;  %v1185_v61 = vld [vmem:[%s11372_s3 + $0x500] sm:$0xff]  ;;  %v1190_v62 = vld [vmem:[%s11372_s3 + $0x528] sm:$0xff] }
  0xf1   : > { %5823 = vmatprep.subr.bf16.mxu1 %v5822_v31  ;;  %v1107_v31 = vld [vmem:[%s11372_s3 + $0x290] sm:$0xff] }
  0xf2   : > { %6077 = vmatpush1.bf16.msra.mxu0 %v6076_v3  ;;  %v1123_v3 = vld [vmem:[%s11372_s3 + $0x310] sm:$0xff]  ;;  %v6100_v4 = vpack.c.bf16 %v1112_v1, %v1107_v31  ;;  %v1192_v31 = vld [vmem:[%s11372_s3 + $0x538] sm:$0xff] }
  0xf3   : > { %6079 = vmatprep.subr.bf16.mxu0 %v6078_v5  ;;  %v6102_v22 = vpack.c.bf16 %v1123_v3, %v1118_v2  ;;  %v1117_v5 = vld [vmem:[%s11372_s3 + $0x2e0] sm:$0xff]  ;;  %v1196_v1 = vld [vmem:[%s11372_s3 + $0x558] sm:$0xff] }
  0xf4   : > { %5825 = vmatpush1.bf16.msra.mxu1 %v5824_v11  ;;  %v6104_v9 = vpack.c.bf16 %v1122_v6, %v1117_v5  ;;  %v6106_v11 = vpack.c.bf16 %v1133_v8, %v1128_v7  ;;  %v1201_v3 = vld [vmem:[%s11372_s3 + $0x580] sm:$0xff]  ;;  %v5844_v6 = vpack.c.bf16 %v1190_v62, %v1185_v61  ;;  %v1195_v8 = vld [vmem:[%s11372_s3 + $0x550] sm:$0xff] }
  0xf5   : > { %5827 = vmatprep.subr.bf16.mxu1 %v5826_v13  ;;  %v1127_v13 = vld [vmem:[%s11372_s3 + $0x330] sm:$0xff] }
  0xf6   : > { %6081 = vmatpush1.bf16.msra.mxu0 %v6080_v16  ;;  %v1143_v16 = vld [vmem:[%s11372_s3 + $0x3b0] sm:$0xff]  ;;  %v6108_v18 = vpack.c.bf16 %v1132_v14, %v1127_v13  ;;  %v5846_v13 = vpack.c.bf16 %v1201_v3, %v1196_v1  ;;  %v1236_v3 = vld [vmem:[%s11372_s3 + $0x698] sm:$0xff] }
  0xf7   : > { %6083 = vmatprep.subr.bf16.mxu0 %v6082_v20  ;;  %v6110_v19 = vpack.c.bf16 %v1143_v16, %v1138_v15  ;;  %v1137_v20 = vld [vmem:[%s11372_s3 + $0x380] sm:$0xff]  ;;  %v1202_v16 = vld [vmem:[%s11372_s3 + $0x588] sm:$0xff] }
  0xf8   : > { %5829 = vmatpush1.bf16.msra.mxu1 %v5828_v27  ;;  %v6112_v25 = vpack.c.bf16 %v1142_v21, %v1137_v20  ;;  %v6114_v27 = vpack.c.bf16 %v1153_v24, %v1148_v23  ;;  %v1197_v15 = vld [vmem:[%s11372_s3 + $0x560] sm:$0xff]  ;;  %v1208_v20 = vld [vmem:[%s11372_s3 + $0x5b8] sm:$0xff] }
  0xf9   : > { %5831 = vmatprep.subr.bf16.mxu1 %v5830_v28  ;;  %v1147_v28 = vld [vmem:[%s11372_s3 + $0x3d0] sm:$0xff]  ;;  %v1213_v21 = vld [vmem:[%s11372_s3 + $0x5e0] sm:$0xff]  ;;  %v6136_v24 = vpack.c.bf16 %v1202_v16, %v1197_v15  ;;  %v1240_v16 = vld [vmem:[%s11372_s3 + $0x6b8] sm:$0xff] }
  0xfa   : > { %6085 = vmatpush1.bf16.msra.mxu0 %v6084_v32  ;;  %v1163_v32 = vld [vmem:[%s11372_s3 + $0x450] sm:$0xff]  ;;  %v6116_v33 = vpack.c.bf16 %v1152_v29, %v1147_v28 }
  0xfb   : > { %6087 = vmatprep.subr.bf16.mxu0 %v6086_v35  ;;  %v6118_v34 = vpack.c.bf16 %v1163_v32, %v1158_v30  ;;  %v1157_v35 = vld [vmem:[%s11372_s3 + $0x420] sm:$0xff]  ;;  %v6138_v30 = vpack.c.bf16 %v1213_v21, %v1208_v20  ;;  %v1207_v32 = vld [vmem:[%s11372_s3 + $0x5b0] sm:$0xff]  ;;  %v1242_v21 = vld [vmem:[%s11372_s3 + $0x6c8] sm:$0xff] }
  0xfc   : > { %5833 = vmatpush1.bf16.msra.mxu1 %v5832_v40  ;;  %v6120_v39 = vpack.c.bf16 %v1162_v36, %v1157_v35  ;;  %v6122_v40 = vpack.c.bf16 %v1173_v38, %v1168_v37  ;;  %v1221_v35 = vld [vmem:[%s11372_s3 + $0x620] sm:$0xff]  ;;  %v1218_v36 = vld [vmem:[%s11372_s3 + $0x608] sm:$0xff]  ;;  %v1223_v37 = vld [vmem:[%s11372_s3 + $0x630] sm:$0xff] }
  0xfd   : > { %5835 = vmatprep.subr.bf16.mxu1 %v5834_v41  ;;  %v1167_v41 = vld [vmem:[%s11372_s3 + $0x470] sm:$0xff]  ;;  %v1237_v20 = vld [vmem:[%s11372_s3 + $0x6a0] sm:$0xff] }
  0xfe   : > { %6089 = vmatpush1.bf16.msra.mxu0 %v6088_v17  ;;  %v1183_v17 = vld [vmem:[%s11372_s3 + $0x4f0] sm:$0xff]  ;;  %v6124_v43 = vpack.c.bf16 %v1172_v42, %v1167_v41  ;;  %v6142_v42 = vpack.c.bf16 %v1223_v37, %v1218_v36  ;;  %v1252_v37 = vld [vmem:[%s11372_s3 + $0x718] sm:$0xff] }
  0xff   : > { %6091 = vmatprep.subr.bf16.mxu0 %v6090_v46  ;;  %v6126_v45 = vpack.c.bf16 %v1183_v17, %v1178_v10  ;;  %v1177_v46 = vld [vmem:[%s11372_s3 + $0x4c0] sm:$0xff]  ;;  %v1215_v10 = vld [vmem:[%s11372_s3 + $0x5f0] sm:$0xff]  ;;  %v1220_v17 = vld [vmem:[%s11372_s3 + $0x618] sm:$0xff] }
 0x100   : > { %5837 = vmatpush1.bf16.msra.mxu1 %v5836_v52  ;;  %v6128_v51 = vpack.c.bf16 %v1182_v48, %v1177_v46  ;;  %v6130_v52 = vpack.c.bf16 %v1193_v50, %v1188_v49  ;;  %v1222_v46 = vld [vmem:[%s11372_s3 + $0x628] sm:$0xff]  ;;  %v1235_v15 = vld [vmem:[%s11372_s3 + $0x690] sm:$0xff] }
 0x101   : > { %5839 = vmatprep.subr.bf16.mxu1 %v5838_v53  ;;  %v573_v53 = vlaneseq  ;;  %v1247_v36 = vld [vmem:[%s11372_s3 + $0x6f0] sm:$0xff] }
 0x102   : > { %6093 = vmatpush1.bf16.msra.mxu0 %v6092_v56  ;;  %v8163_v56 = vld [vmem:[%s11371_s2] sm:$0xff] }
 0x103   : > { %6095 = vmatprep.subr.bf16.mxu0 %v6094_v59  ;;  %v8157_v54 = vshrl.u32 %v573_v53, 7  ;;  %v1226_v53 = vld [vmem:[%s11372_s3 + $0x648] sm:$0xff] }
 0x104   : > { %5841 = vmatpush1.bf16.msra.mxu1 %v5840_v47 }
 0x105   : > { %5843 = vmatprep.subr.bf16.mxu1 %v5842_v63  ;;  %v575_v55 = vsub.s32 0, %v8157_v54  ;;  %v579_v57 = vsub.s32 1, %v8157_v54  ;;  %v587_v28 = vsub.s32 3, %v8157_v54 }
 0x106   : > { %6097 = vmatpush1.bf16.msra.mxu0 %v6096_v0 }
 0x107   : > { %6099 = vmatprep.subr.bf16.mxu0 %v6098_v26  ;;  %v8169_v58 = vrot.slane %v8163_v56, %v575_v55  ;;  %v8174_v59 = vrot.slane %v8163_v56, %v579_v57  ;;  %v1187_v26 = vld [vmem:[%s11372_s3 + $0x510] sm:$0xff] }
 0x108   : > { %v6132_v7 = vpack.c.bf16 %v1192_v31, %v1187_v26  ;;  %v1230_v26 = vld [vmem:[%s11372_s3 + $0x668] sm:$0xff] }
 0x10a   : > { %6101 = vmatpush1.bf16.msra.mxu0 %v6100_v4  ;;  %v1198_v4 = vld [vmem:[%s11372_s3 + $0x568] sm:$0xff] }
 0x10b   : > { %6103 = vmatprep.subr.bf16.mxu0 %v6102_v22  ;;  %v1203_v22 = vld [vmem:[%s11372_s3 + $0x590] sm:$0xff] }
 0x10c   : > { %v6134_v14 = vpack.c.bf16 %v1203_v22, %v1198_v4  ;;  %v1241_v4 = vld [vmem:[%s11372_s3 + $0x6c0] sm:$0xff]  ;;  %v1238_v22 = vld [vmem:[%s11372_s3 + $0x6a8] sm:$0xff] }
 0x10e   : > { %6105 = vmatpush1.bf16.msra.mxu0 %v6104_v9  ;;  %v1200_v9 = vld [vmem:[%s11372_s3 + $0x578] sm:$0xff] }
 0x10f   : > { %6107 = vmatprep.subr.bf16.mxu0 %v6106_v11  ;;  %v5848_v23 = vpack.c.bf16 %v1200_v9, %v1195_v8 }
 0x112   : > { %6109 = vmatpush1.bf16.msra.mxu0 %v6108_v18  ;;  %v1206_v18 = vld [vmem:[%s11372_s3 + $0x5a8] sm:$0xff] }
 0x113   : > { %6111 = vmatprep.subr.bf16.mxu0 %v6110_v19  ;;  %v1211_v19 = vld [vmem:[%s11372_s3 + $0x5d0] sm:$0xff] }
 0x114   : > { %v5850_v29 = vpack.c.bf16 %v1211_v19, %v1206_v18  ;;  %v5862_v18 = vpack.c.bf16 %v1241_v4, %v1236_v3  ;;  %v1272_v3 = vld [vmem:[%s11372_s3 + $0x7b8] sm:$0xff] }
 0x115   : > { %v1276_v4 = vld [vmem:[%s11372_s3 + $0x7d8] sm:$0xff] }
 0x116   : > { %6113 = vmatpush1.bf16.msra.mxu0 %v6112_v25  ;;  %v1205_v25 = vld [vmem:[%s11372_s3 + $0x5a0] sm:$0xff] }
 0x117   : > { %6115 = vmatprep.subr.bf16.mxu0 %v6114_v27  ;;  %v1210_v27 = vld [vmem:[%s11372_s3 + $0x5c8] sm:$0xff] }
 0x118   : > { %v5852_v38 = vpack.c.bf16 %v1210_v27, %v1205_v25  ;;  %v1248_v25 = vld [vmem:[%s11372_s3 + $0x6f8] sm:$0xff]  ;;  %v1253_v27 = vld [vmem:[%s11372_s3 + $0x720] sm:$0xff] }
 0x11a   : > { %6117 = vmatpush1.bf16.msra.mxu0 %v6116_v33  ;;  %v1212_v33 = vld [vmem:[%s11372_s3 + $0x5d8] sm:$0xff] }
 0x11b   : > { %6119 = vmatprep.subr.bf16.mxu0 %v6118_v34  ;;  %v1216_v34 = vld [vmem:[%s11372_s3 + $0x5f8] sm:$0xff] }
 0x11c   : > { %v5854_v41 = vpack.c.bf16 %v1221_v35, %v1216_v34  ;;  %v6154_v35 = vpack.c.bf16 %v1253_v27, %v1248_v25  ;;  %v1282_v25 = vld [vmem:[%s11372_s3 + $0x808] sm:$0xff] }
 0x11d   : > { %v1286_v27 = vld [vmem:[%s11372_s3 + $0x828] sm:$0xff] }
 0x11e   : > { %6121 = vmatpush1.bf16.msra.mxu0 %v6120_v39  ;;  %v6140_v39 = vpack.c.bf16 %v1212_v33, %v1207_v32  ;;  %v1245_v32 = vld [vmem:[%s11372_s3 + $0x6e0] sm:$0xff]  ;;  %v1250_v33 = vld [vmem:[%s11372_s3 + $0x708] sm:$0xff] }
 0x11f   : > { %6123 = vmatprep.subr.bf16.mxu0 %v6122_v40  ;;  %v8266_v40 = vrot.slane %v8163_v56, %v587_v28 }
 0x122   : > { %6125 = vmatpush1.bf16.msra.mxu0 %v6124_v43 }
 0x123   : > { %6127 = vmatprep.subr.bf16.mxu0 %v6126_v45  ;;  %v1217_v45 = vld [vmem:[%s11372_s3 + $0x600] sm:$0xff] }
 0x124   : > { %v6144_v62 = vpack.c.bf16 %v1222_v46, %v1217_v45  ;;  %v1260_v45 = vld [vmem:[%s11372_s3 + $0x758] sm:$0xff] }
 0x126   : > { %6129 = vmatpush1.bf16.msra.mxu0 %v6128_v51 }
 0x127   : > { %6131 = vmatprep.subr.bf16.mxu0 %v6130_v52  ;;  %v5856_v52 = vpack.c.bf16 %v1220_v17, %v1215_v10  ;;  %v5868_v10 = vpack.c.bf16 %v1250_v33, %v1245_v32  ;;  %v6156_v17 = vpack.c.bf16 %v1252_v37, %v1247_v36  ;;  %v1293_v32 = vld [vmem:[%s11372_s3 + $0x860] sm:$0xff] }
 0x128   : > { %v1285_v37 = vld [vmem:[%s11372_s3 + $0x820] sm:$0xff] }
 0x174   : > { %v690_v60 = vpop.f32.mrb[0].mxu0  ;;  %v8176_v44 = vpop.f32.mrb[0].mxu1 }
 0x175   : > { %v691_v47 = vadd.f32 %v690_v60, %v8169_v58  ;;  %v692_v63 = vpop.f32.mrb[1].mxu0  ;;  %v8185_v0 = vpop.f32.mrb[1].mxu1  ;;  %v1231_v60 = vld [vmem:[%s11372_s3 + $0x670] sm:$0xff] }
 0x176   : > { %v693_v2 = vadd.f32 %v692_v63, %v8174_v59  ;;  %v1225_v63 = vld [vmem:[%s11372_s3 + $0x640] sm:$0xff] }
 0x177   : > { %v8214_v11 = vmax.f32 %v691_v47, 0.0  ;;  %v1233_v47 = vld [vmem:[%s11372_s3 + $0x680] sm:$0xff] }
 0x178   : > { %v8206_v5 = vmax.f32 %v693_v2, 0.0  ;;  %v1232_v2 = vld [vmem:[%s11372_s3 + $0x678] sm:$0xff] }
 0x17a   : > { %1836 = vmatprep.mubr.f32.mxu1 %v8206_v5  ;;  %2221 = vmatprep.mubr.f32.mxu0 %v8206_v5 }
 0x17b   : > { %1837 = vmatmul.mubr.f32.vlgmr.msra.gmra.mrb[8].mxu1 %v8214_v11  ;;  %2222 = vmatmul.mubr.f32.vlgmr.msra.gmra.mrb[12].mxu0 %v8214_v11 }
 0x17c   : > { %5845 = vmatpush1.bf16.msra.mxu1 %v5844_v6  ;;  %6133 = vmatpush1.bf16.msra.mxu0 %v6132_v7  ;;  %v1243_v6 = vld [vmem:[%s11372_s3 + $0x6d0] sm:$0xff]  ;;  %v5858_v7 = vpack.c.bf16 %v1231_v60, %v1226_v53  ;;  %v1268_v60 = vld [vmem:[%s11372_s3 + $0x798] sm:$0xff] }
 0x17d   : > { %5847 = vmatprep.subr.bf16.mxu1 %v5846_v13  ;;  %6135 = vmatprep.subr.bf16.mxu0 %v6134_v14  ;;  %v5860_v13 = vpack.c.bf16 %v1230_v26, %v1225_v63  ;;  %v6150_v19 = vpack.c.bf16 %v1243_v6, %v1238_v22  ;;  %v1271_v53 = vld [vmem:[%s11372_s3 + $0x7b0] sm:$0xff]  ;;  %v1270_v63 = vld [vmem:[%s11372_s3 + $0x7a8] sm:$0xff]  ;;  %v1281_v22 = vld [vmem:[%s11372_s3 + $0x800] sm:$0xff] }
 0x17e   : > { %v1278_v6 = vld [vmem:[%s11372_s3 + $0x7e8] sm:$0xff] }
 0x180   : > { %5849 = vmatpush1.bf16.msra.mxu1 %v5848_v23  ;;  %6137 = vmatpush1.bf16.msra.mxu0 %v6136_v24  ;;  %v1246_v23 = vld [vmem:[%s11372_s3 + $0x6e8] sm:$0xff]  ;;  %v1251_v24 = vld [vmem:[%s11372_s3 + $0x710] sm:$0xff] }
 0x181   : > { %5851 = vmatprep.subr.bf16.mxu1 %v5850_v29  ;;  %6139 = vmatprep.subr.bf16.mxu0 %v6138_v30  ;;  %v5864_v29 = vpack.c.bf16 %v1240_v16, %v1235_v15  ;;  %v6152_v30 = vpack.c.bf16 %v1242_v21, %v1237_v20  ;;  %v5866_v34 = vpack.c.bf16 %v1251_v24, %v1246_v23  ;;  %v1280_v20 = vld [vmem:[%s11372_s3 + $0x7f8] sm:$0xff]  ;;  %v1277_v24 = vld [vmem:[%s11372_s3 + $0x7e0] sm:$0xff] }
 0x182   : > { %v696_v43 = vpop.f32.mrb[2].mxu0  ;;  %v5878_v21 = vpack.c.bf16 %v1281_v22, %v1276_v4  ;;  %v6168_v36 = vpack.c.bf16 %v1282_v25, %v1277_v24  ;;  %v1305_v22 = vld [vmem:[%s11372_s3 + $0x8c0] sm:$0xff]  ;;  %v1323_v24 = vld [vmem:[%s11372_s3 + $0x950] sm:$0xff] }
 0x183   : > { %v697_v48 = vadd.f32 %v696_v43, %v8169_v58  ;;  %v698_v49 = vpop.f32.mrb[3].mxu0  ;;  %v8281_v50 = vpop.f32.mrb[2].mxu1  ;;  %v1228_v58 = vld [vmem:[%s11372_s3 + $0x658] sm:$0xff]  ;;  %v1255_v43 = vld [vmem:[%s11372_s3 + $0x730] sm:$0xff] }
 0x184   : > { %v699_v51 = vadd.f32 %v698_v49, %v8174_v59  ;;  %5853 = vmatpush1.bf16.msra.mxu1 %v5852_v38  ;;  %6141 = vmatpush1.bf16.msra.mxu0 %v6140_v39  ;;  %v8293_v61 = vpop.f32.mrb[3].mxu1  ;;  %v770_v59 = vadd.f32 %v8185_v0, %v8266_v40  ;;  %v1227_v0 = vld [vmem:[%s11372_s3 + $0x650] sm:$0xff]  ;;  %v6146_v8 = vpack.c.bf16 %v1233_v47, %v1228_v58  ;;  %v1256_v38 = vld [vmem:[%s11372_s3 + $0x738] sm:$0xff]  ;;  %v1261_v39 = vld [vmem:[%s11372_s3 + $0x760] sm:$0xff] }
 0x185   : > { %5855 = vmatprep.subr.bf16.mxu1 %v5854_v41  ;;  %6143 = vmatprep.subr.bf16.mxu0 %v6142_v42  ;;  %v8306_v31 = vmax.f32 %v697_v48, 0.0  ;;  %v6148_v14 = vpack.c.bf16 %v1232_v2, %v1227_v0  ;;  %v1258_v41 = vld [vmem:[%s11372_s3 + $0x748] sm:$0xff]  ;;  %v1263_v42 = vld [vmem:[%s11372_s3 + $0x770] sm:$0xff]  ;;  %v5870_v46 = vpack.c.bf16 %v1261_v39, %v1256_v38  ;;  %v1257_v49 = vld [vmem:[%s11372_s3 + $0x740] sm:$0xff] }
 0x186   : > { %v8308_v1 = vmax.f32 %v699_v51, 0.0  ;;  %v8329_v9 = vmax.f32 %v770_v59, 0.0  ;;  %v6158_v48 = vpack.c.bf16 %v1263_v42, %v1258_v41  ;;  %v1262_v51 = vld [vmem:[%s11372_s3 + $0x768] sm:$0xff]  ;;  %v1273_v58 = vld [vmem:[%s11372_s3 + $0x7c0] sm:$0xff]  ;;  %v5872_v59 = vpack.c.bf16 %v1260_v45, %v1255_v43  ;;  %v1267_v2 = vld [vmem:[%s11372_s3 + $0x790] sm:$0xff] }
 0x187   : > { %v1265_v47 = vld [vmem:[%s11372_s3 + $0x780] sm:$0xff]  ;;  %v6162_v0 = vpack.c.bf16 %v1273_v58, %v1268_v60  ;;  %v1290_v38 = vld [vmem:[%s11372_s3 + $0x848] sm:$0xff]  ;;  %v1292_v43 = vld [vmem:[%s11372_s3 + $0x858] sm:$0xff] }
 0x188   : > { %1842 = vmatprep.mubr.f32.mxu1 %v8308_v1  ;;  %5857 = vmatpush1.bf16.msra.mxu1 %v5856_v52  ;;  %v1266_v52 = vld [vmem:[%s11372_s3 + $0x788] sm:$0xff]  ;;  %v5876_v16 = vpack.c.bf16 %v1270_v63, %v1265_v47  ;;  %v1296_v45 = vld [vmem:[%s11372_s3 + $0x878] sm:$0xff] }
 0x189   : > { %2227 = vmatprep.mubr.f32.mxu0 %v8308_v1  ;;  %6145 = vmatpush1.bf16.msra.mxu0 %v6144_v62  ;;  %v6160_v62 = vpack.c.bf16 %v1262_v51, %v1257_v49  ;;  %v5874_v26 = vpack.c.bf16 %v1271_v53, %v1266_v52  ;;  %v1303_v49 = vld [vmem:[%s11372_s3 + $0x8b0] sm:$0xff]  ;;  %v5884_v51 = vpack.c.bf16 %v1290_v38, %v1285_v37  ;;  %v1300_v60 = vld [vmem:[%s11372_s3 + $0x898] sm:$0xff]  ;;  %v1302_v47 = vld [vmem:[%s11372_s3 + $0x8a8] sm:$0xff] }
 0x18a   : > { %1843 = vmatmul.mubr.f32.gmra.mrb[10].mxu1 %v8306_v31  ;;  %2228 = vmatmul.mubr.f32.gmra.mrb[14].mxu0 %v8306_v31  ;;  %v1295_v53 = vld [vmem:[%s11372_s3 + $0x870] sm:$0xff]  ;;  %v1306_v63 = vld [vmem:[%s11372_s3 + $0x8c8] sm:$0xff] }
 0x18b   : > { %1913 = vmatprep.mubr.f32.mxu1 %v8329_v9  ;;  %2298 = vmatprep.mubr.f32.mxu0 %v8329_v9  ;;  %v1322_v37 = vld [vmem:[%s11372_s3 + $0x948] sm:$0xff] }
 0x18c   : > { %5859 = vmatprep.subr.bf16.mxu1 %v5858_v7  ;;  %6147 = vmatprep.subr.bf16.mxu0 %v6146_v8  ;;  %v1283_v7 = vld [vmem:[%s11372_s3 + $0x810] sm:$0xff]  ;;  %v1326_v38 = vld [vmem:[%s11372_s3 + $0x968] sm:$0xff] }
 0x18d   : > { %5861 = vmatpush1.bf16.msra.mxu1 %v5860_v13  ;;  %6149 = vmatpush1.bf16.msra.mxu0 %v6148_v14  ;;  %v6166_v23 = vpack.c.bf16 %v1283_v7, %v1278_v6  ;;  %v1310_v6 = vld [vmem:[%s11372_s3 + $0x8e8] sm:$0xff] }
 0x18e   : > { %5863 = vmatprep.subr.bf16.mxu1 %v5862_v18  ;;  %6151 = vmatprep.subr.bf16.mxu0 %v6150_v19  ;;  %v6164_v18 = vpack.c.bf16 %v1272_v3, %v1267_v2  ;;  %v1275_v19 = vld [vmem:[%s11372_s3 + $0x7d0] sm:$0xff]  ;;  %v1313_v2 = vld [vmem:[%s11372_s3 + $0x900] sm:$0xff]  ;;  %v5888_v3 = vpack.c.bf16 %v1300_v60, %v1295_v53  ;;  %v5892_v25 = vpack.c.bf16 %v1310_v6, %v1305_v22  ;;  %v1332_v60 = vld [vmem:[%s11372_s3 + $0x998] sm:$0xff] }
 0x18f   : > { %v1327_v53 = vld [vmem:[%s11372_s3 + $0x970] sm:$0xff]  ;;  %v1337_v6 = vld [vmem:[%s11372_s3 + $0x9c0] sm:$0xff] }
 0x191   : > { %5865 = vmatpush1.bf16.msra.mxu1 %v5864_v29  ;;  %6153 = vmatpush1.bf16.msra.mxu0 %v6152_v30  ;;  %v1291_v29 = vld [vmem:[%s11372_s3 + $0x850] sm:$0xff]  ;;  %v1288_v30 = vld [vmem:[%s11372_s3 + $0x838] sm:$0xff] }
 0x192   : > { %5867 = vmatprep.subr.bf16.mxu1 %v5866_v34  ;;  %6155 = vmatprep.subr.bf16.mxu0 %v6154_v35  ;;  %v5880_v35 = vpack.c.bf16 %v1280_v20, %v1275_v19  ;;  %v5882_v42 = vpack.c.bf16 %v1291_v29, %v1286_v27  ;;  %v1312_v19 = vld [vmem:[%s11372_s3 + $0x8f8] sm:$0xff]  ;;  %v1315_v29 = vld [vmem:[%s11372_s3 + $0x910] sm:$0xff] }
 0x193   : > { %v1316_v20 = vld [vmem:[%s11372_s3 + $0x918] sm:$0xff] }
 0x195   : > { %5869 = vmatpush1.bf16.msra.mxu1 %v5868_v10  ;;  %6157 = vmatpush1.bf16.msra.mxu0 %v6156_v17  ;;  %v6170_v10 = vpack.c.bf16 %v1293_v32, %v1288_v30  ;;  %v1287_v17 = vld [vmem:[%s11372_s3 + $0x830] sm:$0xff]  ;;  %v1320_v30 = vld [vmem:[%s11372_s3 + $0x938] sm:$0xff] }
 0x196   : > { %5871 = vmatprep.subr.bf16.mxu1 %v5870_v46  ;;  %6159 = vmatprep.subr.bf16.mxu0 %v6158_v48  ;;  %v1301_v46 = vld [vmem:[%s11372_s3 + $0x8a0] sm:$0xff]  ;;  %v1298_v48 = vld [vmem:[%s11372_s3 + $0x888] sm:$0xff]  ;;  %v6172_v52 = vpack.c.bf16 %v1292_v43, %v1287_v17  ;;  %v5896_v43 = vpack.c.bf16 %v1320_v30, %v1315_v29 }
 0x197   : > { %v5886_v58 = vpack.c.bf16 %v1301_v46, %v1296_v45  ;;  %v1333_v17 = vld [vmem:[%s11372_s3 + $0x9a0] sm:$0xff] }
 0x198   : > { %v8432_v8 = vpop.f32.mrb[4].mxu0  ;;  %v8434_v13 = vpop.f32.mrb[4].mxu1  ;;  %v1325_v46 = vld [vmem:[%s11372_s3 + $0x960] sm:$0xff] }
 0x199   : > { %5873 = vmatpush1.bf16.msra.mxu1 %v5872_v59  ;;  %6161 = vmatpush1.bf16.msra.mxu0 %v6160_v62  ;;  %v8436_v14 = vpop.f32.mrb[5].mxu0  ;;  %v8438_v15 = vpop.f32.mrb[5].mxu1  ;;  %v6174_v59 = vpack.c.bf16 %v1303_v49, %v1298_v48  ;;  %v1297_v62 = vld [vmem:[%s11372_s3 + $0x880] sm:$0xff]  ;;  %v1330_v48 = vld [vmem:[%s11372_s3 + $0x988] sm:$0xff]  ;;  %v583_v49 = vsub.s32 2, %v8157_v54 }
 0x19a   : > { %5875 = vmatprep.subr.bf16.mxu1 %v5874_v26  ;;  %6163 = vmatprep.subr.bf16.mxu0 %v6162_v0  ;;  %v1311_v26 = vld [vmem:[%s11372_s3 + $0x8f0] sm:$0xff]  ;;  %v1308_v0 = vld [vmem:[%s11372_s3 + $0x8d8] sm:$0xff]  ;;  %v6176_v4 = vpack.c.bf16 %v1302_v47, %v1297_v62  ;;  %v1338_v62 = vld [vmem:[%s11372_s3 + $0x9c8] sm:$0xff] }
 0x19b   : > { %v5890_v7 = vpack.c.bf16 %v1311_v26, %v1306_v63  ;;  %v1343_v47 = vld [vmem:[%s11372_s3 + $0x9f0] sm:$0xff]  ;;  %v5900_v63 = vpack.c.bf16 %v1330_v48, %v1325_v46  ;;  %v6188_v26 = vpack.c.bf16 %v1332_v60, %v1327_v53  ;;  %v1345_v30 = vld [vmem:[%s11372_s3 + $0xa00] sm:$0xff]  ;;  %v1360_v46 = vld [vmem:[%s11372_s3 + $0xa78] sm:$0xff] }
 0x19c   : > { %v8464_v33 = vpop.f32.mrb[6].mxu0  ;;  %v8466_v34 = vpop.f32.mrb[6].mxu1  ;;  %v6190_v22 = vpack.c.bf16 %v1343_v47, %v1338_v62  ;;  %v1362_v60 = vld [vmem:[%s11372_s3 + $0xa88] sm:$0xff]  ;;  %v1368_v62 = vld [vmem:[%s11372_s3 + $0xab8] sm:$0xff]  ;;  %v1373_v47 = vld [vmem:[%s11372_s3 + $0xae0] sm:$0xff] }
 0x19d   : > { %5877 = vmatpush1.bf16.msra.mxu1 %v5876_v16  ;;  %6165 = vmatpush1.bf16.msra.mxu0 %v6164_v18  ;;  %v8474_v39 = vpop.f32.mrb[7].mxu0  ;;  %v8476_v41 = vpop.f32.mrb[7].mxu1  ;;  %v6178_v16 = vpack.c.bf16 %v1313_v2, %v1308_v0  ;;  %v1307_v18 = vld [vmem:[%s11372_s3 + $0x8d0] sm:$0xff]  ;;  %v1340_v2 = vld [vmem:[%s11372_s3 + $0x9d8] sm:$0xff] }
 0x19e   : > { %5879 = vmatprep.subr.bf16.mxu1 %v5878_v21  ;;  %6167 = vmatprep.subr.bf16.mxu0 %v6166_v23  ;;  %v1321_v21 = vld [vmem:[%s11372_s3 + $0x940] sm:$0xff]  ;;  %v1318_v23 = vld [vmem:[%s11372_s3 + $0x928] sm:$0xff]  ;;  %v6180_v27 = vpack.c.bf16 %v1312_v19, %v1307_v18  ;;  %v1335_v0 = vld [vmem:[%s11372_s3 + $0x9b0] sm:$0xff]  ;;  %v595_v18 = vsub.s32 5, %v8157_v54 }
 0x19f   : > { %v5894_v32 = vpack.c.bf16 %v1321_v21, %v1316_v20  ;;  %v1351_v19 = vld [vmem:[%s11372_s3 + $0xa30] sm:$0xff]  ;;  %v1348_v20 = vld [vmem:[%s11372_s3 + $0xa18] sm:$0xff]  ;;  %v1353_v21 = vld [vmem:[%s11372_s3 + $0xa40] sm:$0xff] }
 0x1a0   : > { %v6194_v29 = vpack.c.bf16 %v1353_v21, %v1348_v20  ;;  %v1381_v20 = vld [vmem:[%s11372_s3 + $0xb20] sm:$0xff] }
 0x1a1   : > { %5881 = vmatpush1.bf16.msra.mxu1 %v5880_v35  ;;  %6169 = vmatpush1.bf16.msra.mxu0 %v6168_v36  ;;  %v6182_v35 = vpack.c.bf16 %v1323_v24, %v1318_v23  ;;  %v1317_v36 = vld [vmem:[%s11372_s3 + $0x920] sm:$0xff]  ;;  %v5904_v23 = vpack.c.bf16 %v1340_v2, %v1335_v0 }
 0x1a2   : > { %5883 = vmatprep.subr.bf16.mxu1 %v5882_v42  ;;  %6171 = vmatprep.subr.bf16.mxu0 %v6170_v10  ;;  %v1331_v42 = vld [vmem:[%s11372_s3 + $0x990] sm:$0xff]  ;;  %v1328_v10 = vld [vmem:[%s11372_s3 + $0x978] sm:$0xff]  ;;  %v6184_v45 = vpack.c.bf16 %v1322_v37, %v1317_v36  ;;  %v8631_v36 = vrot.slane %v8163_v56, %v595_v18 }
 0x1a3   : > { %v1352_v37 = vld [vmem:[%s11372_s3 + $0xa38] sm:$0xff] }
 0x1a4   : > { %v1372_v18 = vld [vmem:[%s11372_s3 + $0xad8] sm:$0xff] }
 0x1a5   : > { %5885 = vmatpush1.bf16.msra.mxu1 %v5884_v51  ;;  %6173 = vmatpush1.bf16.msra.mxu0 %v6172_v52  ;;  %v5898_v51 = vpack.c.bf16 %v1331_v42, %v1326_v38  ;;  %v6186_v52 = vpack.c.bf16 %v1333_v17, %v1328_v10  ;;  %v1356_v38 = vld [vmem:[%s11372_s3 + $0xa58] sm:$0xff]  ;;  %v1361_v42 = vld [vmem:[%s11372_s3 + $0xa80] sm:$0xff] }
 0x1a6   : > { %5887 = vmatprep.subr.bf16.mxu1 %v5886_v58  ;;  %6175 = vmatprep.subr.bf16.mxu0 %v6174_v59  ;;  %v1336_v58 = vld [vmem:[%s11372_s3 + $0x9b8] sm:$0xff]  ;;  %v1341_v59 = vld [vmem:[%s11372_s3 + $0x9e0] sm:$0xff] }
 0x1a9   : > { %5889 = vmatpush1.bf16.msra.mxu1 %v5888_v3  ;;  %6177 = vmatpush1.bf16.msra.mxu0 %v6176_v4  ;;  %v584_v3 = vrot.slane %v8163_v56, %v583_v49  ;;  %v5902_v4 = vpack.c.bf16 %v1341_v59, %v1336_v58  ;;  %v1358_v56 = vld [vmem:[%s11372_s3 + $0xa68] sm:$0xff] }
 0x1aa   : > { %5891 = vmatprep.subr.bf16.mxu1 %v5890_v7  ;;  %6179 = vmatprep.subr.bf16.mxu0 %v6178_v16  ;;  %v1342_v7 = vld [vmem:[%s11372_s3 + $0x9e8] sm:$0xff] }
 0x1ab   : > { %v1346_v16 = vld [vmem:[%s11372_s3 + $0xa08] sm:$0xff]  ;;  %v6192_v24 = vpack.c.bf16 %v1342_v7, %v1337_v6  ;;  %v774_v17 = vadd.f32 %v8281_v50, %v584_v3  ;;  %v1357_v50 = vld [vmem:[%s11372_s3 + $0xa60] sm:$0xff] }
 0x1ac   : > { %v1366_v58 = vld [vmem:[%s11372_s3 + $0xaa8] sm:$0xff]  ;;  %v6200_v2 = vpack.c.bf16 %v1362_v60, %v1357_v50  ;;  %v1392_v50 = vld [vmem:[%s11372_s3 + $0xb78] sm:$0xff] }
 0x1ad   : > { %5893 = vmatpush1.bf16.msra.mxu1 %v5892_v25  ;;  %6181 = vmatpush1.bf16.msra.mxu0 %v6180_v27  ;;  %v768_v25 = vadd.f32 %v8176_v44, %v584_v3  ;;  %v5906_v27 = vpack.c.bf16 %v1351_v19, %v1346_v16  ;;  %v1347_v44 = vld [vmem:[%s11372_s3 + $0xa10] sm:$0xff]  ;;  %v8687_v0 = vmax.f32 %v774_v17, 0.0  ;;  %v1365_v3 = vld [vmem:[%s11372_s3 + $0xaa0] sm:$0xff]  ;;  %v6202_v16 = vpack.c.bf16 %v1373_v47, %v1368_v62  ;;  %v1376_v19 = vld [vmem:[%s11372_s3 + $0xaf8] sm:$0xff] }
 0x1ae   : > { %5895 = vmatprep.subr.bf16.mxu1 %v5894_v32  ;;  %6183 = vmatprep.subr.bf16.mxu0 %v6182_v35  ;;  %v1350_v32 = vld [vmem:[%s11372_s3 + $0xa28] sm:$0xff]  ;;  %v776_v35 = vadd.f32 %v8293_v61, %v8266_v40  ;;  %v1363_v40 = vld [vmem:[%s11372_s3 + $0xa90] sm:$0xff]  ;;  %v1396_v60 = vld [vmem:[%s11372_s3 + $0xb98] sm:$0xff] }
 0x1af   : > { %v5908_v61 = vpack.c.bf16 %v1350_v32, %v1345_v30  ;;  %v8651_v10 = vmax.f32 %v768_v25, 0.0  ;;  %v6198_v53 = vpack.c.bf16 %v1363_v40, %v1358_v56  ;;  %v5918_v30 = vpack.c.bf16 %v1381_v20, %v1376_v19  ;;  %v1375_v32 = vld [vmem:[%s11372_s3 + $0xaf0] sm:$0xff]  ;;  %v1388_v40 = vld [vmem:[%s11372_s3 + $0xb58] sm:$0xff]  ;;  %v1413_v20 = vld [vmem:[%s11372_s3 + $0xc20] sm:$0xff] }
 0x1b0   : > { %v8660_v48 = vmax.f32 %v776_v35, 0.0  ;;  %v1380_v35 = vld [vmem:[%s11372_s3 + $0xb18] sm:$0xff]  ;;  %v1391_v56 = vld [vmem:[%s11372_s3 + $0xb70] sm:$0xff] }
 0x1b1   : > { %5897 = vmatpush1.bf16.msra.mxu1 %v5896_v43  ;;  %6185 = vmatpush1.bf16.msra.mxu0 %v6184_v45  ;;  %v6196_v43 = vpack.c.bf16 %v1352_v37, %v1347_v44  ;;  %v1355_v45 = vld [vmem:[%s11372_s3 + $0xa50] sm:$0xff]  ;;  %v1377_v44 = vld [vmem:[%s11372_s3 + $0xb00] sm:$0xff]  ;;  %v5920_v17 = vpack.c.bf16 %v1380_v35, %v1375_v32  ;;  %v1408_v19 = vld [vmem:[%s11372_s3 + $0xbf8] sm:$0xff] }
 0x1b2   : > { %5899 = vmatprep.subr.bf16.mxu1 %v5898_v51  ;;  %6187 = vmatprep.subr.bf16.mxu0 %v6186_v52  ;;  %v847_v51 = vadd.f32 %v8436_v14, %v8631_v36  ;;  %v5910_v52 = vpack.c.bf16 %v1361_v42, %v1356_v38  ;;  %v1371_v14 = vld [vmem:[%s11372_s3 + $0xad0] sm:$0xff]  ;;  %v1382_v38 = vld [vmem:[%s11372_s3 + $0xb28] sm:$0xff]  ;;  %v6218_v32 = vpack.c.bf16 %v1413_v20, %v1408_v19  ;;  %v1412_v35 = vld [vmem:[%s11372_s3 + $0xc18] sm:$0xff] }
 0x1b3   : > { %v5914_v7 = vpack.c.bf16 %v1371_v14, %v1366_v58  ;;  %v1386_v42 = vld [vmem:[%s11372_s3 + $0xb48] sm:$0xff]  ;;  %v1401_v58 = vld [vmem:[%s11372_s3 + $0xbc0] sm:$0xff]  ;;  %v1403_v62 = vld [vmem:[%s11372_s3 + $0xbd0] sm:$0xff] }
 0x1b4   : > { %v8699_v6 = vmax.f32 %v847_v51, 0.0  ;;  %v1390_v51 = vld [vmem:[%s11372_s3 + $0xb68] sm:$0xff] }
 0x1b5   : > { %5901 = vmatpush1.bf16.msra.mxu1 %v5900_v63  ;;  %6189 = vmatpush1.bf16.msra.mxu0 %v6188_v26  ;;  %v5912_v26 = vpack.c.bf16 %v1360_v46, %v1355_v45  ;;  %v5922_v45 = vpack.c.bf16 %v1391_v56, %v1386_v42  ;;  %v1385_v46 = vld [vmem:[%s11372_s3 + $0xb40] sm:$0xff]  ;;  %v1398_v14 = vld [vmem:[%s11372_s3 + $0xba8] sm:$0xff]  ;;  %v1423_v42 = vld [vmem:[%s11372_s3 + $0xc70] sm:$0xff] }
 0x1b6   : > { %5903 = vmatprep.subr.bf16.mxu1 %v5902_v4  ;;  %6191 = vmatprep.subr.bf16.mxu0 %v6190_v22  ;;  %v1370_v4 = vld [vmem:[%s11372_s3 + $0xac8] sm:$0xff]  ;;  %v1367_v22 = vld [vmem:[%s11372_s3 + $0xab0] sm:$0xff]  ;;  %v5924_v47 = vpack.c.bf16 %v1390_v51, %v1385_v46 }
 0x1b7   : > { %v1422_v51 = vld [vmem:[%s11372_s3 + $0xc68] sm:$0xff] }
 0x1b9   : > { %5905 = vmatpush1.bf16.msra.mxu1 %v5904_v23  ;;  %6193 = vmatpush1.bf16.msra.mxu0 %v6192_v24  ;;  %v1378_v23 = vld [vmem:[%s11372_s3 + $0xb08] sm:$0xff]  ;;  %v1383_v24 = vld [vmem:[%s11372_s3 + $0xb30] sm:$0xff] }
 0x1ba   : > { %5907 = vmatprep.subr.bf16.mxu1 %v5906_v27  ;;  %6195 = vmatprep.subr.bf16.mxu0 %v6194_v29  ;;  %v5916_v27 = vpack.c.bf16 %v1370_v4, %v1365_v3  ;;  %v6204_v29 = vpack.c.bf16 %v1372_v18, %v1367_v22  ;;  %v6206_v37 = vpack.c.bf16 %v1383_v24, %v1378_v23  ;;  %v1400_v3 = vld [vmem:[%s11372_s3 + $0xbb8] sm:$0xff]  ;;  %v1397_v4 = vld [vmem:[%s11372_s3 + $0xba0] sm:$0xff]  ;;  %v1411_v18 = vld [vmem:[%s11372_s3 + $0xc10] sm:$0xff] }
 0x1bb   : > { %v6214_v22 = vpack.c.bf16 %v1403_v62, %v1398_v14 }
 0x1bc   : > { %1914 = vmatmul.mubr.f32.vlgmr.msra.gmra.mrb[8].mxu1 %v8651_v10  ;;  %2299 = vmatmul.mubr.f32.vlgmr.msra.gmra.mrb[12].mxu0 %v8651_v10  ;;  %v8675_v59 = vpop.f32.mrb[8].mxu0 }
 0x1bd   : > { %1919 = vmatprep.mubr.f32.mxu1 %v8660_v48  ;;  %5909 = vmatpush1.bf16.msra.mxu1 %v5908_v61  ;;  %v1000_v63 = vpop.f32.mrb[9].mxu0  ;;  %v1393_v61 = vld [vmem:[%s11372_s3 + $0xb80] sm:$0xff] }
 0x1be   : > { %2304 = vmatprep.mubr.f32.mxu0 %v8660_v48  ;;  %6197 = vmatpush1.bf16.msra.mxu0 %v6196_v43  ;;  %v6208_v43 = vpack.c.bf16 %v1382_v38, %v1377_v44  ;;  %v1416_v44 = vld [vmem:[%s11372_s3 + $0xc38] sm:$0xff]  ;;  %v1418_v38 = vld [vmem:[%s11372_s3 + $0xc48] sm:$0xff] }
 0x1bf   : > { %5911 = vmatprep.subr.bf16.mxu1 %v5910_v52  ;;  %6199 = vmatprep.subr.bf16.mxu0 %v6198_v53  ;;  %v1387_v52 = vld [vmem:[%s11372_s3 + $0xb50] sm:$0xff]  ;;  %v6210_v53 = vpack.c.bf16 %v1393_v61, %v1388_v40  ;;  %v6222_v46 = vpack.c.bf16 %v1423_v42, %v1418_v38 }
 0x1c0   : > { %1920 = vmatmul.mubr.f32.gmra.mrb[10].mxu1 %v8687_v0  ;;  %2305 = vmatmul.mubr.f32.gmra.mrb[14].mxu0 %v8687_v0  ;;  %v8712_v21 = vpop.f32.mrb[10].mxu0  ;;  %v6212_v63 = vpack.c.bf16 %v1392_v50, %v1387_v52  ;;  %v1426_v52 = vld [vmem:[%s11372_s3 + $0xc88] sm:$0xff]  ;;  %v1428_v50 = vld [vmem:[%s11372_s3 + $0xc98] sm:$0xff] }
 0x1c1   : > { %5913 = vmatpush1.bf16.msra.mxu1 %v5912_v26  ;;  %1990 = vmatprep.mubr.f32.mxu1 %v8699_v6  ;;  %v1005_v25 = vpop.f32.mrb[11].mxu0  ;;  %v5926_v26 = vpack.c.bf16 %v1401_v58, %v1396_v60  ;;  %v1433_v60 = vld [vmem:[%s11372_s3 + $0xcc0] sm:$0xff] }
 0x1c2   : > { %6201 = vmatpush1.bf16.msra.mxu0 %v6200_v2  ;;  %2375 = vmatprep.mubr.f32.mxu0 %v8699_v6  ;;  %v1395_v2 = vld [vmem:[%s11372_s3 + $0xb90] sm:$0xff] }
 0x1c3   : > { %5915 = vmatprep.subr.bf16.mxu1 %v5914_v7  ;;  %6203 = vmatprep.subr.bf16.mxu0 %v6202_v16  ;;  %v1402_v7 = vld [vmem:[%s11372_s3 + $0xbc8] sm:$0xff]  ;;  %v5928_v23 = vpack.c.bf16 %v1400_v3, %v1395_v2  ;;  %v6226_v2 = vpack.c.bf16 %v1433_v60, %v1428_v50  ;;  %v1432_v3 = vld [vmem:[%s11372_s3 + $0xcb8] sm:$0xff] }
 0x1c4   : > { %v1406_v16 = vld [vmem:[%s11372_s3 + $0xbe8] sm:$0xff]  ;;  %v6216_v24 = vpack.c.bf16 %v1402_v7, %v1397_v4  ;;  %v1436_v4 = vld [vmem:[%s11372_s3 + $0xcd8] sm:$0xff] }
 0x1c5   : > { %5917 = vmatpush1.bf16.msra.mxu1 %v5916_v27  ;;  %v5930_v25 = vpack.c.bf16 %v1411_v18, %v1406_v16  ;;  %v1405_v27 = vld [vmem:[%s11372_s3 + $0xbe0] sm:$0xff]  ;;  %v1438_v7 = vld [vmem:[%s11372_s3 + $0xce8] sm:$0xff]  ;;  %v1443_v16 = vld [vmem:[%s11372_s3 + $0xd10] sm:$0xff] }
 0x1c6   : > { %6205 = vmatpush1.bf16.msra.mxu0 %v6204_v29  ;;  %5919 = vmatprep.subr.bf16.mxu1 %v5918_v30  ;;  %v1410_v29 = vld [vmem:[%s11372_s3 + $0xc08] sm:$0xff]  ;;  %v1407_v30 = vld [vmem:[%s11372_s3 + $0xbf0] sm:$0xff] }
 0x1c7   : > { %6207 = vmatprep.subr.bf16.mxu0 %v6206_v37  ;;  %v1421_v37 = vld [vmem:[%s11372_s3 + $0xc60] sm:$0xff]  ;;  %v5932_v56 = vpack.c.bf16 %v1410_v29, %v1405_v27  ;;  %v6220_v40 = vpack.c.bf16 %v1412_v35, %v1407_v30  ;;  %v6230_v27 = vpack.c.bf16 %v1443_v16, %v1438_v7  ;;  %v1442_v29 = vld [vmem:[%s11372_s3 + $0xd08] sm:$0xff]  ;;  %v1448_v35 = vld [vmem:[%s11372_s3 + $0xd38] sm:$0xff] }
 0x1c8   : > { %v5934_v61 = vpack.c.bf16 %v1421_v37, %v1416_v44  ;;  %v1446_v30 = vld [vmem:[%s11372_s3 + $0xd28] sm:$0xff]  ;;  %v1453_v44 = vld [vmem:[%s11372_s3 + $0xd60] sm:$0xff] }
 0x1c9   : > { %5921 = vmatpush1.bf16.msra.mxu1 %v5920_v17  ;;  %v1415_v17 = vld [vmem:[%s11372_s3 + $0xc30] sm:$0xff] }
 0x1ca   : > { %6209 = vmatpush1.bf16.msra.mxu0 %v6208_v43  ;;  %5923 = vmatprep.subr.bf16.mxu1 %v5922_v45  ;;  %v1420_v43 = vld [vmem:[%s11372_s3 + $0xc58] sm:$0xff]  ;;  %v1417_v45 = vld [vmem:[%s11372_s3 + $0xc40] sm:$0xff] }
 0x1cb   : > { %6211 = vmatprep.subr.bf16.mxu0 %v6210_v53  ;;  %v1431_v53 = vld [vmem:[%s11372_s3 + $0xcb0] sm:$0xff]  ;;  %v5936_v58 = vpack.c.bf16 %v1420_v43, %v1415_v17  ;;  %v6224_v14 = vpack.c.bf16 %v1422_v51, %v1417_v45  ;;  %v6234_v17 = vpack.c.bf16 %v1453_v44, %v1448_v35  ;;  %v1452_v43 = vld [vmem:[%s11372_s3 + $0xd58] sm:$0xff]  ;;  %v1458_v51 = vld [vmem:[%s11372_s3 + $0xd88] sm:$0xff] }
 0x1cc   : > { %v5938_v62 = vpack.c.bf16 %v1431_v53, %v1426_v52  ;;  %v1456_v45 = vld [vmem:[%s11372_s3 + $0xd78] sm:$0xff]  ;;  %v1463_v52 = vld [vmem:[%s11372_s3 + $0xdb0] sm:$0xff] }
 0x1cd   : > { %5925 = vmatpush1.bf16.msra.mxu1 %v5924_v47  ;;  %v1425_v47 = vld [vmem:[%s11372_s3 + $0xc80] sm:$0xff] }
 0x1ce   : > { %6213 = vmatpush1.bf16.msra.mxu0 %v6212_v63  ;;  %5927 = vmatprep.subr.bf16.mxu1 %v5926_v26  ;;  %v1430_v63 = vld [vmem:[%s11372_s3 + $0xca8] sm:$0xff]  ;;  %v1427_v26 = vld [vmem:[%s11372_s3 + $0xc90] sm:$0xff] }
 0x1cf   : > { %6215 = vmatprep.subr.bf16.mxu0 %v6214_v22  ;;  %v1441_v22 = vld [vmem:[%s11372_s3 + $0xd00] sm:$0xff]  ;;  %v5940_v18 = vpack.c.bf16 %v1430_v63, %v1425_v47  ;;  %v6228_v19 = vpack.c.bf16 %v1432_v3, %v1427_v26  ;;  %v6238_v47 = vpack.c.bf16 %v1463_v52, %v1458_v51  ;;  %v1462_v63 = vld [vmem:[%s11372_s3 + $0xda8] sm:$0xff]  ;;  %v1468_v3 = vld [vmem:[%s11372_s3 + $0xdd8] sm:$0xff]  ;;  %v591_v51 = vsub.s32 4, %v8157_v54 }
 0x1d0   : > { %v5942_v20 = vpack.c.bf16 %v1441_v22, %v1436_v4  ;;  %v1466_v26 = vld [vmem:[%s11372_s3 + $0xdc8] sm:$0xff]  ;;  %v1473_v4 = vld [vmem:[%s11372_s3 + $0xe00] sm:$0xff] }
 0x1d1   : > { %5929 = vmatpush1.bf16.msra.mxu1 %v5928_v23  ;;  %v1435_v23 = vld [vmem:[%s11372_s3 + $0xcd0] sm:$0xff] }
 0x1d2   : > { %6217 = vmatpush1.bf16.msra.mxu0 %v6216_v24  ;;  %5931 = vmatprep.subr.bf16.mxu1 %v5930_v25  ;;  %v1440_v24 = vld [vmem:[%s11372_s3 + $0xcf8] sm:$0xff]  ;;  %v1437_v25 = vld [vmem:[%s11372_s3 + $0xce0] sm:$0xff] }
 0x1d3   : > { %6219 = vmatprep.subr.bf16.mxu0 %v6218_v32  ;;  %v1451_v32 = vld [vmem:[%s11372_s3 + $0xd50] sm:$0xff]  ;;  %v5944_v37 = vpack.c.bf16 %v1440_v24, %v1435_v23  ;;  %v6232_v38 = vpack.c.bf16 %v1442_v29, %v1437_v25  ;;  %v6242_v23 = vpack.c.bf16 %v1473_v4, %v1468_v3  ;;  %v1472_v24 = vld [vmem:[%s11372_s3 + $0xdf8] sm:$0xff]  ;;  %v1478_v29 = vld [vmem:[%s11372_s3 + $0xe28] sm:$0xff] }
 0x1d4   : > { %v5946_v42 = vpack.c.bf16 %v1451_v32, %v1446_v30  ;;  %v1476_v25 = vld [vmem:[%s11372_s3 + $0xe18] sm:$0xff]  ;;  %v1483_v30 = vld [vmem:[%s11372_s3 + $0xe50] sm:$0xff]  ;;  %v9014_v4 = vld [vmem:[%s11371_s2] sm:$0xff] }
 0x1d5   : > { %5933 = vmatpush1.bf16.msra.mxu1 %v5932_v56  ;;  %v1445_v56 = vld [vmem:[%s11372_s3 + $0xd20] sm:$0xff] }
 0x1d6   : > { %6221 = vmatpush1.bf16.msra.mxu0 %v6220_v40  ;;  %5935 = vmatprep.subr.bf16.mxu1 %v5934_v61  ;;  %v1450_v40 = vld [vmem:[%s11372_s3 + $0xd48] sm:$0xff]  ;;  %v1447_v61 = vld [vmem:[%s11372_s3 + $0xd30] sm:$0xff] }
 0x1d7   : > { %6223 = vmatprep.subr.bf16.mxu0 %v6222_v46  ;;  %v1461_v46 = vld [vmem:[%s11372_s3 + $0xda0] sm:$0xff]  ;;  %v5948_v53 = vpack.c.bf16 %v1450_v40, %v1445_v56  ;;  %v6236_v50 = vpack.c.bf16 %v1452_v43, %v1447_v61  ;;  %v6246_v56 = vpack.c.bf16 %v1483_v30, %v1478_v29  ;;  %v1482_v40 = vld [vmem:[%s11372_s3 + $0xe48] sm:$0xff]  ;;  %v1488_v43 = vld [vmem:[%s11372_s3 + $0xe78] sm:$0xff] }
 0x1d8   : > { %v5950_v60 = vpack.c.bf16 %v1461_v46, %v1456_v45  ;;  %v1486_v61 = vld [vmem:[%s11372_s3 + $0xe68] sm:$0xff]  ;;  %v1493_v45 = vld [vmem:[%s11372_s3 + $0xea0] sm:$0xff]  ;;  %v1511_v29 = vld [vmem:[%s11372_s3 + $0xf30] sm:$0xff] }
 0x1d9   : > { %5937 = vmatpush1.bf16.msra.mxu1 %v5936_v58  ;;  %v1455_v58 = vld [vmem:[%s11372_s3 + $0xd70] sm:$0xff]  ;;  %v1508_v30 = vld [vmem:[%s11372_s3 + $0xf18] sm:$0xff] }
 0x1da   : > { %6225 = vmatpush1.bf16.msra.mxu0 %v6224_v14  ;;  %5939 = vmatprep.subr.bf16.mxu1 %v5938_v62  ;;  %v1460_v14 = vld [vmem:[%s11372_s3 + $0xd98] sm:$0xff]  ;;  %v1457_v62 = vld [vmem:[%s11372_s3 + $0xd80] sm:$0xff] }
 0x1db   : > { %6227 = vmatprep.subr.bf16.mxu0 %v6226_v2  ;;  %v1471_v2 = vld [vmem:[%s11372_s3 + $0xdf0] sm:$0xff]  ;;  %v5952_v22 = vpack.c.bf16 %v1460_v14, %v1455_v58  ;;  %v6240_v7 = vpack.c.bf16 %v1462_v63, %v1457_v62  ;;  %v6250_v14 = vpack.c.bf16 %v1493_v45, %v1488_v43  ;;  %v1492_v62 = vld [vmem:[%s11372_s3 + $0xe98] sm:$0xff]  ;;  %v1501_v63 = vld [vmem:[%s11372_s3 + $0xee0] sm:$0xff] }
 0x1dc   : > { %v5954_v16 = vpack.c.bf16 %v1471_v2, %v1466_v26  ;;  %v1487_v58 = vld [vmem:[%s11372_s3 + $0xe70] sm:$0xff]  ;;  %v1498_v26 = vld [vmem:[%s11372_s3 + $0xec8] sm:$0xff]  ;;  %v1512_v43 = vld [vmem:[%s11372_s3 + $0xf38] sm:$0xff] }
 0x1dd   : > { %5941 = vmatpush1.bf16.msra.mxu1 %v5940_v18  ;;  %v1465_v18 = vld [vmem:[%s11372_s3 + $0xdc0] sm:$0xff]  ;;  %v1503_v2 = vld [vmem:[%s11372_s3 + $0xef0] sm:$0xff]  ;;  %v1518_v45 = vld [vmem:[%s11372_s3 + $0xf68] sm:$0xff] }
 0x1de   : > { %6229 = vmatpush1.bf16.msra.mxu0 %v6228_v19  ;;  %5943 = vmatprep.subr.bf16.mxu1 %v5942_v20  ;;  %v1470_v19 = vld [vmem:[%s11372_s3 + $0xde8] sm:$0xff]  ;;  %v1467_v20 = vld [vmem:[%s11372_s3 + $0xdd0] sm:$0xff] }
 0x1df   : > { %6231 = vmatprep.subr.bf16.mxu0 %v6230_v27  ;;  %v1481_v27 = vld [vmem:[%s11372_s3 + $0xe40] sm:$0xff]  ;;  %v5956_v32 = vpack.c.bf16 %v1470_v19, %v1465_v18  ;;  %v6244_v35 = vpack.c.bf16 %v1472_v24, %v1467_v20  ;;  %v1495_v18 = vld [vmem:[%s11372_s3 + $0xeb0] sm:$0xff]  ;;  %v1500_v19 = vld [vmem:[%s11372_s3 + $0xed8] sm:$0xff]  ;;  %v6254_v24 = vpack.c.bf16 %v1503_v2, %v1498_v26 }
 0x1e0   : > { %v5958_v44 = vpack.c.bf16 %v1481_v27, %v1476_v25  ;;  %v1497_v20 = vld [vmem:[%s11372_s3 + $0xec0] sm:$0xff]  ;;  %v1502_v25 = vld [vmem:[%s11372_s3 + $0xee8] sm:$0xff] }
 0x1e1   : > { %5945 = vmatpush1.bf16.msra.mxu1 %v5944_v37  ;;  %v1475_v37 = vld [vmem:[%s11372_s3 + $0xe10] sm:$0xff]  ;;  %v1506_v27 = vld [vmem:[%s11372_s3 + $0xf08] sm:$0xff] }
 0x1e2   : > { %6233 = vmatpush1.bf16.msra.mxu0 %v6232_v38  ;;  %5947 = vmatprep.subr.bf16.mxu1 %v5946_v42  ;;  %v1480_v38 = vld [vmem:[%s11372_s3 + $0xe38] sm:$0xff]  ;;  %v1477_v42 = vld [vmem:[%s11372_s3 + $0xe20] sm:$0xff]  ;;  %v1522_v26 = vld [vmem:[%s11372_s3 + $0xf88] sm:$0xff] }
 0x1e3   : > { %6235 = vmatprep.subr.bf16.mxu0 %v6234_v17  ;;  %v1491_v17 = vld [vmem:[%s11372_s3 + $0xe90] sm:$0xff]  ;;  %v5960_v46 = vpack.c.bf16 %v1480_v38, %v1475_v37  ;;  %v6248_v52 = vpack.c.bf16 %v1482_v40, %v1477_v42  ;;  %v6256_v37 = vpack.c.bf16 %v1502_v25, %v1497_v20  ;;  %v5970_v38 = vpack.c.bf16 %v1511_v29, %v1506_v27  ;;  %v1526_v2 = vld [vmem:[%s11372_s3 + $0xfa8] sm:$0xff] }
 0x1e4   : > { %v1530_v25 = vld [vmem:[%s11372_s3 + $0xfc8] sm:$0xff]  ;;  %v1527_v27 = vld [vmem:[%s11372_s3 + $0xfb0] sm:$0xff] }
 0x1e5   : > { %5949 = vmatpush1.bf16.msra.mxu1 %v5948_v53  ;;  %v5962_v53 = vpack.c.bf16 %v1491_v17, %v1486_v61  ;;  %v1505_v61 = vld [vmem:[%s11372_s3 + $0xf00] sm:$0xff]  ;;  %v1507_v17 = vld [vmem:[%s11372_s3 + $0xf10] sm:$0xff] }
 0x1e6   : > { %6237 = vmatpush1.bf16.msra.mxu0 %v6236_v50  ;;  %5951 = vmatprep.subr.bf16.mxu1 %v5950_v60  ;;  %v1485_v50 = vld [vmem:[%s11372_s3 + $0xe60] sm:$0xff]  ;;  %v1490_v60 = vld [vmem:[%s11372_s3 + $0xe88] sm:$0xff] }
 0x1e7   : > { %6239 = vmatprep.subr.bf16.mxu0 %v6238_v47  ;;  %v1496_v47 = vld [vmem:[%s11372_s3 + $0xeb8] sm:$0xff]  ;;  %v5964_v3 = vpack.c.bf16 %v1490_v60, %v1485_v50 }
 0x1e9   : > { %5953 = vmatpush1.bf16.msra.mxu1 %v5952_v22  ;;  %v592_v22 = vrot.slane %v9014_v4, %v591_v51 }
 0x1ea   : > { %6241 = vmatpush1.bf16.msra.mxu0 %v6240_v7  ;;  %5955 = vmatprep.subr.bf16.mxu1 %v5954_v16  ;;  %v6252_v7 = vpack.c.bf16 %v1492_v62, %v1487_v58  ;;  %v5966_v16 = vpack.c.bf16 %v1501_v63, %v1496_v47  ;;  %v1515_v47 = vld [vmem:[%s11372_s3 + $0xf50] sm:$0xff]  ;;  %v1520_v63 = vld [vmem:[%s11372_s3 + $0xf78] sm:$0xff] }
 0x1eb   : > { %6243 = vmatprep.subr.bf16.mxu0 %v6242_v23  ;;  %v603_v23 = vsub.s32 7, %v8157_v54 }
 0x1ed   : > { %5957 = vmatpush1.bf16.msra.mxu1 %v5956_v32  ;;  %v1513_v32 = vld [vmem:[%s11372_s3 + $0xf40] sm:$0xff]  ;;  %v9046_v42 = vrot.slane %v9014_v4, %v603_v23 }
 0x1ee   : > { %6245 = vmatpush1.bf16.msra.mxu0 %v6244_v35  ;;  %5959 = vmatprep.subr.bf16.mxu1 %v5958_v44  ;;  %v5968_v35 = vpack.c.bf16 %v1500_v19, %v1495_v18  ;;  %v845_v44 = vadd.f32 %v8432_v8, %v592_v22  ;;  %v6258_v40 = vpack.c.bf16 %v1513_v32, %v1508_v30  ;;  %v1510_v8 = vld [vmem:[%s11372_s3 + $0xf28] sm:$0xff]  ;;  %v1532_v30 = vld [vmem:[%s11372_s3 + $0xfd8] sm:$0xff] }
 0x1ef   : > { %6247 = vmatprep.subr.bf16.mxu0 %v6246_v56  ;;  %v853_v56 = vadd.f32 %v8474_v39, %v8631_v36  ;;  %v1516_v39 = vld [vmem:[%s11372_s3 + $0xf58] sm:$0xff]  ;;  %v1521_v36 = vld [vmem:[%s11372_s3 + $0xf80] sm:$0xff]  ;;  %v5972_v50 = vpack.c.bf16 %v1510_v8, %v1505_v61  ;;  %v924_v60 = vadd.f32 %v8438_v15, %v9046_v42  ;;  %v5976_v18 = vpack.c.bf16 %v1520_v63, %v1515_v47  ;;  %v1535_v61 = vld [vmem:[%s11372_s3 + $0xff0] sm:$0xff] }
 0x1f0   : > { %v5974_v62 = vpack.c.bf16 %v1521_v36, %v1516_v39  ;;  %v1536_v32 = vld [vmem:[%s11372_s3 + $0xff8] sm:$0xff]  ;;  %v1542_v39 = vld [vmem:[%s11372_s3 + $0x1028] sm:$0xff]  ;;  %v1547_v63 = vld [vmem:[%s11372_s3 + $0x1050] sm:$0xff] }
 0x1f1   : > { %5961 = vmatpush1.bf16.msra.mxu1 %v5960_v46  ;;  %v1523_v46 = vld [vmem:[%s11372_s3 + $0xf90] sm:$0xff]  ;;  %v9079_v58 = vmax.f32 %v853_v56, 0.0  ;;  %v9111_v19 = vmax.f32 %v924_v60, 0.0  ;;  %v6268_v56 = vpack.c.bf16 %v1532_v30, %v1527_v27  ;;  %v1540_v8 = vld [vmem:[%s11372_s3 + $0x1018] sm:$0xff]  ;;  %v1546_v36 = vld [vmem:[%s11372_s3 + $0x1048] sm:$0xff] }
 0x1f2   : > { %6249 = vmatpush1.bf16.msra.mxu0 %v6248_v52  ;;  %5963 = vmatprep.subr.bf16.mxu1 %v5962_v53  ;;  %v9074_v52 = vmax.f32 %v845_v44, 0.0  ;;  %v851_v53 = vadd.f32 %v8464_v33, %v592_v22  ;;  %v1517_v33 = vld [vmem:[%s11372_s3 + $0xf60] sm:$0xff]  ;;  %v6262_v15 = vpack.c.bf16 %v1523_v46, %v1518_v45  ;;  %v1528_v22 = vld [vmem:[%s11372_s3 + $0xfb8] sm:$0xff]  ;;  %v1538_v44 = vld [vmem:[%s11372_s3 + $0x1008] sm:$0xff] }
 0x1f3   : > { %6251 = vmatprep.subr.bf16.mxu0 %v6250_v14  ;;  %v6260_v14 = vpack.c.bf16 %v1512_v43, %v1507_v17  ;;  %v6264_v20 = vpack.c.bf16 %v1522_v26, %v1517_v33  ;;  %v1537_v17 = vld [vmem:[%s11372_s3 + $0x1000] sm:$0xff]  ;;  %v1551_v45 = vld [vmem:[%s11372_s3 + $0x1070] sm:$0xff]  ;;  %v1548_v46 = vld [vmem:[%s11372_s3 + $0x1058] sm:$0xff] }
 0x1f4   : > { %v6272_v60 = vpack.c.bf16 %v1542_v39, %v1537_v17  ;;  %v1550_v47 = vld [vmem:[%s11372_s3 + $0x1068] sm:$0xff]  ;;  %v1556_v26 = vld [vmem:[%s11372_s3 + $0x1098] sm:$0xff] }
 0x1f5   : > { %5965 = vmatpush1.bf16.msra.mxu1 %v5964_v3  ;;  %v1531_v3 = vld [vmem:[%s11372_s3 + $0xfd0] sm:$0xff]  ;;  %v1566_v30 = vld [vmem:[%s11372_s3 + $0x10e8] sm:$0xff]  ;;  %v1576_v39 = vld [vmem:[%s11372_s3 + $0x1138] sm:$0xff] }
 0x1f6   : > { %6253 = vmatpush1.bf16.msra.mxu0 %v6252_v7  ;;  %5967 = vmatprep.subr.bf16.mxu1 %v5966_v16  ;;  %v1533_v7 = vld [vmem:[%s11372_s3 + $0xfe0] sm:$0xff]  ;;  %v9108_v16 = vmax.f32 %v851_v53, 0.0  ;;  %v5978_v23 = vpack.c.bf16 %v1531_v3, %v1526_v2  ;;  %v1558_v3 = vld [vmem:[%s11372_s3 + $0x10a8] sm:$0xff] }
 0x1f7   : > { %6255 = vmatprep.subr.bf16.mxu0 %v6254_v24  ;;  %v1525_v24 = vld [vmem:[%s11372_s3 + $0xfa0] sm:$0xff]  ;;  %v6266_v29 = vpack.c.bf16 %v1533_v7, %v1528_v22  ;;  %v1563_v22 = vld [vmem:[%s11372_s3 + $0x10d0] sm:$0xff] }
 0x1f8   : > { %v1553_v53 = vld [vmem:[%s11372_s3 + $0x1080] sm:$0xff]  ;;  %v6278_v27 = vpack.c.bf16 %v1563_v22, %v1558_v3 }
 0x1f9   : > { %5969 = vmatpush1.bf16.msra.mxu1 %v5968_v35  ;;  %v1541_v35 = vld [vmem:[%s11372_s3 + $0x1020] sm:$0xff]  ;;  %v6274_v33 = vpack.c.bf16 %v1553_v53, %v1548_v46  ;;  %v1583_v46 = vld [vmem:[%s11372_s3 + $0x1170] sm:$0xff] }
 0x1fa   : > { %6257 = vmatpush1.bf16.msra.mxu0 %v6256_v37  ;;  %5971 = vmatprep.subr.bf16.mxu1 %v5970_v38  ;;  %v1543_v37 = vld [vmem:[%s11372_s3 + $0x1030] sm:$0xff]  ;;  %v5980_v38 = vpack.c.bf16 %v1530_v25, %v1525_v24  ;;  %v1561_v2 = vld [vmem:[%s11372_s3 + $0x10c0] sm:$0xff]  ;;  %v1560_v24 = vld [vmem:[%s11372_s3 + $0x10b8] sm:$0xff] }
 0x1fb   : > { %6259 = vmatprep.subr.bf16.mxu0 %v6258_v40  ;;  %v5982_v40 = vpack.c.bf16 %v1541_v35, %v1536_v32  ;;  %v6270_v43 = vpack.c.bf16 %v1543_v37, %v1538_v44  ;;  %v1557_v25 = vld [vmem:[%s11372_s3 + $0x10a0] sm:$0xff]  ;;  %v1571_v32 = vld [vmem:[%s11372_s3 + $0x1110] sm:$0xff]  ;;  %v1568_v35 = vld [vmem:[%s11372_s3 + $0x10f8] sm:$0xff] }
 0x1fc   : > { %1991 = vmatmul.mubr.f32.vlgmr.msra.gmra.mrb[8].mxu1 %v9074_v52  ;;  %v1573_v44 = vld [vmem:[%s11372_s3 + $0x1120] sm:$0xff] }
 0x1fd   : > { %2376 = vmatmul.mubr.f32.vlgmr.msra.gmra.mrb[12].mxu0 %v9074_v52  ;;  %1996 = vmatprep.mubr.f32.mxu1 %v9079_v58  ;;  %v6282_v17 = vpack.c.bf16 %v1573_v44, %v1568_v35  ;;  %v1593_v3 = vld [vmem:[%s11372_s3 + $0x11c0] sm:$0xff]  ;;  %v1603_v35 = vld [vmem:[%s11372_s3 + $0x1210] sm:$0xff] }
 0x1fe   : > { %5973 = vmatpush1.bf16.msra.mxu1 %v5972_v50  ;;  %2381 = vmatprep.mubr.f32.mxu0 %v9079_v58  ;;  %v5984_v50 = vpack.c.bf16 %v1540_v8, %v1535_v61  ;;  %v1570_v61 = vld [vmem:[%s11372_s3 + $0x1108] sm:$0xff]  ;;  %v1567_v8 = vld [vmem:[%s11372_s3 + $0x10f0] sm:$0xff] }
 0x1ff   : > { %6261 = vmatpush1.bf16.msra.mxu0 %v6260_v14  ;;  %5975 = vmatprep.subr.bf16.mxu1 %v5974_v62  ;;  %v5986_v14 = vpack.c.bf16 %v1551_v45, %v1546_v36  ;;  %v1545_v62 = vld [vmem:[%s11372_s3 + $0x1040] sm:$0xff]  ;;  %v1578_v45 = vld [vmem:[%s11372_s3 + $0x1148] sm:$0xff] }
 0x200   : > { %1997 = vmatmul.mubr.f32.gmra.mrb[10].mxu1 %v9108_v16  ;;  %6263 = vmatprep.subr.bf16.mxu0 %v6262_v15  ;;  %v1552_v15 = vld [vmem:[%s11372_s3 + $0x1078] sm:$0xff]  ;;  %v5988_v7 = vpack.c.bf16 %v1550_v47, %v1545_v62  ;;  %v1581_v36 = vld [vmem:[%s11372_s3 + $0x1160] sm:$0xff] }
 0x201   : > { %2382 = vmatmul.mubr.f32.gmra.mrb[14].mxu0 %v9108_v16  ;;  %2067 = vmatprep.mubr.f32.mxu1 %v9111_v19  ;;  %v1580_v62 = vld [vmem:[%s11372_s3 + $0x1158] sm:$0xff]  ;;  %v1577_v47 = vld [vmem:[%s11372_s3 + $0x1140] sm:$0xff] }
 0x202   : > { %5977 = vmatpush1.bf16.msra.mxu1 %v5976_v18  ;;  %2452 = vmatprep.mubr.f32.mxu0 %v9111_v19  ;;  %v6276_v18 = vpack.c.bf16 %v1552_v15, %v1547_v63  ;;  %v6286_v63 = vpack.c.bf16 %v1583_v46, %v1578_v45  ;;  %v1586_v15 = vld [vmem:[%s11372_s3 + $0x1188] sm:$0xff]  ;;  %v1613_v45 = vld [vmem:[%s11372_s3 + $0x1260] sm:$0xff] }
 0x203   : > { %6265 = vmatpush1.bf16.msra.mxu0 %v6264_v20  ;;  %5979 = vmatprep.subr.bf16.mxu1 %v5978_v23  ;;  %v5990_v20 = vpack.c.bf16 %v1561_v2, %v1556_v26  ;;  %v1555_v23 = vld [vmem:[%s11372_s3 + $0x1090] sm:$0xff]  ;;  %v1588_v2 = vld [vmem:[%s11372_s3 + $0x1198] sm:$0xff] }
 0x204   : > { %6267 = vmatprep.subr.bf16.mxu0 %v6266_v29  ;;  %v1562_v29 = vld [vmem:[%s11372_s3 + $0x10c8] sm:$0xff]  ;;  %v5992_v37 = vpack.c.bf16 %v1560_v24, %v1555_v23  ;;  %v1591_v26 = vld [vmem:[%s11372_s3 + $0x11b0] sm:$0xff] }
 0x205   : > { %v1590_v23 = vld [vmem:[%s11372_s3 + $0x11a8] sm:$0xff]  ;;  %v1587_v24 = vld [vmem:[%s11372_s3 + $0x1190] sm:$0xff] }
 0x206   : > { %5981 = vmatpush1.bf16.msra.mxu1 %v5980_v38  ;;  %v6280_v38 = vpack.c.bf16 %v1562_v29, %v1557_v25  ;;  %v6290_v25 = vpack.c.bf16 %v1593_v3, %v1588_v2  ;;  %v1596_v29 = vld [vmem:[%s11372_s3 + $0x11d8] sm:$0xff]  ;;  %v1623_v2 = vld [vmem:[%s11372_s3 + $0x12b0] sm:$0xff] }
 0x207   : > { %6269 = vmatpush1.bf16.msra.mxu0 %v6268_v56  ;;  %5983 = vmatprep.subr.bf16.mxu1 %v5982_v40  ;;  %v5994_v56 = vpack.c.bf16 %v1571_v32, %v1566_v30  ;;  %v1565_v40 = vld [vmem:[%s11372_s3 + $0x10e0] sm:$0xff]  ;;  %v1598_v32 = vld [vmem:[%s11372_s3 + $0x11e8] sm:$0xff] }
 0x208   : > { %6271 = vmatprep.subr.bf16.mxu0 %v6270_v43  ;;  %v1572_v43 = vld [vmem:[%s11372_s3 + $0x1118] sm:$0xff]  ;;  %v5996_v53 = vpack.c.bf16 %v1570_v61, %v1565_v40  ;;  %v1601_v30 = vld [vmem:[%s11372_s3 + $0x1200] sm:$0xff] }
 0x209   : > { %v1600_v40 = vld [vmem:[%s11372_s3 + $0x11f8] sm:$0xff]  ;;  %v1597_v61 = vld [vmem:[%s11372_s3 + $0x11e0] sm:$0xff] }
 0x20a   : > { %5985 = vmatpush1.bf16.msra.mxu1 %v5984_v50  ;;  %v6284_v50 = vpack.c.bf16 %v1572_v43, %v1567_v8  ;;  %v6294_v8 = vpack.c.bf16 %v1603_v35, %v1598_v32  ;;  %v1606_v43 = vld [vmem:[%s11372_s3 + $0x1228] sm:$0xff]  ;;  %v1633_v32 = vld [vmem:[%s11372_s3 + $0x1300] sm:$0xff] }
 0x20b   : > { %6273 = vmatpush1.bf16.msra.mxu0 %v6272_v60  ;;  %5987 = vmatprep.subr.bf16.mxu1 %v5986_v14  ;;  %v5998_v60 = vpack.c.bf16 %v1581_v36, %v1576_v39  ;;  %v1575_v14 = vld [vmem:[%s11372_s3 + $0x1130] sm:$0xff]  ;;  %v1608_v36 = vld [vmem:[%s11372_s3 + $0x1238] sm:$0xff] }
 0x20c   : > { %6275 = vmatprep.subr.bf16.mxu0 %v6274_v33  ;;  %v1582_v33 = vld [vmem:[%s11372_s3 + $0x1168] sm:$0xff]  ;;  %v6000_v22 = vpack.c.bf16 %v1580_v62, %v1575_v14  ;;  %v1611_v39 = vld [vmem:[%s11372_s3 + $0x1250] sm:$0xff] }
 0x20d   : > { %v1610_v14 = vld [vmem:[%s11372_s3 + $0x1248] sm:$0xff]  ;;  %v1607_v62 = vld [vmem:[%s11372_s3 + $0x1230] sm:$0xff] }
 0x20e   : > { %5989 = vmatpush1.bf16.msra.mxu1 %v5988_v7  ;;  %v6288_v7 = vpack.c.bf16 %v1582_v33, %v1577_v47  ;;  %v6298_v47 = vpack.c.bf16 %v1613_v45, %v1608_v36  ;;  %v1616_v33 = vld [vmem:[%s11372_s3 + $0x1278] sm:$0xff]  ;;  %v1643_v36 = vld [vmem:[%s11372_s3 + $0x1350] sm:$0xff] }
 0x20f   : > { %6277 = vmatpush1.bf16.msra.mxu0 %v6276_v18  ;;  %5991 = vmatprep.subr.bf16.mxu1 %v5990_v20  ;;  %v6002_v18 = vpack.c.bf16 %v1591_v26, %v1586_v15  ;;  %v1585_v20 = vld [vmem:[%s11372_s3 + $0x1180] sm:$0xff]  ;;  %v1618_v26 = vld [vmem:[%s11372_s3 + $0x1288] sm:$0xff] }
 0x210   : > { %6279 = vmatprep.subr.bf16.mxu0 %v6278_v27  ;;  %v1592_v27 = vld [vmem:[%s11372_s3 + $0x11b8] sm:$0xff]  ;;  %v6004_v44 = vpack.c.bf16 %v1590_v23, %v1585_v20  ;;  %v1621_v15 = vld [vmem:[%s11372_s3 + $0x12a0] sm:$0xff] }
 0x211   : > { %v1620_v20 = vld [vmem:[%s11372_s3 + $0x1298] sm:$0xff]  ;;  %v1617_v23 = vld [vmem:[%s11372_s3 + $0x1280] sm:$0xff] }
 0x212   : > { %5993 = vmatpush1.bf16.msra.mxu1 %v5992_v37  ;;  %v6292_v37 = vpack.c.bf16 %v1592_v27, %v1587_v24  ;;  %v6302_v24 = vpack.c.bf16 %v1623_v2, %v1618_v26  ;;  %v1626_v27 = vld [vmem:[%s11372_s3 + $0x12c8] sm:$0xff]  ;;  %v1653_v26 = vld [vmem:[%s11372_s3 + $0x13a0] sm:$0xff] }
 0x213   : > { %6281 = vmatpush1.bf16.msra.mxu0 %v6280_v38  ;;  %5995 = vmatprep.subr.bf16.mxu1 %v5994_v56  ;;  %v6006_v38 = vpack.c.bf16 %v1601_v30, %v1596_v29  ;;  %v1595_v56 = vld [vmem:[%s11372_s3 + $0x11d0] sm:$0xff]  ;;  %v1628_v30 = vld [vmem:[%s11372_s3 + $0x12d8] sm:$0xff] }
 0x214   : > { %6283 = vmatprep.subr.bf16.mxu0 %v6282_v17  ;;  %v1602_v17 = vld [vmem:[%s11372_s3 + $0x1208] sm:$0xff]  ;;  %v6008_v46 = vpack.c.bf16 %v1600_v40, %v1595_v56  ;;  %v1631_v29 = vld [vmem:[%s11372_s3 + $0x12f0] sm:$0xff] }
 0x215   : > { %v1630_v56 = vld [vmem:[%s11372_s3 + $0x12e8] sm:$0xff]  ;;  %v1627_v40 = vld [vmem:[%s11372_s3 + $0x12d0] sm:$0xff] }
 0x216   : > { %5997 = vmatpush1.bf16.msra.mxu1 %v5996_v53  ;;  %v6296_v53 = vpack.c.bf16 %v1602_v17, %v1597_v61  ;;  %v6306_v61 = vpack.c.bf16 %v1633_v32, %v1628_v30  ;;  %v1636_v17 = vld [vmem:[%s11372_s3 + $0x1318] sm:$0xff]  ;;  %v1658_v30 = vld [vmem:[%s11372_s3 + $0x13c8] sm:$0xff]  ;;  %v1663_v32 = vld [vmem:[%s11372_s3 + $0x13f0] sm:$0xff] }
 0x217   : > { %6285 = vmatpush1.bf16.msra.mxu0 %v6284_v50  ;;  %5999 = vmatprep.subr.bf16.mxu1 %v5998_v60  ;;  %v6010_v50 = vpack.c.bf16 %v1611_v39, %v1606_v43  ;;  %v1605_v60 = vld [vmem:[%s11372_s3 + $0x1220] sm:$0xff]  ;;  %v1638_v39 = vld [vmem:[%s11372_s3 + $0x1328] sm:$0xff] }
 0x218   : > { %6287 = vmatprep.subr.bf16.mxu0 %v6286_v63  ;;  %v1612_v63 = vld [vmem:[%s11372_s3 + $0x1258] sm:$0xff]  ;;  %v6012_v3 = vpack.c.bf16 %v1610_v14, %v1605_v60  ;;  %v1641_v43 = vld [vmem:[%s11372_s3 + $0x1340] sm:$0xff] }
 0x219   : > { %v1640_v60 = vld [vmem:[%s11372_s3 + $0x1338] sm:$0xff]  ;;  %v1637_v14 = vld [vmem:[%s11372_s3 + $0x1320] sm:$0xff] }
 0x21a   : > { %6001 = vmatpush1.bf16.msra.mxu1 %v6000_v22  ;;  %v6300_v22 = vpack.c.bf16 %v1612_v63, %v1607_v62  ;;  %v6310_v62 = vpack.c.bf16 %v1643_v36, %v1638_v39  ;;  %v1646_v63 = vld [vmem:[%s11372_s3 + $0x1368] sm:$0xff]  ;;  %v1668_v39 = vld [vmem:[%s11372_s3 + $0x1418] sm:$0xff]  ;;  %v1673_v36 = vld [vmem:[%s11372_s3 + $0x1440] sm:$0xff] }
 0x21b   : > { %6289 = vmatpush1.bf16.msra.mxu0 %v6288_v7  ;;  %6003 = vmatprep.subr.bf16.mxu1 %v6002_v18  ;;  %v6014_v7 = vpack.c.bf16 %v1621_v15, %v1616_v33  ;;  %v1615_v18 = vld [vmem:[%s11372_s3 + $0x1270] sm:$0xff]  ;;  %v1648_v15 = vld [vmem:[%s11372_s3 + $0x1378] sm:$0xff] }
 0x21c   : > { %6291 = vmatprep.subr.bf16.mxu0 %v6290_v25  ;;  %v1622_v25 = vld [vmem:[%s11372_s3 + $0x12a8] sm:$0xff]  ;;  %v6016_v35 = vpack.c.bf16 %v1620_v20, %v1615_v18  ;;  %v1651_v33 = vld [vmem:[%s11372_s3 + $0x1390] sm:$0xff]  ;;  %v1645_v18 = vld [vmem:[%s11372_s3 + $0x1360] sm:$0xff] }
 0x21d   : > { %v1650_v20 = vld [vmem:[%s11372_s3 + $0x1388] sm:$0xff] }
 0x21e   : > { %6005 = vmatpush1.bf16.msra.mxu1 %v6004_v44  ;;  %v6304_v44 = vpack.c.bf16 %v1622_v25, %v1617_v23  ;;  %v1647_v23 = vld [vmem:[%s11372_s3 + $0x1370] sm:$0xff]  ;;  %v1652_v25 = vld [vmem:[%s11372_s3 + $0x1398] sm:$0xff] }
 0x21f   : > { %6293 = vmatpush1.bf16.msra.mxu0 %v6292_v37  ;;  %6007 = vmatprep.subr.bf16.mxu1 %v6006_v38  ;;  %v6018_v37 = vpack.c.bf16 %v1631_v29, %v1626_v27  ;;  %v1625_v38 = vld [vmem:[%s11372_s3 + $0x12c0] sm:$0xff]  ;;  %v1656_v27 = vld [vmem:[%s11372_s3 + $0x13b8] sm:$0xff] }
 0x220   : > { %6295 = vmatprep.subr.bf16.mxu0 %v6294_v8  ;;  %v1632_v8 = vld [vmem:[%s11372_s3 + $0x12f8] sm:$0xff]  ;;  %v6020_v45 = vpack.c.bf16 %v1630_v56, %v1625_v38  ;;  %v1661_v29 = vld [vmem:[%s11372_s3 + $0x13e0] sm:$0xff]  ;;  %v1655_v56 = vld [vmem:[%s11372_s3 + $0x13b0] sm:$0xff] }
 0x221   : > { %v6030_v38 = vpack.c.bf16 %v1661_v29, %v1656_v27  ;;  %v1686_v27 = vld [vmem:[%s11372_s3 + $0x14a8] sm:$0xff]  ;;  %v1691_v29 = vld [vmem:[%s11372_s3 + $0x14d0] sm:$0xff] }
 0x222   : > { %6009 = vmatpush1.bf16.msra.mxu1 %v6008_v46  ;;  %v6308_v46 = vpack.c.bf16 %v1632_v8, %v1627_v40  ;;  %v1660_v40 = vld [vmem:[%s11372_s3 + $0x13d8] sm:$0xff]  ;;  %v6318_v8 = vpack.c.bf16 %v1663_v32, %v1658_v30  ;;  %v1693_v32 = vld [vmem:[%s11372_s3 + $0x14e0] sm:$0xff] }
 0x223   : > { %6297 = vmatpush1.bf16.msra.mxu0 %v6296_v53  ;;  %6011 = vmatprep.subr.bf16.mxu1 %v6010_v50  ;;  %v6022_v53 = vpack.c.bf16 %v1641_v43, %v1636_v17  ;;  %v1635_v50 = vld [vmem:[%s11372_s3 + $0x1310] sm:$0xff]  ;;  %v1666_v17 = vld [vmem:[%s11372_s3 + $0x1408] sm:$0xff]  ;;  %v1688_v30 = vld [vmem:[%s11372_s3 + $0x14b8] sm:$0xff] }
 0x224   : > { %6299 = vmatprep.subr.bf16.mxu0 %v6298_v47  ;;  %v1642_v47 = vld [vmem:[%s11372_s3 + $0x1348] sm:$0xff]  ;;  %v6024_v2 = vpack.c.bf16 %v1640_v60, %v1635_v50  ;;  %v1671_v43 = vld [vmem:[%s11372_s3 + $0x1430] sm:$0xff]  ;;  %v930_v60 = vadd.f32 %v8476_v41, %v9046_v42  ;;  %v1676_v41 = vld [vmem:[%s11372_s3 + $0x1458] sm:$0xff] }
 0x225   : > { %v6034_v50 = vpack.c.bf16 %v1671_v43, %v1666_v17  ;;  %v1681_v42 = vld [vmem:[%s11372_s3 + $0x1480] sm:$0xff]  ;;  %v1696_v17 = vld [vmem:[%s11372_s3 + $0x14f8] sm:$0xff] }
 0x226   : > { %6013 = vmatpush1.bf16.msra.mxu1 %v6012_v3  ;;  %v599_v3 = vsub.s32 6, %v8157_v54  ;;  %v1701_v43 = vld [vmem:[%s11372_s3 + $0x1520] sm:$0xff] }
 0x227   : > { %6301 = vmatpush1.bf16.msra.mxu0 %v6300_v22  ;;  %6015 = vmatprep.subr.bf16.mxu1 %v6014_v7  ;;  %v6312_v22 = vpack.c.bf16 %v1642_v47, %v1637_v14  ;;  %v6026_v7 = vpack.c.bf16 %v1651_v33, %v1646_v63  ;;  %v6322_v14 = vpack.c.bf16 %v1673_v36, %v1668_v39  ;;  %v1670_v47 = vld [vmem:[%s11372_s3 + $0x1428] sm:$0xff]  ;;  %v1672_v63 = vld [vmem:[%s11372_s3 + $0x1438] sm:$0xff]  ;;  %v1703_v36 = vld [vmem:[%s11372_s3 + $0x1530] sm:$0xff] }
 0x228   : > { %6303 = vmatprep.subr.bf16.mxu0 %v6302_v24  ;;  %v6314_v24 = vpack.c.bf16 %v1653_v26, %v1648_v15  ;;  %v1678_v33 = vld [vmem:[%s11372_s3 + $0x1468] sm:$0xff]  ;;  %v1683_v15 = vld [vmem:[%s11372_s3 + $0x1490] sm:$0xff] }
 0x229   : > { %v1698_v39 = vld [vmem:[%s11372_s3 + $0x1508] sm:$0xff] }
 0x22a   : > { %6017 = vmatpush1.bf16.msra.mxu1 %v6016_v35  ;;  %v6028_v35 = vpack.c.bf16 %v1650_v20, %v1645_v18  ;;  %v6038_v18 = vpack.c.bf16 %v1681_v42, %v1676_v41  ;;  %v1675_v20 = vld [vmem:[%s11372_s3 + $0x1450] sm:$0xff]  ;;  %v1708_v41 = vld [vmem:[%s11372_s3 + $0x1558] sm:$0xff]  ;;  %v1713_v42 = vld [vmem:[%s11372_s3 + $0x1580] sm:$0xff] }
 0x22b   : > { %6305 = vmatpush1.bf16.msra.mxu0 %v6304_v44  ;;  %6019 = vmatprep.subr.bf16.mxu1 %v6018_v37  ;;  %v600_v44 = vrot.slane %v9014_v4, %v599_v3  ;;  %v6316_v37 = vpack.c.bf16 %v1652_v25, %v1647_v23  ;;  %v1662_v4 = vld [vmem:[%s11372_s3 + $0x13e8] sm:$0xff]  ;;  %v1680_v23 = vld [vmem:[%s11372_s3 + $0x1478] sm:$0xff] }
 0x22c   : > { %6307 = vmatprep.subr.bf16.mxu0 %v6306_v61  ;;  %v1657_v61 = vld [vmem:[%s11372_s3 + $0x13c0] sm:$0xff]  ;;  %v1682_v25 = vld [vmem:[%s11372_s3 + $0x1488] sm:$0xff] }
 0x22e   : > { %6021 = vmatpush1.bf16.msra.mxu1 %v6020_v45  ;;  %v6032_v45 = vpack.c.bf16 %v1660_v40, %v1655_v56  ;;  %v1685_v56 = vld [vmem:[%s11372_s3 + $0x14a0] sm:$0xff]  ;;  %v1690_v40 = vld [vmem:[%s11372_s3 + $0x14c8] sm:$0xff] }
 0x22f   : > { %6309 = vmatpush1.bf16.msra.mxu0 %v6308_v46  ;;  %6023 = vmatprep.subr.bf16.mxu1 %v6022_v53  ;;  %v922_v46 = vadd.f32 %v8434_v13, %v600_v44  ;;  %v6320_v53 = vpack.c.bf16 %v1662_v4, %v1657_v61  ;;  %v1667_v13 = vld [vmem:[%s11372_s3 + $0x1410] sm:$0xff]  ;;  %v1692_v4 = vld [vmem:[%s11372_s3 + $0x14d8] sm:$0xff] }
 0x230   : > { %6311 = vmatprep.subr.bf16.mxu0 %v6310_v62  ;;  %v1665_v62 = vld [vmem:[%s11372_s3 + $0x1400] sm:$0xff]  ;;  %v1687_v61 = vld [vmem:[%s11372_s3 + $0x14b0] sm:$0xff] }
 0x231   : > { %v9482_v26 = vmax.f32 %v922_v46, 0.0  ;;  %v6036_v3 = vpack.c.bf16 %v1670_v47, %v1665_v62  ;;  %v6332_v46 = vpack.c.bf16 %v1692_v4, %v1687_v61  ;;  %v6334_v62 = vpack.c.bf16 %v1703_v36, %v1698_v39  ;;  %v1702_v47 = vld [vmem:[%s11372_s3 + $0x1528] sm:$0xff]  ;;  %v1728_v4 = vld [vmem:[%s11372_s3 + $0x15f8] sm:$0xff] }
 0x232   : > { %6025 = vmatpush1.bf16.msra.mxu1 %v6024_v2  ;;  %v928_v2 = vadd.f32 %v8466_v34, %v600_v44  ;;  %v1677_v34 = vld [vmem:[%s11372_s3 + $0x1460] sm:$0xff]  ;;  %v6040_v44 = vpack.c.bf16 %v1680_v23, %v1675_v20  ;;  %v6338_v20 = vpack.c.bf16 %v1713_v42, %v1708_v41  ;;  %v1712_v23 = vld [vmem:[%s11372_s3 + $0x1578] sm:$0xff]  ;;  %v1726_v61 = vld [vmem:[%s11372_s3 + $0x15e8] sm:$0xff] }
 0x233   : > { %6313 = vmatpush1.bf16.msra.mxu0 %v6312_v22  ;;  %6027 = vmatprep.subr.bf16.mxu1 %v6026_v7  ;;  %v9485_v22 = vmax.f32 %v930_v60, 0.0  ;;  %v6324_v7 = vpack.c.bf16 %v1672_v63, %v1667_v13  ;;  %v1700_v60 = vld [vmem:[%s11372_s3 + $0x1518] sm:$0xff]  ;;  %v1706_v13 = vld [vmem:[%s11372_s3 + $0x1548] sm:$0xff]  ;;  %v1711_v63 = vld [vmem:[%s11372_s3 + $0x1570] sm:$0xff] }
 0x234   : > { %6315 = vmatprep.subr.bf16.mxu0 %v6314_v24  ;;  %v6326_v24 = vpack.c.bf16 %v1683_v15, %v1678_v33 }
 0x236   : > { %6029 = vmatpush1.bf16.msra.mxu1 %v6028_v35  ;;  %v9514_v35 = vmax.f32 %v928_v2, 0.0  ;;  %v6050_v2 = vpack.c.bf16 %v1711_v63, %v1706_v13  ;;  %v1743_v13 = vld [vmem:[%s11372_s3 + $0x1670] sm:$0xff]  ;;  %v4561_v63 = vld [vmem:[%s11371_s2 + $0x8] ss:$0 sm:$0xff] }
 0x237   : > { %6317 = vmatpush1.bf16.msra.mxu0 %v6316_v37  ;;  %6031 = vmatprep.subr.bf16.mxu1 %v6030_v38  ;;  %v6328_v37 = vpack.c.bf16 %v1682_v25, %v1677_v34  ;;  %v6042_v38 = vpack.c.bf16 %v1691_v29, %v1686_v27  ;;  %v1716_v34 = vld [vmem:[%s11372_s3 + $0x1598] sm:$0xff]  ;;  %v1718_v25 = vld [vmem:[%s11372_s3 + $0x15a8] sm:$0xff]  ;;  %v1723_v27 = vld [vmem:[%s11372_s3 + $0x15d0] sm:$0xff] }
 0x238   : > { %6319 = vmatprep.subr.bf16.mxu0 %v6318_v8  ;;  %v6330_v8 = vpack.c.bf16 %v1693_v32, %v1688_v30 }
 0x23a   : > { %6033 = vmatpush1.bf16.msra.mxu1 %v6032_v45  ;;  %v6044_v45 = vpack.c.bf16 %v1690_v40, %v1685_v56  ;;  %v6342_v56 = vpack.c.bf16 %v1723_v27, %v1718_v25  ;;  %v1722_v40 = vld [vmem:[%s11372_s3 + $0x15c8] sm:$0xff]  ;;  %v999_v27 = vadd.f32 %v4561_v63, %v8675_v59 }
 0x23b   : > { %6321 = vmatpush1.bf16.msra.mxu0 %v6320_v53  ;;  %6035 = vmatprep.subr.bf16.mxu1 %v6034_v50  ;;  %v6046_v53 = vpack.c.bf16 %v1701_v43, %v1696_v17  ;;  %v1695_v50 = vld [vmem:[%s11372_s3 + $0x14f0] sm:$0xff]  ;;  %v1733_v17 = vld [vmem:[%s11372_s3 + $0x1620] sm:$0xff]  ;;  %v1354_v59 = vld [vmem:[%s11372_s3 + $0xa48] sm:$0xff] }
 0x23c   : > { %6323 = vmatprep.subr.bf16.mxu0 %v6322_v14  ;;  %v1697_v14 = vld [vmem:[%s11372_s3 + $0x1500] sm:$0xff]  ;;  %v6048_v33 = vpack.c.bf16 %v1700_v60, %v1695_v50  ;;  %v6346_v50 = vpack.c.bf16 %v1733_v17, %v1728_v4  ;;  %v1732_v60 = vld [vmem:[%s11372_s3 + $0x1618] sm:$0xff]  ;;  %v9693_v17 = vmax.f32 %v999_v27, 0.0  ;;  %v1059_v27 = vld [vmem:[%s11372_s3 + $0x110] sm:$0xff] }
 0x23d   : > { %2068 = vmatmul.mubr.f32.vlgmr.msra.gmra.mrb[8].mxu1 %v9482_v26  ;;  %v6336_v15 = vpack.c.bf16 %v1702_v47, %v1697_v14  ;;  %v1736_v14 = vld [vmem:[%s11372_s3 + $0x1638] sm:$0xff]  ;;  %v1738_v47 = vld [vmem:[%s11372_s3 + $0x1648] sm:$0xff] }
 0x23e   : > { %2453 = vmatmul.mubr.f32.vlgmr.msra.gmra.mrb[12].mxu0 %v9482_v26  ;;  %2073 = vmatprep.mubr.f32.mxu1 %v9485_v22  ;;  %v1444_v4 = vld [vmem:[%s11372_s3 + $0xd18] sm:$0xff] }
 0x23f   : > { %6037 = vmatpush1.bf16.msra.mxu1 %v6036_v3  ;;  %2458 = vmatprep.mubr.f32.mxu0 %v9485_v22  ;;  %v1705_v3 = vld [vmem:[%s11372_s3 + $0x1540] sm:$0xff] }
 0x240   : > { %6325 = vmatpush1.bf16.msra.mxu0 %v6324_v7  ;;  %6039 = vmatprep.subr.bf16.mxu1 %v6038_v18  ;;  %v1710_v7 = vld [vmem:[%s11372_s3 + $0x1568] sm:$0xff]  ;;  %v1707_v18 = vld [vmem:[%s11372_s3 + $0x1550] sm:$0xff] }
 0x241   : > { %2074 = vmatmul.mubr.f32.gmra.mrb[10].mxu1 %v9514_v35  ;;  %6327 = vmatprep.subr.bf16.mxu0 %v6326_v24  ;;  %v1721_v24 = vld [vmem:[%s11372_s3 + $0x15c0] sm:$0xff]  ;;  %v6052_v29 = vpack.c.bf16 %v1710_v7, %v1705_v3  ;;  %v6340_v30 = vpack.c.bf16 %v1712_v23, %v1707_v18  ;;  %v6350_v7 = vpack.c.bf16 %v1743_v13, %v1738_v47  ;;  %v1742_v18 = vld [vmem:[%s11372_s3 + $0x1668] sm:$0xff] }
 0x242   : > { %2459 = vmatmul.mubr.f32.gmra.mrb[14].mxu0 %v9514_v35  ;;  %2144 = vmatprep.mubr.f32.mxu1 %v7069_v12  ;;  %v6054_v32 = vpack.c.bf16 %v1721_v24, %v1716_v34  ;;  %v1737_v3 = vld [vmem:[%s11372_s3 + $0x1640] sm:$0xff]  ;;  %v1114_v23 = vld [vmem:[%s11372_s3 + $0x2c8] sm:$0xff] }
 0x243   : > { %6041 = vmatpush1.bf16.msra.mxu1 %v6040_v44  ;;  %2529 = vmatprep.mubr.f32.mxu0 %v7069_v12  ;;  %v1715_v44 = vld [vmem:[%s11372_s3 + $0x1590] sm:$0xff]  ;;  %v1429_v34 = vld [vmem:[%s11372_s3 + $0xca0] sm:$0xff]  ;;  %v1434_v24 = vld [vmem:[%s11372_s3 + $0xcc8] sm:$0xff] }
 0x244   : > { %6329 = vmatpush1.bf16.msra.mxu0 %v6328_v37  ;;  %6043 = vmatprep.subr.bf16.mxu1 %v6042_v38  ;;  %v1720_v37 = vld [vmem:[%s11372_s3 + $0x15b8] sm:$0xff]  ;;  %v1717_v38 = vld [vmem:[%s11372_s3 + $0x15a0] sm:$0xff]  ;;  %v1454_v13 = vld [vmem:[%s11372_s3 + $0xd68] sm:$0xff] }
 0x245   : > { %6331 = vmatprep.subr.bf16.mxu0 %v6330_v8  ;;  %v1731_v8 = vld [vmem:[%s11372_s3 + $0x1610] sm:$0xff]  ;;  %v6056_v43 = vpack.c.bf16 %v1720_v37, %v1715_v44  ;;  %v6344_v39 = vpack.c.bf16 %v1722_v40, %v1717_v38  ;;  %v1034_v44 = vld [vmem:[%s11372_s3 + $0x48] sm:$0xff]  ;;  %v6418_v37 = vpack.c.bf16 %v1434_v24, %v1429_v34  ;;  %v1349_v38 = vld [vmem:[%s11372_s3 + $0xa20] sm:$0xff] }
 0x246   : > { %v6058_v36 = vpack.c.bf16 %v1731_v8, %v1726_v61  ;;  %v1124_v40 = vld [vmem:[%s11372_s3 + $0x318] sm:$0xff]  ;;  %v1439_v8 = vld [vmem:[%s11372_s3 + $0xcf0] sm:$0xff]  ;;  %v1449_v47 = vld [vmem:[%s11372_s3 + $0xd40] sm:$0xff] }
 0x247   : > { %6045 = vmatpush1.bf16.msra.mxu1 %v6044_v45  ;;  %v1725_v45 = vld [vmem:[%s11372_s3 + $0x15e0] sm:$0xff] }
 0x248   : > { %6333 = vmatpush1.bf16.msra.mxu0 %v6332_v46  ;;  %6047 = vmatprep.subr.bf16.mxu1 %v6046_v53  ;;  %v1730_v46 = vld [vmem:[%s11372_s3 + $0x1608] sm:$0xff]  ;;  %v1727_v53 = vld [vmem:[%s11372_s3 + $0x15f0] sm:$0xff] }
 0x249   : > { %6335 = vmatprep.subr.bf16.mxu0 %v6334_v62  ;;  %v1741_v62 = vld [vmem:[%s11372_s3 + $0x1660] sm:$0xff]  ;;  %v6060_v41 = vpack.c.bf16 %v1730_v46, %v1725_v45  ;;  %v6348_v42 = vpack.c.bf16 %v1732_v60, %v1727_v53  ;;  %v1044_v45 = vld [vmem:[%s11372_s3 + $0x98] sm:$0xff]  ;;  %v1359_v53 = vld [vmem:[%s11372_s3 + $0xa70] sm:$0xff] }
 0x24a   : > { %v1129_v60 = vld [vmem:[%s11372_s3 + $0x340] sm:$0xff] }
 0x24b   : > { %6049 = vmatpush1.bf16.msra.mxu1 %v6048_v33  ;;  %v6062_v33 = vpack.c.bf16 %v1741_v62, %v1736_v14  ;;  %v1134_v14 = vld [vmem:[%s11372_s3 + $0x368] sm:$0xff] }
 0x24c   : > { %6337 = vmatpush1.bf16.msra.mxu0 %v6336_v15  ;;  %6051 = vmatprep.subr.bf16.mxu1 %v6050_v2  ;;  %v1735_v15 = vld [vmem:[%s11372_s3 + $0x1630] sm:$0xff]  ;;  %v1740_v2 = vld [vmem:[%s11372_s3 + $0x1658] sm:$0xff] }
 0x24d   : > { %6339 = vmatprep.subr.bf16.mxu0 %v6338_v20  ;;  %v1109_v20 = vld [vmem:[%s11372_s3 + $0x2a0] sm:$0xff]  ;;  %v6064_v25 = vpack.c.bf16 %v1740_v2, %v1735_v15  ;;  %v6362_v2 = vpack.c.bf16 %v1134_v14, %v1129_v60  ;;  %v1079_v14 = vld [vmem:[%s11372_s3 + $0x1b0] sm:$0xff] }
 0x24e   : > { %v1369_v15 = vld [vmem:[%s11372_s3 + $0xac0] sm:$0xff] }
 0x24f   : > { %6053 = vmatpush1.bf16.msra.mxu1 %v6052_v29  ;;  %v6352_v29 = vpack.c.bf16 %v1742_v18, %v1737_v3  ;;  %v1374_v3 = vld [vmem:[%s11372_s3 + $0xae8] sm:$0xff]  ;;  %v1144_v18 = vld [vmem:[%s11372_s3 + $0x3b8] sm:$0xff] }
 0x250   : > { %6341 = vmatpush1.bf16.msra.mxu0 %v6340_v30  ;;  %6055 = vmatprep.subr.bf16.mxu1 %v6054_v32  ;;  %v6354_v30 = vpack.c.bf16 %v1114_v23, %v1109_v20  ;;  %v1029_v32 = vld [vmem:[%s11372_s3 + $0x20] sm:$0xff]  ;;  %v6426_v20 = vpack.c.bf16 %v1454_v13, %v1449_v47  ;;  %v1464_v23 = vld [vmem:[%s11372_s3 + $0xdb8] sm:$0xff]  ;;  %v6428_v24 = vpack.c.bf16 %v1374_v3, %v1369_v15  ;;  %v1399_v47 = vld [vmem:[%s11372_s3 + $0xbb0] sm:$0xff] }
 0x251   : > { %6343 = vmatprep.subr.bf16.mxu0 %v6342_v56  ;;  %v1119_v56 = vld [vmem:[%s11372_s3 + $0x2f0] sm:$0xff]  ;;  %v6356_v61 = vpack.c.bf16 %v1034_v44, %v1029_v32  ;;  %v1149_v44 = vld [vmem:[%s11372_s3 + $0x3e0] sm:$0xff] }
 0x252   : > { %v6358_v46 = vpack.c.bf16 %v1124_v40, %v1119_v56  ;;  %v1489_v15 = vld [vmem:[%s11372_s3 + $0xe80] sm:$0xff] }
 0x253   : > { %6057 = vmatpush1.bf16.msra.mxu1 %v6056_v43  ;;  %v1004_v43 = vadd.f32 %v4561_v63, %v8712_v21  ;;  %v1364_v21 = vld [vmem:[%s11372_s3 + $0xa98] sm:$0xff] }
 0x254   : > { %6345 = vmatpush1.bf16.msra.mxu0 %v6344_v39  ;;  %6059 = vmatprep.subr.bf16.mxu1 %v6058_v36  ;;  %v6420_v39 = vpack.c.bf16 %v1354_v59, %v1349_v38  ;;  %v1039_v36 = vld [vmem:[%s11372_s3 + $0x70] sm:$0xff]  ;;  %v1469_v38 = vld [vmem:[%s11372_s3 + $0xde0] sm:$0xff] }
 0x255   : > { %6347 = vmatprep.subr.bf16.mxu0 %v6346_v50  ;;  %v6422_v50 = vpack.c.bf16 %v1444_v4, %v1439_v8  ;;  %v6360_v62 = vpack.c.bf16 %v1044_v45, %v1039_v36  ;;  %v9722_v63 = vmax.f32 %v1004_v43, 0.0  ;;  %v1074_v8 = vld [vmem:[%s11372_s3 + $0x188] sm:$0xff]  ;;  %v1389_v4 = vld [vmem:[%s11372_s3 + $0xb60] sm:$0xff]  ;;  %v1159_v36 = vld [vmem:[%s11372_s3 + $0x430] sm:$0xff] }
 0x256   : > { %v1164_v45 = vld [vmem:[%s11372_s3 + $0x458] sm:$0xff] }
 0x257   : > { %6061 = vmatpush1.bf16.msra.mxu1 %v6060_v41  ;;  %v6424_v41 = vpack.c.bf16 %v1364_v21, %v1359_v53  ;;  %v1484_v53 = vld [vmem:[%s11372_s3 + $0xe58] sm:$0xff]  ;;  %v6374_v60 = vpack.c.bf16 %v1164_v45, %v1159_v36 }
 0x258   : > { %6349 = vmatpush1.bf16.msra.mxu0 %v6348_v42  ;;  %6063 = vmatprep.subr.bf16.mxu1 %v6062_v33  ;;  %v1049_v42 = vld [vmem:[%s11372_s3 + $0xc0] sm:$0xff]  ;;  %v1054_v33 = vld [vmem:[%s11372_s3 + $0xe8] sm:$0xff] }
 0x259   : > { %6351 = vmatprep.subr.bf16.mxu0 %v6350_v7  ;;  %v1139_v7 = vld [vmem:[%s11372_s3 + $0x390] sm:$0xff]  ;;  %v6364_v34 = vpack.c.bf16 %v1054_v33, %v1049_v42  ;;  %v1169_v42 = vld [vmem:[%s11372_s3 + $0x480] sm:$0xff]  ;;  %v1174_v33 = vld [vmem:[%s11372_s3 + $0x4a8] sm:$0xff] }
 0x25b   : > { %6065 = vmatpush1.bf16.msra.mxu1 %v6064_v25  ;;  %v6366_v25 = vpack.c.bf16 %v1144_v18, %v1139_v7  ;;  %v6378_v18 = vpack.c.bf16 %v1174_v33, %v1169_v42  ;;  %v1289_v33 = vld [vmem:[%s11372_s3 + $0x840] sm:$0xff] }
 0x25c   : > { %6353 = vmatpush1.bf16.msra.mxu0 %v6352_v29  ;;  %6355 = vmatprep.subr.bf16.mxu1 %v6354_v30  ;;  %v1064_v29 = vld [vmem:[%s11372_s3 + $0x138] sm:$0xff]  ;;  %v1379_v30 = vld [vmem:[%s11372_s3 + $0xb10] sm:$0xff] }
 0x25d   : > { %6419 = vmatprep.subr.bf16.mxu0 %v6418_v37  ;;  %v1154_v37 = vld [vmem:[%s11372_s3 + $0x408] sm:$0xff]  ;;  %v6368_v59 = vpack.c.bf16 %v1064_v29, %v1059_v27  ;;  %v1184_v27 = vld [vmem:[%s11372_s3 + $0x4f8] sm:$0xff]  ;;  %v1499_v29 = vld [vmem:[%s11372_s3 + $0xed0] sm:$0xff] }
 0x25e   : > { %2145 = vmatmul.mubr.f32.vlgmr.msra.gmra.mrb[8].mxu1 %v9693_v17  ;;  %v6370_v40 = vpack.c.bf16 %v1154_v37, %v1149_v44  ;;  %v1099_v37 = vld [vmem:[%s11372_s3 + $0x250] sm:$0xff] }
 0x25f   : > { %2530 = vmatmul.mubr.f32.vlgmr.msra.gmra.mrb[12].mxu0 %v9693_v17  ;;  %6357 = vmatpush3.bf16.msra.mxu1 %v6356_v61  ;;  %v1069_v61 = vld [vmem:[%s11372_s3 + $0x160] sm:$0xff] }
 0x260   : > { %6421 = vmatpush3.bf16.msra.mxu0 %v6420_v39  ;;  %2150 = vmatprep.mubr.f32.mxu1 %v7069_v12  ;;  %v1394_v39 = vld [vmem:[%s11372_s3 + $0xb88] sm:$0xff]  ;;  %v6372_v21 = vpack.c.bf16 %v1074_v8, %v1069_v61  ;;  %v1669_v8 = vld [vmem:[%s11372_s3 + $0x1420] sm:$0xff] }
 0x261   : > { %2535 = vmatprep.mubr.f32.mxu0 %v7069_v12  ;;  %6359 = vmatprep.subr.bf16.mxu1 %v6358_v46  ;;  %v1459_v12 = vld [vmem:[%s11372_s3 + $0xd90] sm:$0xff]  ;;  %v1274_v61 = vld [vmem:[%s11372_s3 + $0x7c8] sm:$0xff] }
 0x262   : > { %2151 = vmatmul.mubr.f32.gmra.mrb[10].mxu1 %v9722_v63  ;;  %6423 = vmatprep.subr.bf16.mxu0 %v6422_v50  ;;  %v6430_v32 = vpack.c.bf16 %v1464_v23, %v1459_v12  ;;  %v1479_v46 = vld [vmem:[%s11372_s3 + $0xe30] sm:$0xff]  ;;  %v6436_v50 = vpack.c.bf16 %v1394_v39, %v1389_v4  ;;  %v1094_v12 = vld [vmem:[%s11372_s3 + $0x228] sm:$0xff]  ;;  %v1409_v23 = vld [vmem:[%s11372_s3 + $0xc00] sm:$0xff] }
 0x263   : > { %2536 = vmatmul.mubr.f32.gmra.mrb[14].mxu0 %v9722_v63  ;;  %6361 = vmatpush3.bf16.msra.mxu1 %v6360_v62  ;;  %v1084_v62 = vld [vmem:[%s11372_s3 + $0x1d8] sm:$0xff]  ;;  %v6438_v13 = vpack.c.bf16 %v1484_v53, %v1479_v46  ;;  %v1674_v4 = vld [vmem:[%s11372_s3 + $0x1448] sm:$0xff]  ;;  %v1189_v46 = vld [vmem:[%s11372_s3 + $0x520] sm:$0xff] }
 0x264   : > { %2606 = vmatprep.mubr.f32.mxu1 %v8206_v5  ;;  %6425 = vmatpush3.bf16.msra.mxu0 %v6424_v41  ;;  %v1384_v5 = vld [vmem:[%s11372_s3 + $0xb38] sm:$0xff]  ;;  %v6376_v3 = vpack.c.bf16 %v1084_v62, %v1079_v14  ;;  %v6482_v45 = vpack.c.bf16 %v1674_v4, %v1669_v8  ;;  %v1194_v53 = vld [vmem:[%s11372_s3 + $0x548] sm:$0xff]  ;;  %v1239_v8 = vld [vmem:[%s11372_s3 + $0x6b0] sm:$0xff] }
 0x265   : > { %2756 = vmatprep.mubr.f32.mxu0 %v8699_v6  ;;  %6363 = vmatprep.subr.bf16.mxu1 %v6362_v2  ;;  %v1474_v6 = vld [vmem:[%s11372_s3 + $0xe08] sm:$0xff]  ;;  %v6432_v56 = vpack.c.bf16 %v1384_v5, %v1379_v30  ;;  %v1404_v41 = vld [vmem:[%s11372_s3 + $0xbd8] sm:$0xff]  ;;  %v6388_v62 = vpack.c.bf16 %v1194_v53, %v1189_v46 }
 0x266   : > { %6427 = vmatprep.subr.bf16.mxu0 %v6426_v20  ;;  %v6434_v43 = vpack.c.bf16 %v1474_v6, %v1469_v38  ;;  %v1494_v2 = vld [vmem:[%s11372_s3 + $0xea8] sm:$0xff]  ;;  %v6440_v7 = vpack.c.bf16 %v1404_v41, %v1399_v47  ;;  %v1089_v20 = vld [vmem:[%s11372_s3 + $0x200] sm:$0xff]  ;;  %v1504_v30 = vld [vmem:[%s11372_s3 + $0xef8] sm:$0xff] }
 0x267   : > { %6365 = vmatpush3.bf16.msra.mxu1 %v6364_v34  ;;  %v6442_v34 = vpack.c.bf16 %v1494_v2, %v1489_v15  ;;  %v1104_v38 = vld [vmem:[%s11372_s3 + $0x278] sm:$0xff]  ;;  %v1419_v6 = vld [vmem:[%s11372_s3 + $0xc50] sm:$0xff]  ;;  %v1294_v15 = vld [vmem:[%s11372_s3 + $0x868] sm:$0xff] }
 0x268   : > { %6429 = vmatpush3.bf16.msra.mxu0 %v6428_v24  ;;  %6367 = vmatprep.subr.bf16.mxu1 %v6366_v25  ;;  %v1414_v24 = vld [vmem:[%s11372_s3 + $0xc28] sm:$0xff]  ;;  %v1179_v25 = vld [vmem:[%s11372_s3 + $0x4d0] sm:$0xff]  ;;  %v1684_v14 = vld [vmem:[%s11372_s3 + $0x1498] sm:$0xff] }
 0x269   : > { %6431 = vmatprep.subr.bf16.mxu0 %v6430_v32  ;;  %v6380_v32 = vpack.c.bf16 %v1094_v12, %v1089_v20  ;;  %v6444_v5 = vpack.c.bf16 %v1414_v24, %v1409_v23  ;;  %v6382_v44 = vpack.c.bf16 %v1184_v27, %v1179_v25  ;;  %v1204_v41 = vld [vmem:[%s11372_s3 + $0x598] sm:$0xff]  ;;  %v1689_v2 = vld [vmem:[%s11372_s3 + $0x14c0] sm:$0xff]  ;;  %v1699_v12 = vld [vmem:[%s11372_s3 + $0x1510] sm:$0xff] }
 0x26a   : > { %v1304_v20 = vld [vmem:[%s11372_s3 + $0x8b8] sm:$0xff]  ;;  %v1309_v25 = vld [vmem:[%s11372_s3 + $0x8e0] sm:$0xff]  ;;  %v1734_v46 = vld [vmem:[%s11372_s3 + $0x1628] sm:$0xff] }
 0x26b   : > { %6369 = vmatpush3.bf16.msra.mxu1 %v6368_v59  ;;  %v6446_v59 = vpack.c.bf16 %v1504_v30, %v1499_v29  ;;  %v1709_v27 = vld [vmem:[%s11372_s3 + $0x1560] sm:$0xff]  ;;  %v1714_v29 = vld [vmem:[%s11372_s3 + $0x1588] sm:$0xff]  ;;  %v1244_v4 = vld [vmem:[%s11372_s3 + $0x6d8] sm:$0xff] }
 0x26c   : > { %6433 = vmatpush3.bf16.msra.mxu0 %v6432_v56  ;;  %6371 = vmatprep.subr.bf16.mxu1 %v6370_v40  ;;  %v1424_v56 = vld [vmem:[%s11372_s3 + $0xc78] sm:$0xff]  ;;  %v1269_v40 = vld [vmem:[%s11372_s3 + $0x7a0] sm:$0xff]  ;;  %v6408_v53 = vpack.c.bf16 %v1244_v4, %v1239_v8 }
 0x26d   : > { %6435 = vmatprep.subr.bf16.mxu0 %v6434_v43  ;;  %v6384_v43 = vpack.c.bf16 %v1104_v38, %v1099_v37  ;;  %v6448_v39 = vpack.c.bf16 %v1424_v56, %v1419_v6  ;;  %v6386_v36 = vpack.c.bf16 %v1274_v61, %v1269_v40  ;;  %v6498_v37 = vpack.c.bf16 %v1714_v29, %v1709_v27  ;;  %v1319_v38 = vld [vmem:[%s11372_s3 + $0x930] sm:$0xff]  ;;  %v1324_v6 = vld [vmem:[%s11372_s3 + $0x958] sm:$0xff] }
 0x26e   : > { %v1724_v56 = vld [vmem:[%s11372_s3 + $0x15d8] sm:$0xff]  ;;  %v6406_v61 = vpack.c.bf16 %v1324_v6, %v1319_v38  ;;  %v1519_v27 = vld [vmem:[%s11372_s3 + $0xf70] sm:$0xff]  ;;  %v1614_v6 = vld [vmem:[%s11372_s3 + $0x1268] sm:$0xff] }
 0x26f   : > { %6373 = vmatpush3.bf16.msra.mxu1 %v6372_v21  ;;  %v1279_v21 = vld [vmem:[%s11372_s3 + $0x7f0] sm:$0xff]  ;;  %v1524_v29 = vld [vmem:[%s11372_s3 + $0xf98] sm:$0xff] }
 0x270   : > { %6437 = vmatpush3.bf16.msra.mxu0 %v6436_v50  ;;  %6375 = vmatprep.subr.bf16.mxu1 %v6374_v60  ;;  %v1284_v50 = vld [vmem:[%s11372_s3 + $0x818] sm:$0xff]  ;;  %v1679_v60 = vld [vmem:[%s11372_s3 + $0x1470] sm:$0xff] }
 0x271   : > { %6439 = vmatprep.subr.bf16.mxu0 %v6438_v13  ;;  %v6390_v47 = vpack.c.bf16 %v1284_v50, %v1279_v21  ;;  %v1199_v13 = vld [vmem:[%s11372_s3 + $0x570] sm:$0xff]  ;;  %v6486_v42 = vpack.c.bf16 %v1684_v14, %v1679_v60  ;;  %v1249_v50 = vld [vmem:[%s11372_s3 + $0x700] sm:$0xff]  ;;  %v1254_v60 = vld [vmem:[%s11372_s3 + $0x728] sm:$0xff] }
 0x272   : > { %v2964_v38 = vld [vmem:[%s11374_s5 + $0x118] sm:$0xff] }
 0x273   : > { %6377 = vmatpush3.bf16.msra.mxu1 %v6376_v3  ;;  %v6392_v3 = vpack.c.bf16 %v1204_v41, %v1199_v13  ;;  %v1739_v13 = vld [vmem:[%s11372_s3 + $0x1650] sm:$0xff]  ;;  %v1744_v41 = vld [vmem:[%s11372_s3 + $0x1678] sm:$0xff] }
 0x274   : > { %6441 = vmatpush3.bf16.msra.mxu0 %v6440_v7  ;;  %6379 = vmatprep.subr.bf16.mxu1 %v6378_v18  ;;  %v6394_v7 = vpack.c.bf16 %v1294_v15, %v1289_v33  ;;  %v1259_v15 = vld [vmem:[%s11372_s3 + $0x750] sm:$0xff] }
 0x275   : > { %6443 = vmatprep.subr.bf16.mxu0 %v6442_v34 }
 0x277   : > { %6381 = vmatpush3.bf16.msra.mxu1 %v6380_v32 }
 0x278   : > { %6445 = vmatpush3.bf16.msra.mxu0 %v6444_v5  ;;  %6383 = vmatprep.subr.bf16.mxu1 %v6382_v44  ;;  %v1229_v5 = vld [vmem:[%s11372_s3 + $0x660] sm:$0xff]  ;;  %v1234_v44 = vld [vmem:[%s11372_s3 + $0x688] sm:$0xff] }
 0x279   : > { %6447 = vmatprep.subr.bf16.mxu0 %v6446_v59  ;;  %v1719_v59 = vld [vmem:[%s11372_s3 + $0x15b0] sm:$0xff]  ;;  %v6404_v40 = vpack.c.bf16 %v1234_v44, %v1229_v5  ;;  %v1609_v5 = vld [vmem:[%s11372_s3 + $0x1240] sm:$0xff] }
 0x27a   : > { %v6458_v4 = vpack.c.bf16 %v1614_v6, %v1609_v5 }
 0x27b   : > { %6385 = vmatpush3.bf16.msra.mxu1 %v6384_v43  ;;  %v6502_v43 = vpack.c.bf16 %v1724_v56, %v1719_v59  ;;  %v2981_v59 = vld [vmem:[%s11374_s5 + $0x1a0] sm:$0xff]  ;;  %v2982_v56 = vld [vmem:[%s11374_s5 + $0x1a8] sm:$0xff] }
 0x27c   : > { %6449 = vmatpush3.bf16.msra.mxu0 %v6448_v39  ;;  %6387 = vmatprep.subr.bf16.mxu1 %v6386_v36  ;;  %v1329_v39 = vld [vmem:[%s11372_s3 + $0x980] sm:$0xff]  ;;  %v1334_v36 = vld [vmem:[%s11372_s3 + $0x9a8] sm:$0xff] }
 0x27d   : > { %6483 = vmatprep.subr.bf16.mxu0 %v6482_v45  ;;  %v6410_v21 = vpack.c.bf16 %v1334_v36, %v1329_v39  ;;  %v2966_v39 = vld [vmem:[%s11374_s5 + $0x128] sm:$0xff]  ;;  %v1624_v36 = vld [vmem:[%s11372_s3 + $0x12b8] sm:$0xff] }
 0x27e   : > { %2607 = vmatmul.mubr.f32.vlgmr.msra.gmra.mrb[12].mxu1 %v8214_v11  ;;  %v1694_v11 = vld [vmem:[%s11372_s3 + $0x14e8] sm:$0xff] }
 0x27f   : > { %2757 = vmatmul.mubr.f32.vlgmr.msra.gmra.mrb[16].mxu0 %v9074_v52  ;;  %2611 = vmatprep.mubr.f32.mxu1 %v8308_v1  ;;  %v1209_v52 = vld [vmem:[%s11372_s3 + $0x5c0] sm:$0xff]  ;;  %v1214_v1 = vld [vmem:[%s11372_s3 + $0x5e8] sm:$0xff]  ;;  %v6490_v18 = vpack.c.bf16 %v1694_v11, %v1689_v2  ;;  %v1264_v2 = vld [vmem:[%s11372_s3 + $0x778] sm:$0xff]  ;;  %v6510_v11 = vpack.c.bf16 %v1744_v41, %v1739_v13 }
 0x280   : > { %6389 = vmatpush3.bf16.msra.mxu1 %v6388_v62  ;;  %2761 = vmatprep.mubr.f32.mxu0 %v9079_v58  ;;  %v1299_v58 = vld [vmem:[%s11372_s3 + $0x890] sm:$0xff]  ;;  %v6396_v23 = vpack.c.bf16 %v1214_v1, %v1209_v52  ;;  %v2977_v52 = vld [vmem:[%s11374_s5 + $0x180] sm:$0xff]  ;;  %v2978_v1 = vld [vmem:[%s11374_s5 + $0x188] sm:$0xff] }
 0x281   : > { %6485 = vmatpush3.bf16.msra.mxu0 %v6482_v45  ;;  %6391 = vmatprep.subr.bf16.mxu1 %v6390_v47  ;;  %v6398_v34 = vpack.c.bf16 %v1304_v20, %v1299_v58  ;;  %v1729_v45 = vld [vmem:[%s11372_s3 + $0x1600] sm:$0xff]  ;;  %v1339_v62 = vld [vmem:[%s11372_s3 + $0x9d0] sm:$0xff]  ;;  %v1344_v47 = vld [vmem:[%s11372_s3 + $0x9f8] sm:$0xff] }
 0x282   : > { %2612 = vmatmul.mubr.f32.gmra.mrb[14].mxu1 %v8306_v31  ;;  %6487 = vmatprep.subr.bf16.mxu0 %v6486_v42  ;;  %v1704_v31 = vld [vmem:[%s11372_s3 + $0x1538] sm:$0xff]  ;;  %v6506_v14 = vpack.c.bf16 %v1734_v46, %v1729_v45  ;;  %v6414_v33 = vpack.c.bf16 %v1344_v47, %v1339_v62  ;;  %v1509_v20 = vld [vmem:[%s11372_s3 + $0xf20] sm:$0xff]  ;;  %v2983_v45 = vld [vmem:[%s11374_s5 + $0x1b0] sm:$0xff] }
 0x283   : > { %2762 = vmatmul.mubr.f32.gmra.mrb[18].mxu0 %v9108_v16  ;;  %2681 = vmatprep.mubr.f32.mxu1 %v8329_v9  ;;  %v1219_v16 = vld [vmem:[%s11372_s3 + $0x610] sm:$0xff]  ;;  %v1224_v9 = vld [vmem:[%s11372_s3 + $0x638] sm:$0xff]  ;;  %v6494_v24 = vpack.c.bf16 %v1704_v31, %v1699_v12  ;;  %v1514_v12 = vld [vmem:[%s11372_s3 + $0xf48] sm:$0xff] }
 0x284   : > { %6393 = vmatpush3.bf16.msra.mxu1 %v6392_v3  ;;  %5509 = vmatprep.mubr.f32.mxu0 %v9693_v17  ;;  %v1314_v17 = vld [vmem:[%s11372_s3 + $0x908] sm:$0xff]  ;;  %v6400_v30 = vpack.c.bf16 %v1224_v9, %v1219_v16  ;;  %v1589_v3 = vld [vmem:[%s11372_s3 + $0x11a0] sm:$0xff]  ;;  %v1599_v31 = vld [vmem:[%s11372_s3 + $0x11f0] sm:$0xff] }
 0x285   : > { %6489 = vmatpush3.bf16.msra.mxu0 %v6486_v42  ;;  %6395 = vmatprep.subr.bf16.mxu1 %v6394_v7  ;;  %v6402_v32 = vpack.c.bf16 %v1314_v17, %v1309_v25  ;;  %v6412_v42 = vpack.c.bf16 %v1254_v60, %v1249_v50  ;;  %v1594_v7 = vld [vmem:[%s11372_s3 + $0x11c8] sm:$0xff]  ;;  %v1604_v9 = vld [vmem:[%s11372_s3 + $0x1218] sm:$0xff]  ;;  %v6452_v17 = vpack.c.bf16 %v1514_v12, %v1509_v20  ;;  %v2967_v62 = vld [vmem:[%s11374_s5 + $0x130] sm:$0xff] }
 0x286   : > { %6491 = vmatprep.subr.bf16.mxu0 %v6490_v18  ;;  %v6450_v58 = vpack.c.bf16 %v1594_v7, %v1589_v3  ;;  %v2962_v16 = vld [vmem:[%s11374_s5 + $0x108] sm:$0xff]  ;;  %v2980_v25 = vld [vmem:[%s11374_s5 + $0x198] sm:$0xff]  ;;  %v2985_v41 = vld [vmem:[%s11374_s5 + $0x1c0] sm:$0xff] }
 0x287   : > { %v2984_v46 = vld [vmem:[%s11374_s5 + $0x1b8] sm:$0xff]  ;;  %v1634_v13 = vld [vmem:[%s11372_s3 + $0x1308] sm:$0xff]  ;;  %v1639_v7 = vld [vmem:[%s11372_s3 + $0x1330] sm:$0xff] }
 0x288   : > { %6397 = vmatpush3.bf16.msra.mxu1 %v6396_v23  ;;  %v6546_v23 = vpack.c.bf16 %v2978_v1, %v2977_v52  ;;  %v2968_v47 = vld [vmem:[%s11374_s5 + $0x138] sm:$0xff]  ;;  %v2969_v1 = vld [vmem:[%s11374_s5 + $0x140] sm:$0xff]  ;;  %v2987_v20 = vld [vmem:[%s11374_s5 + $0x1d0] sm:$0xff] }
 0x289   : > { %6493 = vmatpush3.bf16.msra.mxu0 %v6490_v18  ;;  %6399 = vmatprep.subr.bf16.mxu1 %v6398_v34  ;;  %v6416_v18 = vpack.c.bf16 %v1264_v2, %v1259_v15  ;;  %v2961_v34 = vld [vmem:[%s11374_s5 + $0x100] sm:$0xff]  ;;  %v1554_v2 = vld [vmem:[%s11372_s3 + $0x1088] sm:$0xff]  ;;  %v2988_v12 = vld [vmem:[%s11374_s5 + $0x1d8] sm:$0xff] }
 0x28a   : > { %6495 = vmatprep.subr.bf16.mxu0 %v6494_v24  ;;  %v1549_v15 = vld [vmem:[%s11372_s3 + $0x1060] sm:$0xff] }
 0x28c   : > { %6401 = vmatpush3.bf16.msra.mxu1 %v6400_v30  ;;  %v6548_v30 = vpack.c.bf16 %v2962_v16, %v2961_v34  ;;  %v1564_v34 = vld [vmem:[%s11372_s3 + $0x10d8] sm:$0xff] }
 0x28d   : > { %6497 = vmatpush3.bf16.msra.mxu0 %v6494_v24  ;;  %6403 = vmatprep.subr.bf16.mxu1 %v6402_v32  ;;  %v2979_v24 = vld [vmem:[%s11374_s5 + $0x190] sm:$0xff]  ;;  %v6454_v32 = vpack.c.bf16 %v1604_v9, %v1599_v31  ;;  %v6468_v31 = vpack.c.bf16 %v1554_v2, %v1549_v15 }
 0x28e   : > { %6499 = vmatprep.subr.bf16.mxu0 %v6498_v37  ;;  %v6550_v44 = vpack.c.bf16 %v2980_v25, %v2979_v24  ;;  %v1649_v24 = vld [vmem:[%s11372_s3 + $0x1380] sm:$0xff]  ;;  %v6566_v25 = vpack.c.bf16 %v2988_v12, %v2987_v20  ;;  %v2934_v20 = vld [vmem:[%s11374_s5 + $0x28] sm:$0xff]  ;;  %v2951_v12 = vld [vmem:[%s11374_s5 + $0xb0] sm:$0xff] }
 0x290   : > { %6405 = vmatpush3.bf16.msra.mxu1 %v6404_v40  ;;  %v6456_v40 = vpack.c.bf16 %v1524_v29, %v1519_v27  ;;  %v2972_v27 = vld [vmem:[%s11374_s5 + $0x158] sm:$0xff]  ;;  %v1654_v29 = vld [vmem:[%s11372_s3 + $0x13a8] sm:$0xff] }
 0x291   : > { %6501 = vmatpush3.bf16.msra.mxu0 %v6498_v37  ;;  %6407 = vmatprep.subr.bf16.mxu1 %v6406_v61  ;;  %v2963_v37 = vld [vmem:[%s11374_s5 + $0x110] sm:$0xff]  ;;  %v1534_v61 = vld [vmem:[%s11372_s3 + $0xfe8] sm:$0xff]  ;;  %v6474_v6 = vpack.c.bf16 %v1654_v29, %v1649_v24  ;;  %v2956_v29 = vld [vmem:[%s11374_s5 + $0xd8] sm:$0xff] }
 0x292   : > { %6503 = vmatprep.subr.bf16.mxu0 %v6502_v43  ;;  %v6552_v8 = vpack.c.bf16 %v2964_v38, %v2963_v37  ;;  %v1574_v37 = vld [vmem:[%s11372_s3 + $0x1128] sm:$0xff] }
 0x294   : > { %6409 = vmatpush3.bf16.msra.mxu1 %v6408_v53 }
 0x295   : > { %6505 = vmatpush3.bf16.msra.mxu0 %v6502_v43  ;;  %6411 = vmatprep.subr.bf16.mxu1 %v6410_v21  ;;  %v2965_v43 = vld [vmem:[%s11374_s5 + $0x120] sm:$0xff]  ;;  %v1544_v21 = vld [vmem:[%s11372_s3 + $0x1038] sm:$0xff] }
 0x296   : > { %6507 = vmatprep.subr.bf16.mxu0 %v6506_v14  ;;  %v6556_v50 = vpack.c.bf16 %v2966_v39, %v2965_v43  ;;  %v1584_v43 = vld [vmem:[%s11372_s3 + $0x1178] sm:$0xff] }
 0x298   : > { %6413 = vmatpush3.bf16.msra.mxu1 %v6412_v42  ;;  %v2986_v42 = vld [vmem:[%s11374_s5 + $0x1c8] sm:$0xff] }
 0x299   : > { %6509 = vmatpush3.bf16.msra.mxu0 %v6506_v14  ;;  %6415 = vmatprep.subr.bf16.mxu1 %v6414_v33  ;;  %v1629_v14 = vld [vmem:[%s11372_s3 + $0x12e0] sm:$0xff]  ;;  %v6562_v52 = vpack.c.bf16 %v2986_v42, %v2985_v41  ;;  %v2947_v42 = vld [vmem:[%s11374_s5 + $0x90] sm:$0xff] }
 0x29a   : > { %6511 = vmatprep.subr.bf16.mxu0 %v6510_v11  ;;  %v6466_v3 = vpack.c.bf16 %v1634_v13, %v1629_v14  ;;  %v2930_v13 = vld [vmem:[%s11374_s5 + $0x8] sm:$0xff] }
 0x29c   : > { %6417 = vmatpush3.bf16.msra.mxu1 %v6416_v18  ;;  %v2970_v18 = vld [vmem:[%s11374_s5 + $0x148] sm:$0xff] }
 0x29d   : > { %6513 = vmatpush3.bf16.msra.mxu0 %v6510_v11  ;;  %6451 = vmatprep.subr.bf16.mxu1 %v6450_v58  ;;  %v6560_v11 = vpack.c.bf16 %v2968_v47, %v2967_v62  ;;  %v1644_v58 = vld [vmem:[%s11372_s3 + $0x1358] sm:$0xff]  ;;  %v6564_v16 = vpack.c.bf16 %v2970_v18, %v2969_v1  ;;  %v2929_v47 = vld [vmem:[%s11374_s5] sm:$0xff] }
 0x29e   : > { %6547 = vmatprep.subr.bf16.mxu0 %v6546_v23  ;;  %v1559_v23 = vld [vmem:[%s11372_s3 + $0x10b0] sm:$0xff]  ;;  %v6470_v9 = vpack.c.bf16 %v1644_v58, %v1639_v7  ;;  %v6516_v15 = vpack.c.bf16 %v2930_v13, %v2929_v47  ;;  %v2949_v7 = vld [vmem:[%s11374_s5 + $0xa0] sm:$0xff] }
 0x29f   : > { %2682 = vmatmul.mubr.f32.vlgmr.msra.gmra.mrb[16].mxu1 %v8651_v10  ;;  %v1529_v10 = vld [vmem:[%s11372_s3 + $0xfc0] sm:$0xff]  ;;  %v6472_v5 = vpack.c.bf16 %v1564_v34, %v1559_v23  ;;  %v2935_v23 = vld [vmem:[%s11374_s5 + $0x30] sm:$0xff]  ;;  %v2936_v34 = vld [vmem:[%s11374_s5 + $0x38] sm:$0xff] }
 0x2a0   : > { %5510 = vmatmul.mubr.f32.vlgmr.msra.gmra.mrb[20].mxu0 %v9722_v63  ;;  %2686 = vmatprep.mubr.f32.mxu1 %v8660_v48  ;;  %v1619_v63 = vld [vmem:[%s11372_s3 + $0x1290] sm:$0xff]  ;;  %v6554_v48 = vpack.c.bf16 %v2982_v56, %v2981_v59  ;;  %v6460_v53 = vpack.c.bf16 %v1534_v61, %v1529_v10  ;;  %v2974_v10 = vld [vmem:[%s11374_s5 + $0x168] sm:$0xff]  ;;  %v1664_v61 = vld [vmem:[%s11372_s3 + $0x13f8] sm:$0xff] }
 0x2a1   : > { %6453 = vmatpush3.bf16.msra.mxu1 %v6452_v17  ;;  %6549 = vmatpush3.bf16.msra.mxu0 %v6548_v30  ;;  %v6462_v60 = vpack.c.bf16 %v1624_v36, %v1619_v63  ;;  %v2971_v17 = vld [vmem:[%s11374_s5 + $0x150] sm:$0xff]  ;;  %v2989_v30 = vld [vmem:[%s11374_s5 + $0x1e0] sm:$0xff] }
 0x2a2   : > { %6455 = vmatprep.subr.bf16.mxu1 %v6454_v32  ;;  %6551 = vmatprep.subr.bf16.mxu0 %v6550_v44  ;;  %v2990_v32 = vld [vmem:[%s11374_s5 + $0x1e8] sm:$0xff]  ;;  %v1569_v44 = vld [vmem:[%s11372_s3 + $0x1100] sm:$0xff]  ;;  %v6568_v38 = vpack.c.bf16 %v2972_v27, %v2971_v17  ;;  %v1659_v59 = vld [vmem:[%s11372_s3 + $0x13d0] sm:$0xff] }
 0x2a3   : > { %2687 = vmatmul.mubr.f32.gmra.mrb[18].mxu1 %v8687_v0  ;;  %v1539_v0 = vld [vmem:[%s11372_s3 + $0x1010] sm:$0xff]  ;;  %v6570_v56 = vpack.c.bf16 %v2990_v32, %v2989_v30  ;;  %v6476_v63 = vpack.c.bf16 %v1574_v37, %v1569_v44  ;;  %v6478_v36 = vpack.c.bf16 %v1664_v61, %v1659_v59  ;;  %v2933_v58 = vld [vmem:[%s11374_s5 + $0x20] sm:$0xff]  ;;  %v2938_v17 = vld [vmem:[%s11374_s5 + $0x48] sm:$0xff] }
 0x2a4   : > { %2831 = vmatprep.mubr.f32.mxu1 %v9111_v19  ;;  %v6558_v19 = vpack.c.bf16 %v2984_v46, %v2983_v45  ;;  %v6464_v33 = vpack.c.bf16 %v1544_v21, %v1539_v0  ;;  %v2945_v45 = vld [vmem:[%s11374_s5 + $0x80] sm:$0xff]  ;;  %v2976_v0 = vld [vmem:[%s11374_s5 + $0x178] sm:$0xff]  ;;  %v2946_v21 = vld [vmem:[%s11374_s5 + $0x88] sm:$0xff] }
 0x2a5   : > { %6457 = vmatpush3.bf16.msra.mxu1 %v6456_v40  ;;  %6553 = vmatpush3.bf16.msra.mxu0 %v6552_v8  ;;  %v2973_v40 = vld [vmem:[%s11374_s5 + $0x160] sm:$0xff]  ;;  %v2991_v8 = vld [vmem:[%s11374_s5 + $0x1f0] sm:$0xff]  ;;  %v6514_v62 = vpack.c.bf16 %v2946_v21, %v2945_v45  ;;  %v2940_v44 = vld [vmem:[%s11374_s5 + $0x58] sm:$0xff] }
 0x2a6   : > { %6459 = vmatprep.subr.bf16.mxu1 %v6458_v4  ;;  %6555 = vmatprep.subr.bf16.mxu0 %v6554_v48  ;;  %v2992_v4 = vld [vmem:[%s11374_s5 + $0x1f8] sm:$0xff]  ;;  %v1579_v48 = vld [vmem:[%s11372_s3 + $0x1150] sm:$0xff]  ;;  %v6572_v39 = vpack.c.bf16 %v2974_v10, %v2973_v40  ;;  %v2957_v37 = vld [vmem:[%s11374_s5 + $0xe0] sm:$0xff] }
 0x2a7   : > { %v6574_v46 = vpack.c.bf16 %v2992_v4, %v2991_v8  ;;  %v6480_v14 = vpack.c.bf16 %v1584_v43, %v1579_v48  ;;  %v2955_v27 = vld [vmem:[%s11374_s5 + $0xd0] sm:$0xff]  ;;  %v2942_v40 = vld [vmem:[%s11374_s5 + $0x68] sm:$0xff]  ;;  %v2960_v61 = vld [vmem:[%s11374_s5 + $0xf8] sm:$0xff] }
 0x2a8   : > { %v6534_v32 = vpack.c.bf16 %v2956_v29, %v2955_v27  ;;  %v2959_v10 = vld [vmem:[%s11374_s5 + $0xf0] sm:$0xff]  ;;  %v2944_v48 = vld [vmem:[%s11374_s5 + $0x78] sm:$0xff] }
 0x2a9   : > { %6461 = vmatpush3.bf16.msra.mxu1 %v6460_v53  ;;  %6557 = vmatpush3.bf16.msra.mxu0 %v6556_v50  ;;  %v2975_v53 = vld [vmem:[%s11374_s5 + $0x170] sm:$0xff]  ;;  %v4590_v50 = vld [vmem:[%s11374_s5 + $0x2c0] sm:$0xff]  ;;  %v6542_v4 = vpack.c.bf16 %v2960_v61, %v2959_v10  ;;  %v4597_v10 = vld [vmem:[%s11374_s5 + $0x2f8] sm:$0xff] }
 0x2aa   : > { %6463 = vmatprep.subr.bf16.mxu1 %v6462_v60  ;;  %6559 = vmatprep.subr.bf16.mxu0 %v6558_v19  ;;  %v4591_v60 = vld [vmem:[%s11374_s5 + $0x2c8] sm:$0xff]  ;;  %v6576_v19 = vpack.c.bf16 %v2976_v0, %v2975_v53 }
 0x2ab   : > { %v6594_v41 = vpack.c.bf16 %v4591_v60, %v4590_v50 }
 0x2ad   : > { %6465 = vmatpush3.bf16.msra.mxu1 %v6464_v33  ;;  %6561 = vmatpush3.bf16.msra.mxu0 %v6560_v11  ;;  %v2948_v33 = vld [vmem:[%s11374_s5 + $0x98] sm:$0xff]  ;;  %v2931_v11 = vld [vmem:[%s11374_s5 + $0x10] sm:$0xff] }
 0x2ae   : > { %6467 = vmatprep.subr.bf16.mxu1 %v6466_v3  ;;  %6563 = vmatprep.subr.bf16.mxu0 %v6562_v52  ;;  %v6518_v2 = vpack.c.bf16 %v2948_v33, %v2947_v42  ;;  %v2932_v3 = vld [vmem:[%s11374_s5 + $0x18] sm:$0xff]  ;;  %v2950_v52 = vld [vmem:[%s11374_s5 + $0xa8] sm:$0xff]  ;;  %v4592_v33 = vld [vmem:[%s11374_s5 + $0x2d0] sm:$0xff] }
 0x2af   : > { %v6520_v1 = vpack.c.bf16 %v2932_v3, %v2931_v11  ;;  %v6522_v18 = vpack.c.bf16 %v2950_v52, %v2949_v7 }
 0x2b1   : > { %6469 = vmatpush3.bf16.msra.mxu1 %v6468_v31  ;;  %6565 = vmatpush3.bf16.msra.mxu0 %v6564_v16  ;;  %v2953_v16 = vld [vmem:[%s11374_s5 + $0xc0] sm:$0xff] }
 0x2b2   : > { %6471 = vmatprep.subr.bf16.mxu1 %v6470_v9  ;;  %6567 = vmatprep.subr.bf16.mxu0 %v6566_v25  ;;  %v6528_v9 = vpack.c.bf16 %v2936_v34, %v2935_v23  ;;  %v2937_v25 = vld [vmem:[%s11374_s5 + $0x40] sm:$0xff]  ;;  %v4576_v34 = vld [vmem:[%s11374_s5 + $0x250] sm:$0xff] }
 0x2b3   : > { %v6532_v30 = vpack.c.bf16 %v2938_v17, %v2937_v25  ;;  %v2997_v25 = vld [vmem:[%s11374_s5 + $0x220] sm:$0xff]  ;;  %v2998_v17 = vld [vmem:[%s11374_s5 + $0x228] sm:$0xff] }
 0x2b5   : > { %6473 = vmatpush3.bf16.msra.mxu1 %v6472_v5  ;;  %6569 = vmatpush3.bf16.msra.mxu0 %v6568_v38  ;;  %v2939_v5 = vld [vmem:[%s11374_s5 + $0x50] sm:$0xff]  ;;  %v2958_v38 = vld [vmem:[%s11374_s5 + $0xe8] sm:$0xff] }
 0x2b6   : > { %6475 = vmatprep.subr.bf16.mxu1 %v6474_v6  ;;  %6571 = vmatprep.subr.bf16.mxu0 %v6570_v56  ;;  %v6536_v6 = vpack.c.bf16 %v2940_v44, %v2939_v5  ;;  %v6538_v59 = vpack.c.bf16 %v2958_v38, %v2957_v37  ;;  %v2941_v56 = vld [vmem:[%s11374_s5 + $0x60] sm:$0xff]  ;;  %v4579_v38 = vld [vmem:[%s11374_s5 + $0x268] sm:$0xff] }
 0x2b7   : > { %v6540_v8 = vpack.c.bf16 %v2942_v40, %v2941_v56  ;;  %v4578_v5 = vld [vmem:[%s11374_s5 + $0x260] sm:$0xff]  ;;  %v3000_v56 = vld [vmem:[%s11374_s5 + $0x238] sm:$0xff]  ;;  %v4596_v40 = vld [vmem:[%s11374_s5 + $0x2f0] sm:$0xff] }
 0x2b8   : > { %v6604_v61 = vpack.c.bf16 %v4579_v38, %v4578_v5 }
 0x2b9   : > { %6477 = vmatpush3.bf16.msra.mxu1 %v6476_v63  ;;  %6573 = vmatpush3.bf16.msra.mxu0 %v6572_v39  ;;  %v2943_v63 = vld [vmem:[%s11374_s5 + $0x70] sm:$0xff]  ;;  %v2993_v39 = vld [vmem:[%s11374_s5 + $0x200] sm:$0xff] }
 0x2ba   : > { %6479 = vmatprep.subr.bf16.mxu1 %v6478_v36  ;;  %6575 = vmatprep.subr.bf16.mxu0 %v6574_v46  ;;  %v6544_v43 = vpack.c.bf16 %v2944_v48, %v2943_v63  ;;  %v2994_v36 = vld [vmem:[%s11374_s5 + $0x208] sm:$0xff]  ;;  %v10325_v46 = vld [vmem:[%s11373_s4] sm:$0x1f]  ;;  %v6606_v63 = vpack.c.bf16 %v4597_v10, %v4596_v40  ;;  %v4581_v48 = vld [vmem:[%s11374_s5 + $0x278] sm:$0xff] }
 0x2bb   : > { %v6578_v45 = vpack.c.bf16 %v2994_v36, %v2993_v39  ;;  %v1750_v53 = vrot.slane %v10325_v46, %v575_v55  ;;  %v1758_v0 = vrot.slane %v10325_v46, %v583_v49  ;;  %v1754_v21 = vrot.slane %v10325_v46, %v579_v57  ;;  %v4574_v55 = vld [vmem:[%s11374_s5 + $0x240] sm:$0xff]  ;;  %v4575_v49 = vld [vmem:[%s11374_s5 + $0x248] sm:$0xff]  ;;  %v2995_v57 = vld [vmem:[%s11374_s5 + $0x210] sm:$0xff] }
 0x2bc   : > { %v1762_v50 = vrot.slane %v10325_v46, %v587_v28  ;;  %v2996_v28 = vld [vmem:[%s11374_s5 + $0x218] sm:$0xff]  ;;  %v6596_v3 = vpack.c.bf16 %v4575_v49, %v4574_v55  ;;  %v4623_v39 = vld [vmem:[%s11374_s5 + $0x3c8] sm:$0xff]  ;;  %v4598_v36 = vld [vmem:[%s11374_s5 + $0x300] sm:$0xff] }
 0x2bd   : > { %6481 = vmatpush3.bf16.msra.mxu1 %v6480_v14  ;;  %6577 = vmatpush3.bf16.msra.mxu0 %v6576_v19  ;;  %v4584_v49 = vld [vmem:[%s11374_s5 + $0x290] sm:$0xff]  ;;  %v4642_v40 = vld [vmem:[%s11374_s5 + $0x460] sm:$0xff]  ;;  %v4643_v10 = vld [vmem:[%s11374_s5 + $0x468] sm:$0xff] }
 0x2be   : > { %6515 = vmatprep.subr.bf16.mxu1 %v6514_v62  ;;  %6595 = vmatprep.subr.bf16.mxu0 %v6594_v41 }
 0x2c0   : > { %2832 = vmatmul.mubr.f32.vlgmr.msra.gmra.mrb[20].mxu1 %v9482_v26  ;;  %v2952_v26 = vld [vmem:[%s11374_s5 + $0xb8] sm:$0xff] }
 0x2c1   : > { %2836 = vmatprep.mubr.f32.mxu1 %v9485_v22  ;;  %6517 = vmatpush3.bf16.msra.mxu1 %v6516_v15  ;;  %v6524_v22 = vpack.c.bf16 %v2934_v20, %v2933_v58  ;;  %v6526_v31 = vpack.c.bf16 %v2952_v26, %v2951_v12  ;;  %v4593_v15 = vld [vmem:[%s11374_s5 + $0x2d8] sm:$0xff]  ;;  %v6582_v20 = vpack.c.bf16 %v2996_v28, %v2995_v57 }
 0x2c2   : > { %6519 = vmatprep.subr.bf16.mxu1 %v6518_v2  ;;  %v6598_v23 = vpack.c.bf16 %v4593_v15, %v4592_v33  ;;  %v4587_v33 = vld [vmem:[%s11374_s5 + $0x2a8] sm:$0xff]  ;;  %v4604_v15 = vld [vmem:[%s11374_s5 + $0x330] sm:$0xff] }
 0x2c4   : > { %2837 = vmatmul.mubr.f32.gmra.mrb[22].mxu1 %v9514_v35  ;;  %v2954_v35 = vld [vmem:[%s11374_s5 + $0xc8] sm:$0xff] }
 0x2c5   : > { %6521 = vmatpush3.bf16.msra.mxu1 %v6520_v1  ;;  %v6530_v24 = vpack.c.bf16 %v2954_v35, %v2953_v16  ;;  %v4577_v16 = vld [vmem:[%s11374_s5 + $0x258] sm:$0xff]  ;;  %v4594_v35 = vld [vmem:[%s11374_s5 + $0x2e0] sm:$0xff] }
 0x2c6   : > { %6523 = vmatprep.subr.bf16.mxu1 %v6522_v18 }
 0x2c9   : > { %6525 = vmatpush3.bf16.msra.mxu1 %v6524_v22 }
 0x2ca   : > { %6527 = vmatprep.subr.bf16.mxu1 %v6526_v31 }
 0x2cd   : > { %6529 = vmatpush3.bf16.msra.mxu1 %v6528_v9 }
 0x2ce   : > { %6531 = vmatprep.subr.bf16.mxu1 %v6530_v24  ;;  %v4595_v24 = vld [vmem:[%s11374_s5 + $0x2e8] sm:$0xff] }
 0x2cf   : > { %v6602_v37 = vpack.c.bf16 %v4595_v24, %v4594_v35 }
 0x2d1   : > { %6533 = vmatpush3.bf16.msra.mxu1 %v6532_v30 }
 0x2d2   : > { %6535 = vmatprep.subr.bf16.mxu1 %v6534_v32  ;;  %v6600_v32 = vpack.c.bf16 %v4577_v16, %v4576_v34 }
 0x2d5   : > { %6537 = vmatpush3.bf16.msra.mxu1 %v6536_v6  ;;  %v6586_v6 = vpack.c.bf16 %v2998_v17, %v2997_v25  ;;  %v4640_v25 = vld [vmem:[%s11374_s5 + $0x450] sm:$0xff]  ;;  %v4641_v17 = vld [vmem:[%s11374_s5 + $0x458] sm:$0xff] }
 0x2d6   : > { %6539 = vmatprep.subr.bf16.mxu1 %v6538_v59  ;;  %v2999_v59 = vld [vmem:[%s11374_s5 + $0x230] sm:$0xff] }
 0x2d9   : > { %6541 = vmatpush3.bf16.msra.mxu1 %v6540_v8  ;;  %v4580_v8 = vld [vmem:[%s11374_s5 + $0x270] sm:$0xff] }
 0x2da   : > { %6543 = vmatprep.subr.bf16.mxu1 %v6542_v4  ;;  %v6590_v4 = vpack.c.bf16 %v3000_v56, %v2999_v59  ;;  %v6662_v59 = vpack.c.bf16 %v4641_v17, %v4640_v25  ;;  %v4682_v17 = vld [vmem:[%s11374_s5 + $0x590] sm:$0xff] }
 0x2dd   : > { %6545 = vmatpush3.bf16.msra.mxu1 %v6544_v43  ;;  %v4622_v43 = vld [vmem:[%s11374_s5 + $0x3c0] sm:$0xff] }
 0x2de   : > { %6579 = vmatprep.subr.bf16.mxu1 %v6578_v45 }
 0x331   : > { %v2146_v60 = vpop.f32.mrb[8].mxu1 }
 0x332   : > { %v6914_v14 = vadd.f32 %v2146_v60, %v1750_v53  ;;  %v2531_v19 = vpop.f32.mrb[12].mxu0  ;;  %v2148_v62 = vpop.f32.mrb[9].mxu1  ;;  %v4583_v60 = vld [vmem:[%s11374_s5 + $0x288] sm:$0xff] }
 0x333   : > { %v6918_v47 = vadd.f32 %v2531_v19, %v1758_v0  ;;  %v6915_v13 = vadd.f32 %v2148_v62, %v1754_v21  ;;  %v2533_v41 = vpop.f32.mrb[13].mxu0  ;;  %v4601_v19 = vld [vmem:[%s11374_s5 + $0x318] sm:$0xff] }
 0x334   : > { %v6919_v42 = vadd.f32 %v2533_v41, %v1762_v50  ;;  %v10359_v7 = vmax.f32 %v6914_v14, 0.0  ;;  %v4600_v14 = vld [vmem:[%s11374_s5 + $0x310] sm:$0xff]  ;;  %v4603_v41 = vld [vmem:[%s11374_s5 + $0x328] sm:$0xff] }
 0x335   : > { %v10357_v2 = vmax.f32 %v6915_v13, 0.0  ;;  %v2152_v11 = vpop.f32.mrb[10].mxu1  ;;  %v10363_v12 = vmax.f32 %v6918_v47, 0.0  ;;  %v6614_v55 = vpack.c.bf16 %v4601_v19, %v4600_v14  ;;  %v4585_v47 = vld [vmem:[%s11374_s5 + $0x298] sm:$0xff]  ;;  %v4602_v13 = vld [vmem:[%s11374_s5 + $0x320] sm:$0xff] }
 0x336   : > { %v10361_v52 = vmax.f32 %v6919_v42, 0.0  ;;  %v6916_v1 = vadd.f32 %v2152_v11, %v1750_v53  ;;  %v2537_v18 = vpop.f32.mrb[14].mxu0  ;;  %v2154_v58 = vpop.f32.mrb[11].mxu1  ;;  %v6608_v53 = vpack.c.bf16 %v4581_v48, %v4580_v8  ;;  %v6616_v57 = vpack.c.bf16 %v4585_v47, %v4584_v49  ;;  %v4586_v42 = vld [vmem:[%s11374_s5 + $0x2a0] sm:$0xff]  ;;  %v4605_v11 = vld [vmem:[%s11374_s5 + $0x338] sm:$0xff]  ;;  %v4644_v8 = vld [vmem:[%s11374_s5 + $0x470] sm:$0xff] }
 0x337   : > { %v6920_v26 = vadd.f32 %v2537_v18, %v1758_v0  ;;  %v6917_v22 = vadd.f32 %v2154_v58, %v1754_v21  ;;  %v2539_v31 = vpop.f32.mrb[15].mxu0  ;;  %3072 = vmatprep.mubr.f32.mxu1 %v10357_v2  ;;  %v6626_v0 = vpack.c.bf16 %v4623_v39, %v4622_v43  ;;  %v6618_v28 = vpack.c.bf16 %v4603_v41, %v4602_v13  ;;  %v4588_v18 = vld [vmem:[%s11374_s5 + $0x2b0] sm:$0xff]  ;;  %v4589_v58 = vld [vmem:[%s11374_s5 + $0x2b8] sm:$0xff]  ;;  %v4696_v48 = vld [vmem:[%s11374_s5 + $0x600] sm:$0xff] }
 0x338   : > { %v6921_v9 = vadd.f32 %v2539_v31, %v1762_v50  ;;  %3147 = vmatprep.mubr.f32.mxu0 %v10361_v52  ;;  %3073 = vmatmul.mubr.f32.vlgmr.msra.gmra.mrb[24].mxu1 %v10359_v7  ;;  %v10389_v29 = vmax.f32 %v6916_v1, 0.0  ;;  %v4582_v50 = vld [vmem:[%s11374_s5 + $0x280] sm:$0xff]  ;;  %v6622_v1 = vpack.c.bf16 %v4605_v11, %v4604_v15  ;;  %v6624_v34 = vpack.c.bf16 %v4589_v58, %v4588_v18  ;;  %v4697_v43 = vld [vmem:[%s11374_s5 + $0x608] sm:$0xff] }
 0x339   : > { %v10386_v27 = vmax.f32 %v6917_v22, 0.0  ;;  %3148 = vmatmul.mubr.f32.vlgmr.msra.gmra.mrb[22].mxu0 %v10363_v12  ;;  %6581 = vmatpush3.bf16.msra.mxu1 %v6578_v45  ;;  %v10396_v44 = vmax.f32 %v6920_v26, 0.0  ;;  %v4599_v45 = vld [vmem:[%s11374_s5 + $0x308] sm:$0xff]  ;;  %v6612_v62 = vpack.c.bf16 %v4583_v60, %v4582_v50  ;;  %v6706_v39 = vpack.c.bf16 %v4697_v43, %v4696_v48  ;;  %v4606_v11 = vld [vmem:[%s11374_s5 + $0x340] sm:$0xff] }
 0x33a   : > { %v10391_v30 = vmax.f32 %v6921_v9, 0.0  ;;  %6597 = vmatpush3.bf16.msra.mxu0 %v6596_v3  ;;  %6583 = vmatprep.subr.bf16.mxu1 %v6582_v20  ;;  %v6610_v21 = vpack.c.bf16 %v4599_v45, %v4598_v36  ;;  %v6620_v3 = vpack.c.bf16 %v4587_v33, %v4586_v42  ;;  %v4639_v26 = vld [vmem:[%s11374_s5 + $0x448] sm:$0xff]  ;;  %v1766_v36 = vrot.slane %v10325_v46, %v591_v51  ;;  %v4680_v58 = vld [vmem:[%s11374_s5 + $0x580] sm:$0xff] }
 0x33b   : > { %3077 = vmatprep.mubr.f32.mxu1 %v10386_v27  ;;  %6599 = vmatprep.subr.bf16.mxu0 %v6598_v23  ;;  %v4607_v18 = vld [vmem:[%s11374_s5 + $0x348] sm:$0xff]  ;;  %v4684_v48 = vld [vmem:[%s11374_s5 + $0x5a0] sm:$0xff] }
 0x33c   : > { %3152 = vmatprep.mubr.f32.mxu0 %v10391_v30  ;;  %3078 = vmatmul.mubr.f32.gmra.mrb[26].mxu1 %v10389_v29  ;;  %v4685_v43 = vld [vmem:[%s11374_s5 + $0x5a8] sm:$0xff] }
 0x33d   : > { %3153 = vmatmul.mubr.f32.gmra.mrb[24].mxu0 %v10396_v44  ;;  %6585 = vmatpush3.bf16.msra.mxu1 %v6582_v20  ;;  %v4638_v20 = vld [vmem:[%s11374_s5 + $0x440] sm:$0xff] }
 0x33e   : > { %6601 = vmatpush3.bf16.msra.mxu0 %v6600_v32  ;;  %3381 = vmatprep.mubr.f32.mxu0 %v10357_v2  ;;  %v6658_v9 = vpack.c.bf16 %v4639_v26, %v4638_v20  ;;  %v4681_v20 = vld [vmem:[%s11374_s5 + $0x588] sm:$0xff]  ;;  %v4624_v26 = vld [vmem:[%s11374_s5 + $0x3d0] sm:$0xff] }
 0x33f   : > { %6603 = vmatprep.subr.bf16.mxu0 %v6602_v37  ;;  %6587 = vmatprep.subr.bf16.mxu1 %v6586_v6 }
 0x341   : > { %6589 = vmatpush3.bf16.msra.mxu1 %v6586_v6 }
 0x342   : > { %6605 = vmatpush3.bf16.msra.mxu0 %v6604_v61  ;;  %6591 = vmatprep.subr.bf16.mxu1 %v6590_v4  ;;  %v6666_v61 = vpack.c.bf16 %v4643_v10, %v4642_v40 }
 0x343   : > { %6607 = vmatprep.subr.bf16.mxu0 %v6606_v63 }
 0x345   : > { %6593 = vmatpush3.bf16.msra.mxu1 %v6590_v4  ;;  %v4645_v4 = vld [vmem:[%s11374_s5 + $0x478] sm:$0xff] }
 0x346   : > { %6609 = vmatpush3.bf16.msra.mxu0 %v6608_v53  ;;  %6627 = vmatprep.subr.bf16.mxu1 %v6626_v0  ;;  %v6670_v63 = vpack.c.bf16 %v4645_v4, %v4644_v8  ;;  %v4611_v8 = vld [vmem:[%s11374_s5 + $0x368] sm:$0xff] }
 0x347   : > { %6611 = vmatprep.subr.bf16.mxu0 %v6610_v21 }
 0x34a   : > { %6613 = vmatpush3.bf16.msra.mxu0 %v6612_v62 }
 0x34b   : > { %6615 = vmatprep.subr.bf16.mxu0 %v6614_v55 }
 0x34e   : > { %6617 = vmatpush3.bf16.msra.mxu0 %v6616_v57 }
 0x34f   : > { %6619 = vmatprep.subr.bf16.mxu0 %v6618_v28 }
 0x351   : > { %v4909_v22 = vpop.f32.mrb[12].mxu1 }
 0x352   : > { %6621 = vmatpush3.bf16.msra.mxu0 %v6620_v3  ;;  %v4985_v31 = vpop.f32.mrb[16].mxu0  ;;  %v4910_v23 = vpop.f32.mrb[13].mxu1 }
 0x353   : > { %v4911_v16 = vadd.f32 %v4910_v23, %v4909_v22  ;;  %v4986_v35 = vpop.f32.mrb[17].mxu0  ;;  %6623 = vmatprep.subr.bf16.mxu0 %v6622_v1  ;;  %v4698_v23 = vld [vmem:[%s11374_s5 + $0x610] sm:$0xff] }
 0x354   : > { %v4987_v24 = vadd.f32 %v4986_v35, %v4985_v31  ;;  %v4625_v31 = vld [vmem:[%s11374_s5 + $0x3d8] sm:$0xff]  ;;  %v6708_v35 = vpack.c.bf16 %v4681_v20, %v4680_v58 }
 0x355   : > { %v4912_v32 = vpop.f32.mrb[14].mxu1  ;;  %v2609_v21 = vadd.f32 %v4911_v16, %v1766_v36  ;;  %v6628_v16 = vpack.c.bf16 %v4607_v18, %v4606_v11  ;;  %v4632_v11 = vld [vmem:[%s11374_s5 + $0x410] sm:$0xff]  ;;  %v4707_v58 = vld [vmem:[%s11374_s5 + $0x658] sm:$0xff] }
 0x356   : > { %6625 = vmatpush3.bf16.msra.mxu0 %v6624_v34  ;;  %v4988_v5 = vpop.f32.mrb[18].mxu0  ;;  %v4913_v37 = vpop.f32.mrb[15].mxu1  ;;  %v4699_v34 = vld [vmem:[%s11374_s5 + $0x618] sm:$0xff]  ;;  %v4706_v18 = vld [vmem:[%s11374_s5 + $0x650] sm:$0xff] }
 0x357   : > { %v4914_v38 = vadd.f32 %v4913_v37, %v4912_v32  ;;  %v4989_v6 = vpop.f32.mrb[19].mxu0  ;;  %6659 = vmatprep.subr.bf16.mxu0 %v6658_v9  ;;  %v4683_v32 = vld [vmem:[%s11374_s5 + $0x598] sm:$0xff]  ;;  %v6630_v37 = vpack.c.bf16 %v4625_v31, %v4624_v26 }
 0x358   : > { %v4990_v56 = vadd.f32 %v4989_v6, %v4988_v5  ;;  %v4626_v5 = vld [vmem:[%s11374_s5 + $0x3e0] sm:$0xff]  ;;  %v4627_v6 = vld [vmem:[%s11374_s5 + $0x3e8] sm:$0xff]  ;;  %v6712_v10 = vpack.c.bf16 %v4683_v32, %v4682_v17  ;;  %v4617_v31 = vld [vmem:[%s11374_s5 + $0x398] sm:$0xff] }
 0x359   : > { %3382 = vmatmul.mubr.f32.vlgmr.msra.gmra.mrb[26].mxu0 %v10359_v7  ;;  %v2614_v55 = vadd.f32 %v4914_v38, %v1766_v36  ;;  %v6710_v38 = vpack.c.bf16 %v4699_v34, %v4698_v23  ;;  %v6634_v4 = vpack.c.bf16 %v4627_v6, %v4626_v5  ;;  %v4629_v36 = vld [vmem:[%s11374_s5 + $0x3f8] sm:$0xff]  ;;  %v6726_v34 = vpack.c.bf16 %v4707_v58, %v4706_v18  ;;  %v4708_v17 = vld [vmem:[%s11374_s5 + $0x660] sm:$0xff]  ;;  %v4709_v32 = vld [vmem:[%s11374_s5 + $0x668] sm:$0xff] }
 0x35a   : > { %3386 = vmatprep.mubr.f32.mxu0 %v10386_v27  ;;  %6661 = vmatpush3.bf16.msra.mxu0 %v6658_v9  ;;  %v4608_v9 = vld [vmem:[%s11374_s5 + $0x350] sm:$0xff]  ;;  %v4619_v6 = vld [vmem:[%s11374_s5 + $0x3a8] sm:$0xff] }
 0x35b   : > { %6663 = vmatprep.subr.bf16.mxu0 %v6662_v59 }
 0x35d   : > { %3387 = vmatmul.mubr.f32.gmra.mrb[28].mxu0 %v10389_v29 }
 0x35e   : > { %6665 = vmatpush3.bf16.msra.mxu0 %v6662_v59  ;;  %v4700_v59 = vld [vmem:[%s11374_s5 + $0x620] sm:$0xff] }
 0x35f   : > { %6667 = vmatprep.subr.bf16.mxu0 %v6666_v61 }
 0x362   : > { %6669 = vmatpush3.bf16.msra.mxu0 %v6666_v61  ;;  %v4610_v61 = vld [vmem:[%s11374_s5 + $0x360] sm:$0xff] }
 0x363   : > { %6671 = vmatprep.subr.bf16.mxu0 %v6670_v63 }
 0x366   : > { %6673 = vmatpush3.bf16.msra.mxu0 %v6670_v63 }
 0x367   : > { %6707 = vmatprep.subr.bf16.mxu0 %v6706_v39  ;;  %v4628_v39 = vld [vmem:[%s11374_s5 + $0x3f0] sm:$0xff] }
 0x372   : > { %v4947_v45 = vpop.f32.mrb[16].mxu1 }
 0x373   : > { %v5511_v53 = vpop.f32.mrb[20].mxu0  ;;  %v4948_v0 = vpop.f32.mrb[17].mxu1 }
 0x374   : > { %v4949_v50 = vadd.f32 %v4948_v0, %v4947_v45  ;;  %v2908_v60 = vpop.f32.mrb[21].mxu0  ;;  %v4702_v45 = vld [vmem:[%s11374_s5 + $0x630] sm:$0xff]  ;;  %v6636_v0 = vpack.c.bf16 %v4611_v8, %v4610_v61  ;;  %v4637_v8 = vld [vmem:[%s11374_s5 + $0x438] sm:$0xff] }
 0x375   : > { %v4636_v61 = vld [vmem:[%s11374_s5 + $0x430] sm:$0xff] }
 0x376   : > { %v2684_v14 = vadd.f32 %v4949_v50, %v2609_v21  ;;  %v4950_v19 = vpop.f32.mrb[18].mxu1  ;;  %v6716_v21 = vpack.c.bf16 %v4685_v43, %v4684_v48  ;;  %v4612_v50 = vld [vmem:[%s11374_s5 + $0x370] sm:$0xff] }
 0x377   : > { %v4951_v62 = vpop.f32.mrb[19].mxu1 }
 0x378   : > { %v4952_v49 = vadd.f32 %v4951_v62, %v4950_v19  ;;  %v2759_v47 = vadd.f32 %v4987_v24, %v2684_v14  ;;  %v4609_v24 = vld [vmem:[%s11374_s5 + $0x358] sm:$0xff]  ;;  %v6638_v14 = vpack.c.bf16 %v4629_v36, %v4628_v39  ;;  %v4686_v62 = vld [vmem:[%s11374_s5 + $0x5b0] sm:$0xff] }
 0x379   : > { %v6632_v40 = vpack.c.bf16 %v4609_v24, %v4608_v9  ;;  %v4634_v9 = vld [vmem:[%s11374_s5 + $0x420] sm:$0xff]  ;;  %v4635_v24 = vld [vmem:[%s11374_s5 + $0x428] sm:$0xff]  ;;  %v4620_v39 = vld [vmem:[%s11374_s5 + $0x3b0] sm:$0xff] }
 0x37a   : > { %v2689_v13 = vadd.f32 %v4952_v49, %v2614_v55  ;;  %v4687_v55 = vld [vmem:[%s11374_s5 + $0x5b8] sm:$0xff]  ;;  %v4630_v49 = vld [vmem:[%s11374_s5 + $0x400] sm:$0xff] }
 0x37b   : > { %v4621_v36 = vld [vmem:[%s11374_s5 + $0x3b8] sm:$0xff] }
 0x37c   : > { %v2764_v41 = vadd.f32 %v4990_v56, %v2689_v13  ;;  %v4701_v56 = vld [vmem:[%s11374_s5 + $0x628] sm:$0xff]  ;;  %v4704_v13 = vld [vmem:[%s11374_s5 + $0x640] sm:$0xff] }
 0x37d   : > { %v6714_v63 = vpack.c.bf16 %v4701_v56, %v4700_v59  ;;  %v6650_v59 = vpack.c.bf16 %v4635_v24, %v4634_v9  ;;  %v6730_v56 = vpack.c.bf16 %v4709_v32, %v4708_v17  ;;  %v4652_v9 = vld [vmem:[%s11374_s5 + $0x4a0] sm:$0xff]  ;;  %v4653_v24 = vld [vmem:[%s11374_s5 + $0x4a8] sm:$0xff] }
 0x37e   : > { %v4726_v17 = vld [vmem:[%s11374_s5 + $0x6e0] sm:$0xff] }
 0x393   : > { %v5023_v57 = vpop.f32.mrb[20].mxu1 }
 0x394   : > { %v5024_v28 = vpop.f32.mrb[21].mxu1 }
 0x395   : > { %v5025_v42 = vadd.f32 %v5024_v28, %v5023_v57  ;;  %v6720_v28 = vpack.c.bf16 %v4687_v55, %v4686_v62  ;;  %v6656_v62 = vpack.c.bf16 %v4621_v36, %v4620_v39  ;;  %v4672_v39 = vld [vmem:[%s11374_s5 + $0x540] sm:$0xff]  ;;  %v4673_v36 = vld [vmem:[%s11374_s5 + $0x548] sm:$0xff] }
 0x397   : > { %v2834_v54 = vadd.f32 %v5025_v42, %v2759_v47  ;;  %v5026_v33 = vpop.f32.mrb[22].mxu1  ;;  %v4631_v47 = vld [vmem:[%s11374_s5 + $0x408] sm:$0xff]  ;;  %v4614_v42 = vld [vmem:[%s11374_s5 + $0x380] sm:$0xff] }
 0x398   : > { %v5027_v51 = vpop.f32.mrb[23].mxu1 }
 0x399   : > { %v2909_v46 = vadd.f32 %v2908_v60, %v2834_v54  ;;  %v5028_v15 = vadd.f32 %v5027_v51, %v5026_v33  ;;  %v4613_v60 = vld [vmem:[%s11374_s5 + $0x378] sm:$0xff]  ;;  %v4615_v54 = vld [vmem:[%s11374_s5 + $0x388] sm:$0xff]  ;;  %v6642_v33 = vpack.c.bf16 %v4631_v47, %v4630_v49 }
 0x39a   : > { %v6640_v57 = vpack.c.bf16 %v4613_v60, %v4612_v50  ;;  %v6644_v20 = vpack.c.bf16 %v4615_v54, %v4614_v42  ;;  %v4664_v50 = vld [vmem:[%s11374_s5 + $0x500] sm:$0xff]  ;;  %v4665_v60 = vld [vmem:[%s11374_s5 + $0x508] sm:$0xff]  ;;  %v4666_v42 = vld [vmem:[%s11374_s5 + $0x510] sm:$0xff] }
 0x39b   : > { %v10517_v3 = vmax.f32 %v2909_v46, 0.0  ;;  %v2839_v1 = vadd.f32 %v5028_v15, %v2764_v41  ;;  %v4705_v41 = vld [vmem:[%s11374_s5 + $0x648] sm:$0xff]  ;;  %v4688_v46 = vld [vmem:[%s11374_s5 + $0x5c0] sm:$0xff]  ;;  %v6674_v49 = vpack.c.bf16 %v4665_v60, %v4664_v50  ;;  %v4667_v54 = vld [vmem:[%s11374_s5 + $0x518] sm:$0xff]  ;;  %v6690_v50 = vpack.c.bf16 %v4673_v36, %v4672_v39 }
 0x39c   : > { %v6722_v51 = vpack.c.bf16 %v4705_v41, %v4704_v13  ;;  %v4689_v15 = vld [vmem:[%s11374_s5 + $0x5c8] sm:$0xff]  ;;  %v4648_v13 = vld [vmem:[%s11374_s5 + $0x480] sm:$0xff]  ;;  %v6678_v18 = vpack.c.bf16 %v4667_v54, %v4666_v42  ;;  %v4658_v54 = vld [vmem:[%s11374_s5 + $0x4d0] sm:$0xff] }
 0x39d   : > { %v2914_v22 = vadd.f32 %v5511_v53, %v2839_v1  ;;  %5528 = vmatprep.mubr.msk.f32.mxu1 %vm3001_vm7, %v10517_v3  ;;  %5547 = vmatprep.mubr.msk.f32.mxu0 %vm3001_vm7, %v10517_v3  ;;  %v4703_v53 = vld [vmem:[%s11374_s5 + $0x638] sm:$0xff]  ;;  %v6724_v26 = vpack.c.bf16 %v4689_v15, %v4688_v46  ;;  %v4649_v41 = vld [vmem:[%s11374_s5 + $0x488] sm:$0xff]  ;;  %v4656_v60 = vld [vmem:[%s11374_s5 + $0x4c0] sm:$0xff] }
 0x39e   : > { %v6718_v19 = vpack.c.bf16 %v4703_v53, %v4702_v45  ;;  %v4633_v1 = vld [vmem:[%s11374_s5 + $0x418] sm:$0xff]  ;;  %v6654_v45 = vpack.c.bf16 %v4637_v8, %v4636_v61  ;;  %v6676_v46 = vpack.c.bf16 %v4649_v41, %v4648_v13  ;;  %v4654_v8 = vld [vmem:[%s11374_s5 + $0x4b0] sm:$0xff] }
 0x39f   : > { %v10550_v25 = vmax.f32 %v2914_v22, 0.0  ;;  %v4616_v22 = vld [vmem:[%s11374_s5 + $0x390] sm:$0xff]  ;;  %v6646_v23 = vpack.c.bf16 %v4633_v1, %v4632_v11  ;;  %v4651_v1 = vld [vmem:[%s11374_s5 + $0x498] sm:$0xff] }
 0x3a0   : > { %v6648_v5 = vpack.c.bf16 %v4617_v31, %v4616_v22  ;;  %v4650_v11 = vld [vmem:[%s11374_s5 + $0x490] sm:$0xff]  ;;  %v4668_v22 = vld [vmem:[%s11374_s5 + $0x520] sm:$0xff]  ;;  %v4669_v31 = vld [vmem:[%s11374_s5 + $0x528] sm:$0xff] }
 0x3a1   : > { %5529 = vmatmul.mubr.msk.f32.vlgmr.msra.gmra.mrb[28].mxu1 %vm3001_vm7, %v10550_v25  ;;  %5548 = vmatmul.mubr.msk.f32.vlgmr.msra.gmra.mrb[30].mxu0 %vm3001_vm7, %v10550_v25  ;;  %v6682_v32 = vpack.c.bf16 %v4669_v31, %v4668_v22  ;;  %v4748_v13 = vld [vmem:[%s11374_s5 + $0x790] sm:$0xff]  ;;  %v4749_v41 = vld [vmem:[%s11374_s5 + $0x798] sm:$0xff]  ;;  %v4660_v31 = vld [vmem:[%s11374_s5 + $0x4e0] sm:$0xff] }
 0x3a2   : > { %6629 = vmatpush3.bf16.msra.mxu1 %v6628_v16  ;;  %6709 = vmatpush3.bf16.msra.mxu0 %v6708_v35  ;;  %v4690_v16 = vld [vmem:[%s11374_s5 + $0x5d0] sm:$0xff]  ;;  %v4691_v35 = vld [vmem:[%s11374_s5 + $0x5d8] sm:$0xff] }
 0x3a3   : > { %3456 = vmatprep.mubr.f32.mxu1 %v10361_v52  ;;  %3767 = vmatprep.mubr.f32.mxu0 %v10361_v52 }
 0x3a4   : > { %6631 = vmatprep.subr.bf16.mxu1 %v6630_v37  ;;  %6711 = vmatprep.subr.bf16.mxu0 %v6710_v38  ;;  %v6728_v37 = vpack.c.bf16 %v4691_v35, %v4690_v16  ;;  %v4618_v38 = vld [vmem:[%s11374_s5 + $0x3a0] sm:$0xff]  ;;  %v6680_v16 = vpack.c.bf16 %v4651_v1, %v4650_v11  ;;  %v4677_v1 = vld [vmem:[%s11374_s5 + $0x568] sm:$0xff] }
 0x3a5   : > { %v6652_v48 = vpack.c.bf16 %v4619_v6, %v4618_v38  ;;  %v4670_v38 = vld [vmem:[%s11374_s5 + $0x530] sm:$0xff]  ;;  %v4671_v6 = vld [vmem:[%s11374_s5 + $0x538] sm:$0xff]  ;;  %v4676_v11 = vld [vmem:[%s11374_s5 + $0x560] sm:$0xff] }
 0x3a6   : > { %6633 = vmatpush3.bf16.msra.mxu1 %v6632_v40  ;;  %6713 = vmatpush3.bf16.msra.mxu0 %v6712_v10  ;;  %v4692_v40 = vld [vmem:[%s11374_s5 + $0x5e0] sm:$0xff]  ;;  %v4693_v10 = vld [vmem:[%s11374_s5 + $0x5e8] sm:$0xff]  ;;  %v6686_v61 = vpack.c.bf16 %v4671_v6, %v4670_v38  ;;  %v6698_v22 = vpack.c.bf16 %v4677_v1, %v4676_v11  ;;  %v4662_v6 = vld [vmem:[%s11374_s5 + $0x4f0] sm:$0xff] }
 0x3a7   : > { %6635 = vmatprep.subr.bf16.mxu1 %v6634_v4  ;;  %6715 = vmatprep.subr.bf16.mxu0 %v6714_v63  ;;  %v4710_v4 = vld [vmem:[%s11374_s5 + $0x670] sm:$0xff]  ;;  %v4711_v63 = vld [vmem:[%s11374_s5 + $0x678] sm:$0xff]  ;;  %v6732_v43 = vpack.c.bf16 %v4693_v10, %v4692_v40  ;;  %v6684_v40 = vpack.c.bf16 %v4653_v24, %v4652_v9  ;;  %v4754_v1 = vld [vmem:[%s11374_s5 + $0x7c0] sm:$0xff] }
 0x3a8   : > { %v6734_v53 = vpack.c.bf16 %v4711_v63, %v4710_v4  ;;  %v4655_v4 = vld [vmem:[%s11374_s5 + $0x4b8] sm:$0xff]  ;;  %v4728_v63 = vld [vmem:[%s11374_s5 + $0x6f0] sm:$0xff] }
 0x3a9   : > { %v4678_v9 = vld [vmem:[%s11374_s5 + $0x570] sm:$0xff]  ;;  %v4679_v24 = vld [vmem:[%s11374_s5 + $0x578] sm:$0xff] }
 0x3aa   : > { %6637 = vmatpush3.bf16.msra.mxu1 %v6636_v0  ;;  %6717 = vmatpush3.bf16.msra.mxu0 %v6716_v21  ;;  %v4694_v0 = vld [vmem:[%s11374_s5 + $0x5f0] sm:$0xff]  ;;  %v4695_v21 = vld [vmem:[%s11374_s5 + $0x5f8] sm:$0xff]  ;;  %v6702_v38 = vpack.c.bf16 %v4679_v24, %v4678_v9 }
 0x3ab   : > { %6639 = vmatprep.subr.bf16.mxu1 %v6638_v14  ;;  %6719 = vmatprep.subr.bf16.mxu0 %v6718_v19  ;;  %v4738_v14 = vld [vmem:[%s11374_s5 + $0x740] sm:$0xff]  ;;  %v4739_v19 = vld [vmem:[%s11374_s5 + $0x748] sm:$0xff]  ;;  %v6736_v55 = vpack.c.bf16 %v4695_v21, %v4694_v0  ;;  %v6688_v0 = vpack.c.bf16 %v4655_v4, %v4654_v8  ;;  %v4756_v9 = vld [vmem:[%s11374_s5 + $0x7d0] sm:$0xff] }
 0x3ac   : > { %v6754_v47 = vpack.c.bf16 %v4739_v19, %v4738_v14  ;;  %v4657_v14 = vld [vmem:[%s11374_s5 + $0x4c8] sm:$0xff]  ;;  %v4730_v19 = vld [vmem:[%s11374_s5 + $0x700] sm:$0xff]  ;;  %v4757_v24 = vld [vmem:[%s11374_s5 + $0x7d8] sm:$0xff] }
 0x3ad   : > { %v4713_v8 = vld [vmem:[%s11374_s5 + $0x688] sm:$0xff]  ;;  %v4786_v4 = vld [vmem:[%s11374_s5 + $0x8c0] sm:$0xff] }
 0x3ae   : > { %6641 = vmatpush3.bf16.msra.mxu1 %v6640_v57  ;;  %6721 = vmatpush3.bf16.msra.mxu0 %v6720_v28  ;;  %v4722_v57 = vld [vmem:[%s11374_s5 + $0x6c0] sm:$0xff]  ;;  %v4723_v28 = vld [vmem:[%s11374_s5 + $0x6c8] sm:$0xff] }
 0x3af   : > { %6643 = vmatprep.subr.bf16.mxu1 %v6642_v33  ;;  %6723 = vmatprep.subr.bf16.mxu0 %v6722_v51  ;;  %v4740_v33 = vld [vmem:[%s11374_s5 + $0x750] sm:$0xff]  ;;  %v4741_v51 = vld [vmem:[%s11374_s5 + $0x758] sm:$0xff]  ;;  %v6756_v15 = vpack.c.bf16 %v4723_v28, %v4722_v57  ;;  %v6692_v57 = vpack.c.bf16 %v4657_v14, %v4656_v60  ;;  %v4716_v14 = vld [vmem:[%s11374_s5 + $0x6a0] sm:$0xff] }
 0x3b0   : > { %v6758_v58 = vpack.c.bf16 %v4741_v51, %v4740_v33  ;;  %v4659_v33 = vld [vmem:[%s11374_s5 + $0x4d8] sm:$0xff]  ;;  %v4732_v51 = vld [vmem:[%s11374_s5 + $0x710] sm:$0xff] }
 0x3b2   : > { %6645 = vmatpush3.bf16.msra.mxu1 %v6644_v20  ;;  %6725 = vmatpush3.bf16.msra.mxu0 %v6724_v26  ;;  %v4724_v20 = vld [vmem:[%s11374_s5 + $0x6d0] sm:$0xff]  ;;  %v4725_v26 = vld [vmem:[%s11374_s5 + $0x6d8] sm:$0xff] }
 0x3b3   : > { %6647 = vmatprep.subr.bf16.mxu1 %v6646_v23  ;;  %6727 = vmatprep.subr.bf16.mxu0 %v6726_v34  ;;  %v4742_v23 = vld [vmem:[%s11374_s5 + $0x760] sm:$0xff]  ;;  %v4743_v34 = vld [vmem:[%s11374_s5 + $0x768] sm:$0xff]  ;;  %v6760_v35 = vpack.c.bf16 %v4725_v26, %v4724_v20  ;;  %v6696_v20 = vpack.c.bf16 %v4659_v33, %v4658_v54 }
 0x3b4   : > { %v4770_v33 = vld [vmem:[%s11374_s5 + $0x840] sm:$0xff] }
 0x3b6   : > { %6649 = vmatpush3.bf16.msra.mxu1 %v6648_v5  ;;  %6729 = vmatpush3.bf16.msra.mxu0 %v6728_v37  ;;  %v6762_v5 = vpack.c.bf16 %v4743_v34, %v4742_v23  ;;  %v4727_v37 = vld [vmem:[%s11374_s5 + $0x6e8] sm:$0xff]  ;;  %v4734_v34 = vld [vmem:[%s11374_s5 + $0x720] sm:$0xff] }
 0x3b7   : > { %6651 = vmatprep.subr.bf16.mxu1 %v6650_v59  ;;  %6731 = vmatprep.subr.bf16.mxu0 %v6730_v56  ;;  %v4744_v59 = vld [vmem:[%s11374_s5 + $0x770] sm:$0xff]  ;;  %v4745_v56 = vld [vmem:[%s11374_s5 + $0x778] sm:$0xff]  ;;  %v6764_v10 = vpack.c.bf16 %v4727_v37, %v4726_v17  ;;  %v4661_v23 = vld [vmem:[%s11374_s5 + $0x4e8] sm:$0xff] }
 0x3b8   : > { %v4752_v17 = vld [vmem:[%s11374_s5 + $0x7b0] sm:$0xff] }
 0x3ba   : > { %6653 = vmatpush3.bf16.msra.mxu1 %v6652_v48  ;;  %6733 = vmatpush3.bf16.msra.mxu0 %v6732_v43  ;;  %v6766_v48 = vpack.c.bf16 %v4745_v56, %v4744_v59  ;;  %v4729_v43 = vld [vmem:[%s11374_s5 + $0x6f8] sm:$0xff]  ;;  %v4736_v56 = vld [vmem:[%s11374_s5 + $0x730] sm:$0xff] }
 0x3bb   : > { %6655 = vmatprep.subr.bf16.mxu1 %v6654_v45  ;;  %6735 = vmatprep.subr.bf16.mxu0 %v6734_v53  ;;  %v4746_v45 = vld [vmem:[%s11374_s5 + $0x780] sm:$0xff]  ;;  %v4747_v53 = vld [vmem:[%s11374_s5 + $0x788] sm:$0xff]  ;;  %v6768_v21 = vpack.c.bf16 %v4729_v43, %v4728_v63  ;;  %v4663_v59 = vld [vmem:[%s11374_s5 + $0x4f8] sm:$0xff] }
 0x3bc   : > { %v4787_v63 = vld [vmem:[%s11374_s5 + $0x8c8] sm:$0xff] }
 0x3bd   : > { %v6818_v36 = vpack.c.bf16 %v4787_v63, %v4786_v4  ;;  %v4759_v4 = vld [vmem:[%s11374_s5 + $0x7e8] sm:$0xff]  ;;  %v4832_v63 = vld [vmem:[%s11374_s5 + $0xa20] sm:$0xff] }
 0x3be   : > { %6657 = vmatpush3.bf16.msra.mxu1 %v6656_v62  ;;  %6737 = vmatpush3.bf16.msra.mxu0 %v6736_v55  ;;  %v6770_v62 = vpack.c.bf16 %v4747_v53, %v4746_v45  ;;  %v4731_v55 = vld [vmem:[%s11374_s5 + $0x708] sm:$0xff]  ;;  %v4714_v45 = vld [vmem:[%s11374_s5 + $0x690] sm:$0xff]  ;;  %v4715_v53 = vld [vmem:[%s11374_s5 + $0x698] sm:$0xff] }
 0x3bf   : > { %6675 = vmatprep.subr.bf16.mxu1 %v6674_v49  ;;  %6755 = vmatprep.subr.bf16.mxu0 %v6754_v47  ;;  %v4674_v49 = vld [vmem:[%s11374_s5 + $0x550] sm:$0xff]  ;;  %v4675_v47 = vld [vmem:[%s11374_s5 + $0x558] sm:$0xff]  ;;  %v6772_v28 = vpack.c.bf16 %v4731_v55, %v4730_v19  ;;  %v4717_v19 = vld [vmem:[%s11374_s5 + $0x6a8] sm:$0xff] }
 0x3c0   : > { %v6694_v42 = vpack.c.bf16 %v4675_v47, %v4674_v49  ;;  %v4791_v55 = vld [vmem:[%s11374_s5 + $0x8e8] sm:$0xff]  ;;  %v6746_v49 = vpack.c.bf16 %v4717_v19, %v4716_v14  ;;  %v4834_v14 = vld [vmem:[%s11374_s5 + $0xa30] sm:$0xff] }
 0x3c1   : > { %3457 = vmatmul.mubr.f32.vlgmr.msra.gmra.mrb[30].mxu1 %v10363_v12  ;;  %3768 = vmatmul.mubr.f32.vlgmr.msra.gmra.mrb[32].mxu0 %v10363_v12 }
 0x3c2   : > { %3461 = vmatprep.mubr.f32.mxu1 %v10391_v30  ;;  %6677 = vmatpush3.bf16.msra.mxu1 %v6676_v46  ;;  %v6774_v46 = vpack.c.bf16 %v4749_v41, %v4748_v13  ;;  %v4718_v13 = vld [vmem:[%s11374_s5 + $0x6b0] sm:$0xff]  ;;  %v4719_v41 = vld [vmem:[%s11374_s5 + $0x6b8] sm:$0xff] }
 0x3c3   : > { %3772 = vmatprep.mubr.f32.mxu0 %v10391_v30  ;;  %6757 = vmatpush3.bf16.msra.mxu0 %v6756_v15  ;;  %v4733_v15 = vld [vmem:[%s11374_s5 + $0x718] sm:$0xff] }
 0x3c4   : > { %6679 = vmatprep.subr.bf16.mxu1 %v6678_v18  ;;  %6759 = vmatprep.subr.bf16.mxu0 %v6758_v58  ;;  %v4750_v18 = vld [vmem:[%s11374_s5 + $0x7a0] sm:$0xff]  ;;  %v4751_v58 = vld [vmem:[%s11374_s5 + $0x7a8] sm:$0xff]  ;;  %v6776_v26 = vpack.c.bf16 %v4733_v15, %v4732_v51 }
 0x3c5   : > { %3462 = vmatmul.mubr.f32.gmra.mrb[32].mxu1 %v10396_v44  ;;  %3773 = vmatmul.mubr.f32.gmra.mrb[34].mxu0 %v10396_v44  ;;  %v4771_v51 = vld [vmem:[%s11374_s5 + $0x848] sm:$0xff] }
 0x3c6   : > { %6681 = vmatpush3.bf16.msra.mxu1 %v6680_v16  ;;  %3692 = vmatprep.mubr.f32.mxu1 %v10357_v2  ;;  %v6778_v16 = vpack.c.bf16 %v4751_v58, %v4750_v18  ;;  %v4845_v15 = vld [vmem:[%s11374_s5 + $0xa88] sm:$0xff]  ;;  %v6786_v11 = vpack.c.bf16 %v4771_v51, %v4770_v33  ;;  %v4836_v33 = vld [vmem:[%s11374_s5 + $0xa40] sm:$0xff] }
 0x3c7   : > { %6761 = vmatpush3.bf16.msra.mxu0 %v6760_v35  ;;  %4002 = vmatprep.mubr.f32.mxu0 %v10357_v2  ;;  %v4735_v35 = vld [vmem:[%s11374_s5 + $0x728] sm:$0xff] }
 0x3c8   : > { %6683 = vmatprep.subr.bf16.mxu1 %v6682_v32  ;;  %6763 = vmatprep.subr.bf16.mxu0 %v6762_v5  ;;  %v4753_v32 = vld [vmem:[%s11374_s5 + $0x7b8] sm:$0xff]  ;;  %v6700_v5 = vpack.c.bf16 %v4661_v23, %v4660_v31  ;;  %v6780_v37 = vpack.c.bf16 %v4735_v35, %v4734_v34  ;;  %v4755_v18 = vld [vmem:[%s11374_s5 + $0x7c8] sm:$0xff]  ;;  %v4846_v34 = vld [vmem:[%s11374_s5 + $0xa90] sm:$0xff] }
 0x3c9   : > { %v4773_v31 = vld [vmem:[%s11374_s5 + $0x858] sm:$0xff]  ;;  %v6788_v23 = vpack.c.bf16 %v4755_v18, %v4754_v1  ;;  %v4854_v1 = vld [vmem:[%s11374_s5 + $0xad0] sm:$0xff] }
 0x3ca   : > { %6685 = vmatpush3.bf16.msra.mxu1 %v6684_v40  ;;  %v6782_v40 = vpack.c.bf16 %v4753_v32, %v4752_v17  ;;  %v4830_v17 = vld [vmem:[%s11374_s5 + $0xa10] sm:$0xff]  ;;  %v4855_v18 = vld [vmem:[%s11374_s5 + $0xad8] sm:$0xff] }
 0x3cb   : > { %6765 = vmatpush3.bf16.msra.mxu0 %v6764_v10  ;;  %6687 = vmatprep.subr.bf16.mxu1 %v6686_v61  ;;  %v4737_v10 = vld [vmem:[%s11374_s5 + $0x738] sm:$0xff]  ;;  %v4712_v61 = vld [vmem:[%s11374_s5 + $0x680] sm:$0xff] }
 0x3cc   : > { %6767 = vmatprep.subr.bf16.mxu0 %v6766_v48  ;;  %v6704_v48 = vpack.c.bf16 %v4663_v59, %v4662_v6  ;;  %v6784_v43 = vpack.c.bf16 %v4737_v10, %v4736_v56  ;;  %v6738_v39 = vpack.c.bf16 %v4713_v8, %v4712_v61  ;;  %v4848_v59 = vld [vmem:[%s11374_s5 + $0xaa0] sm:$0xff]  ;;  %v4849_v56 = vld [vmem:[%s11374_s5 + $0xaa8] sm:$0xff] }
 0x3cd   : > { %v4758_v8 = vld [vmem:[%s11374_s5 + $0x7e0] sm:$0xff] }
 0x3ce   : > { %6689 = vmatpush3.bf16.msra.mxu1 %v6688_v0  ;;  %v4788_v0 = vld [vmem:[%s11374_s5 + $0x8d0] sm:$0xff] }
 0x3cf   : > { %6769 = vmatpush3.bf16.msra.mxu0 %v6768_v21  ;;  %6691 = vmatprep.subr.bf16.mxu1 %v6690_v50  ;;  %v4789_v21 = vld [vmem:[%s11374_s5 + $0x8d8] sm:$0xff]  ;;  %v6742_v50 = vpack.c.bf16 %v4715_v53, %v4714_v45  ;;  %v4850_v45 = vld [vmem:[%s11374_s5 + $0xab0] sm:$0xff]  ;;  %v6796_v53 = vpack.c.bf16 %v4759_v4, %v4758_v8 }
 0x3d0   : > { %6771 = vmatprep.subr.bf16.mxu0 %v6770_v62  ;;  %v6822_v60 = vpack.c.bf16 %v4789_v21, %v4788_v0  ;;  %v4790_v62 = vld [vmem:[%s11374_s5 + $0x8e0] sm:$0xff]  ;;  %v4858_v8 = vld [vmem:[%s11374_s5 + $0xaf0] sm:$0xff]  ;;  %v4859_v4 = vld [vmem:[%s11374_s5 + $0xaf8] sm:$0xff] }
 0x3d1   : > { %v6826_v47 = vpack.c.bf16 %v4791_v55, %v4790_v62  ;;  %v4835_v62 = vld [vmem:[%s11374_s5 + $0xa38] sm:$0xff]  ;;  %v4778_v55 = vld [vmem:[%s11374_s5 + $0x880] sm:$0xff] }
 0x3d2   : > { %6693 = vmatpush3.bf16.msra.mxu1 %v6692_v57  ;;  %v4792_v57 = vld [vmem:[%s11374_s5 + $0x8f0] sm:$0xff] }
 0x3d3   : > { %6773 = vmatpush3.bf16.msra.mxu0 %v6772_v28  ;;  %6695 = vmatprep.subr.bf16.mxu1 %v6694_v42  ;;  %v4793_v28 = vld [vmem:[%s11374_s5 + $0x8f8] sm:$0xff]  ;;  %v6750_v42 = vpack.c.bf16 %v4719_v41, %v4718_v13  ;;  %v4853_v13 = vld [vmem:[%s11374_s5 + $0xac8] sm:$0xff] }
 0x3d4   : > { %6775 = vmatprep.subr.bf16.mxu0 %v6774_v46  ;;  %v6830_v54 = vpack.c.bf16 %v4793_v28, %v4792_v57  ;;  %v4844_v46 = vld [vmem:[%s11374_s5 + $0xa80] sm:$0xff]  ;;  %v6880_v57 = vpack.c.bf16 %v4835_v62, %v4834_v14 }
 0x3d5   : > { %v6866_v58 = vpack.c.bf16 %v4845_v15, %v4844_v46  ;;  %v4837_v46 = vld [vmem:[%s11374_s5 + $0xa48] sm:$0xff]  ;;  %v4780_v15 = vld [vmem:[%s11374_s5 + $0x890] sm:$0xff] }
 0x3d6   : > { %6697 = vmatpush3.bf16.msra.mxu1 %v6696_v20  ;;  %v4828_v20 = vld [vmem:[%s11374_s5 + $0xa00] sm:$0xff] }
 0x3d7   : > { %6777 = vmatpush3.bf16.msra.mxu0 %v6776_v26  ;;  %6699 = vmatprep.subr.bf16.mxu1 %v6698_v22  ;;  %v4829_v26 = vld [vmem:[%s11374_s5 + $0xa08] sm:$0xff]  ;;  %v4772_v22 = vld [vmem:[%s11374_s5 + $0x850] sm:$0xff] }
 0x3d8   : > { %6779 = vmatprep.subr.bf16.mxu0 %v6778_v16  ;;  %v4847_v16 = vld [vmem:[%s11374_s5 + $0xa98] sm:$0xff]  ;;  %v6868_v35 = vpack.c.bf16 %v4829_v26, %v4828_v20  ;;  %v6790_v32 = vpack.c.bf16 %v4773_v31, %v4772_v22  ;;  %v6884_v20 = vpack.c.bf16 %v4837_v46, %v4836_v33  ;;  %v4764_v22 = vld [vmem:[%s11374_s5 + $0x810] sm:$0xff] }
 0x3d9   : > { %v6870_v6 = vpack.c.bf16 %v4847_v16, %v4846_v34  ;;  %v4765_v31 = vld [vmem:[%s11374_s5 + $0x818] sm:$0xff]  ;;  %v6886_v34 = vpack.c.bf16 %v4855_v18, %v4854_v1 }
 0x3da   : > { %6701 = vmatpush3.bf16.msra.mxu1 %v6700_v5  ;;  %v4831_v5 = vld [vmem:[%s11374_s5 + $0xa18] sm:$0xff] }
 0x3db   : > { %6781 = vmatpush3.bf16.msra.mxu0 %v6780_v37  ;;  %6703 = vmatprep.subr.bf16.mxu1 %v6702_v38  ;;  %v4774_v37 = vld [vmem:[%s11374_s5 + $0x860] sm:$0xff]  ;;  %v4775_v38 = vld [vmem:[%s11374_s5 + $0x868] sm:$0xff]  ;;  %v6872_v10 = vpack.c.bf16 %v4831_v5, %v4830_v17  ;;  %v4839_v16 = vld [vmem:[%s11374_s5 + $0xa58] sm:$0xff] }
 0x3dc   : > { %6783 = vmatprep.subr.bf16.mxu0 %v6782_v40  ;;  %v6792_v40 = vpack.c.bf16 %v4757_v24, %v4756_v9  ;;  %v6794_v61 = vpack.c.bf16 %v4775_v38, %v4774_v37  ;;  %v4783_v9 = vld [vmem:[%s11374_s5 + $0x8a8] sm:$0xff]  ;;  %v4856_v24 = vld [vmem:[%s11374_s5 + $0xae0] sm:$0xff] }
 0x3dd   : > { %v4857_v17 = vld [vmem:[%s11374_s5 + $0xae8] sm:$0xff]  ;;  %v4766_v38 = vld [vmem:[%s11374_s5 + $0x820] sm:$0xff] }
 0x3de   : > { %6705 = vmatpush3.bf16.msra.mxu1 %v6704_v48  ;;  %v6874_v48 = vpack.c.bf16 %v4849_v56, %v4848_v59  ;;  %v4840_v59 = vld [vmem:[%s11374_s5 + $0xa60] sm:$0xff]  ;;  %v6890_v56 = vpack.c.bf16 %v4857_v17, %v4856_v24 }
 0x3df   : > { %6785 = vmatpush3.bf16.msra.mxu0 %v6784_v43  ;;  %6739 = vmatprep.subr.bf16.mxu1 %v6738_v39  ;;  %v4833_v43 = vld [vmem:[%s11374_s5 + $0xa28] sm:$0xff] }
 0x3e0   : > { %6819 = vmatprep.subr.bf16.mxu0 %v6818_v36  ;;  %v6876_v0 = vpack.c.bf16 %v4833_v43, %v4832_v63 }
 0x3e1   : > { %3693 = vmatmul.mubr.f32.vlgmr.msra.gmra.mrb[34].mxu1 %v10359_v7 }
 0x3e2   : > { %4003 = vmatmul.mubr.f32.vlgmr.msra.gmra.mrb[36].mxu0 %v10359_v7  ;;  %3697 = vmatprep.mubr.f32.mxu1 %v10386_v27 }
 0x3e3   : > { %6741 = vmatpush3.bf16.msra.mxu1 %v6738_v39  ;;  %4007 = vmatprep.mubr.f32.mxu0 %v10386_v27  ;;  %v4776_v39 = vld [vmem:[%s11374_s5 + $0x870] sm:$0xff] }
 0x3e4   : > { %6821 = vmatpush3.bf16.msra.mxu0 %v6818_v36  ;;  %6743 = vmatprep.subr.bf16.mxu1 %v6742_v50  ;;  %v4777_v36 = vld [vmem:[%s11374_s5 + $0x878] sm:$0xff] }
 0x3e5   : > { %3698 = vmatmul.mubr.f32.gmra.mrb[36].mxu1 %v10389_v29  ;;  %6823 = vmatprep.subr.bf16.mxu0 %v6822_v60  ;;  %v6798_v21 = vpack.c.bf16 %v4777_v36, %v4776_v39  ;;  %v4768_v39 = vld [vmem:[%s11374_s5 + $0x830] sm:$0xff]  ;;  %v4769_v36 = vld [vmem:[%s11374_s5 + $0x838] sm:$0xff] }
 0x3e6   : > { %4008 = vmatmul.mubr.f32.gmra.mrb[38].mxu0 %v10389_v29  ;;  %5566 = vmatprep.mubr.msk.f32.mxu1 %vm3001_vm7, %v10517_v3 }
 0x3e7   : > { %6745 = vmatpush3.bf16.msra.mxu1 %v6742_v50  ;;  %5585 = vmatprep.mubr.msk.f32.mxu0 %vm3001_vm7, %v10517_v3  ;;  %v4760_v50 = vld [vmem:[%s11374_s5 + $0x7f0] sm:$0xff] }
 0x3e8   : > { %6825 = vmatpush3.bf16.msra.mxu0 %v6822_v60  ;;  %6747 = vmatprep.subr.bf16.mxu1 %v6746_v49  ;;  %v4761_v60 = vld [vmem:[%s11374_s5 + $0x7f8] sm:$0xff] }
 0x3e9   : > { %6827 = vmatprep.subr.bf16.mxu0 %v6826_v47  ;;  %v6800_v41 = vpack.c.bf16 %v4761_v60, %v4760_v50  ;;  %v6816_v60 = vpack.c.bf16 %v4769_v36, %v4768_v39  ;;  %v4808_v36 = vld [vmem:[%s11374_s5 + $0x960] sm:$0xff] }
 0x3eb   : > { %6749 = vmatpush3.bf16.msra.mxu1 %v6746_v49  ;;  %v4779_v49 = vld [vmem:[%s11374_s5 + $0x888] sm:$0xff] }
 0x3ec   : > { %6829 = vmatpush3.bf16.msra.mxu0 %v6826_v47  ;;  %6751 = vmatprep.subr.bf16.mxu1 %v6750_v42  ;;  %v4852_v47 = vld [vmem:[%s11374_s5 + $0xac0] sm:$0xff]  ;;  %v6802_v28 = vpack.c.bf16 %v4779_v49, %v4778_v55 }
 0x3ed   : > { %6831 = vmatprep.subr.bf16.mxu0 %v6830_v54  ;;  %v6882_v51 = vpack.c.bf16 %v4853_v13, %v4852_v47  ;;  %v4796_v13 = vld [vmem:[%s11374_s5 + $0x900] sm:$0xff] }
 0x3ef   : > { %6753 = vmatpush3.bf16.msra.mxu1 %v6750_v42  ;;  %v4762_v42 = vld [vmem:[%s11374_s5 + $0x800] sm:$0xff] }
 0x3f0   : > { %6833 = vmatpush3.bf16.msra.mxu0 %v6830_v54  ;;  %6787 = vmatprep.subr.bf16.mxu1 %v6786_v11  ;;  %v4763_v54 = vld [vmem:[%s11374_s5 + $0x808] sm:$0xff]  ;;  %v4781_v11 = vld [vmem:[%s11374_s5 + $0x898] sm:$0xff] }
 0x3f1   : > { %6867 = vmatprep.subr.bf16.mxu0 %v6866_v58  ;;  %v6804_v58 = vpack.c.bf16 %v4763_v54, %v4762_v42  ;;  %v6806_v26 = vpack.c.bf16 %v4781_v11, %v4780_v15  ;;  %v4815_v42 = vld [vmem:[%s11374_s5 + $0x998] sm:$0xff] }
 0x3f2   : > { %5567 = vmatmul.mubr.msk.f32.vlgmr.msra.gmra.mrb[38].mxu1 %vm3001_vm7, %v10550_v25 }
 0x3f3   : > { %5586 = vmatmul.mubr.msk.f32.vlgmr.msra.gmra.mrb[40].mxu0 %vm3001_vm7, %v10550_v25  ;;  %6789 = vmatpush3.bf16.msra.mxu1 %v6788_v23  ;;  %v4838_v23 = vld [vmem:[%s11374_s5 + $0xa50] sm:$0xff] }
 0x3f4   : > { %4077 = vmatprep.mubr.f32.mxu1 %v10361_v52  ;;  %6869 = vmatpush3.bf16.msra.mxu0 %v6868_v35  ;;  %v4782_v35 = vld [vmem:[%s11374_s5 + $0x8a0] sm:$0xff]  ;;  %v6888_v5 = vpack.c.bf16 %v4839_v16, %v4838_v23 }
 0x3f5   : > { %4387 = vmatprep.mubr.f32.mxu0 %v10361_v52  ;;  %6791 = vmatprep.subr.bf16.mxu1 %v6790_v32  ;;  %v4851_v52 = vld [vmem:[%s11374_s5 + $0xab8] sm:$0xff]  ;;  %v6808_v32 = vpack.c.bf16 %v4765_v31, %v4764_v22  ;;  %v6810_v37 = vpack.c.bf16 %v4783_v9, %v4782_v35  ;;  %v4816_v22 = vld [vmem:[%s11374_s5 + $0x9a0] sm:$0xff]  ;;  %v4817_v31 = vld [vmem:[%s11374_s5 + $0x9a8] sm:$0xff] }
 0x3f6   : > { %6871 = vmatprep.subr.bf16.mxu0 %v6870_v6  ;;  %v6878_v19 = vpack.c.bf16 %v4851_v52, %v4850_v45  ;;  %v4767_v6 = vld [vmem:[%s11374_s5 + $0x828] sm:$0xff]  ;;  %v4842_v45 = vld [vmem:[%s11374_s5 + $0xa70] sm:$0xff]  ;;  %v6894_v52 = vpack.c.bf16 %v4859_v4, %v4858_v8  ;;  %v6842_v16 = vpack.c.bf16 %v4817_v31, %v4816_v22  ;;  %v4800_v35 = vld [vmem:[%s11374_s5 + $0x920] sm:$0xff] }
 0x3f7   : > { %6793 = vmatpush3.bf16.msra.mxu1 %v6792_v40  ;;  %v4841_v40 = vld [vmem:[%s11374_s5 + $0xa68] sm:$0xff]  ;;  %v6812_v63 = vpack.c.bf16 %v4767_v6, %v4766_v38  ;;  %v4804_v6 = vld [vmem:[%s11374_s5 + $0x940] sm:$0xff]  ;;  %v4806_v8 = vld [vmem:[%s11374_s5 + $0x950] sm:$0xff] }
 0x3f8   : > { %6873 = vmatpush3.bf16.msra.mxu0 %v6872_v10  ;;  %6795 = vmatprep.subr.bf16.mxu1 %v6794_v61  ;;  %v4784_v10 = vld [vmem:[%s11374_s5 + $0x8b0] sm:$0xff]  ;;  %v4785_v61 = vld [vmem:[%s11374_s5 + $0x8b8] sm:$0xff]  ;;  %v4801_v9 = vld [vmem:[%s11374_s5 + $0x928] sm:$0xff] }
 0x3f9   : > { %6875 = vmatprep.subr.bf16.mxu0 %v6874_v48  ;;  %v6892_v48 = vpack.c.bf16 %v4841_v40, %v4840_v59  ;;  %v6814_v43 = vpack.c.bf16 %v4785_v61, %v4784_v10  ;;  %v6844_v24 = vpack.c.bf16 %v4801_v9, %v4800_v35  ;;  %v4805_v59 = vld [vmem:[%s11374_s5 + $0x948] sm:$0xff]  ;;  %v4823_v40 = vld [vmem:[%s11374_s5 + $0x9d8] sm:$0xff] }
 0x3fa   : > { %v6852_v10 = vpack.c.bf16 %v4805_v59, %v4804_v6  ;;  %v4807_v4 = vld [vmem:[%s11374_s5 + $0x958] sm:$0xff] }
 0x3fb   : > { %6797 = vmatpush3.bf16.msra.mxu1 %v6796_v53  ;;  %v4843_v53 = vld [vmem:[%s11374_s5 + $0xa78] sm:$0xff] }
 0x3fc   : > { %6877 = vmatpush3.bf16.msra.mxu0 %v6876_v0  ;;  %6799 = vmatprep.subr.bf16.mxu1 %v6798_v21  ;;  %v4812_v0 = vld [vmem:[%s11374_s5 + $0x980] sm:$0xff]  ;;  %v4813_v21 = vld [vmem:[%s11374_s5 + $0x988] sm:$0xff] }
 0x3fd   : > { %6879 = vmatprep.subr.bf16.mxu0 %v6878_v19  ;;  %v6896_v19 = vpack.c.bf16 %v4843_v53, %v4842_v45  ;;  %v6834_v55 = vpack.c.bf16 %v4813_v21, %v4812_v0  ;;  %v4809_v45 = vld [vmem:[%s11374_s5 + $0x968] sm:$0xff]  ;;  %v4827_v53 = vld [vmem:[%s11374_s5 + $0x9f8] sm:$0xff] }
 0x3fe   : > { %v6860_v0 = vpack.c.bf16 %v4809_v45, %v4808_v36 }
 0x3ff   : > { %6801 = vmatpush3.bf16.msra.mxu1 %v6800_v41  ;;  %v4797_v41 = vld [vmem:[%s11374_s5 + $0x908] sm:$0xff] }
 0x400   : > { %6881 = vmatpush3.bf16.msra.mxu0 %v6880_v57  ;;  %6803 = vmatprep.subr.bf16.mxu1 %v6802_v28  ;;  %v4814_v28 = vld [vmem:[%s11374_s5 + $0x990] sm:$0xff] }
 0x401   : > { %6883 = vmatprep.subr.bf16.mxu0 %v6882_v51  ;;  %v6836_v51 = vpack.c.bf16 %v4797_v41, %v4796_v13  ;;  %v6838_v18 = vpack.c.bf16 %v4815_v42, %v4814_v28  ;;  %v4862_v41 = vld [vmem:[%s11374_s5 + $0xb10] sm:$0xff] }
 0x403   : > { %6805 = vmatpush3.bf16.msra.mxu1 %v6804_v58  ;;  %v4798_v58 = vld [vmem:[%s11374_s5 + $0x910] sm:$0xff] }
 0x404   : > { %6885 = vmatpush3.bf16.msra.mxu0 %v6884_v20  ;;  %6807 = vmatprep.subr.bf16.mxu1 %v6806_v26  ;;  %v4799_v20 = vld [vmem:[%s11374_s5 + $0x918] sm:$0xff] }
 0x405   : > { %6887 = vmatprep.subr.bf16.mxu0 %v6886_v34  ;;  %v6840_v23 = vpack.c.bf16 %v4799_v20, %v4798_v58 }
 0x407   : > { %6809 = vmatpush3.bf16.msra.mxu1 %v6808_v32  ;;  %v4802_v32 = vld [vmem:[%s11374_s5 + $0x930] sm:$0xff] }
 0x408   : > { %6889 = vmatpush3.bf16.msra.mxu0 %v6888_v5  ;;  %6811 = vmatprep.subr.bf16.mxu1 %v6810_v37  ;;  %v4803_v5 = vld [vmem:[%s11374_s5 + $0x938] sm:$0xff]  ;;  %v4820_v37 = vld [vmem:[%s11374_s5 + $0x9c0] sm:$0xff] }
 0x409   : > { %6891 = vmatprep.subr.bf16.mxu0 %v6890_v56  ;;  %v4822_v56 = vld [vmem:[%s11374_s5 + $0x9d0] sm:$0xff] }
 0x40a   : > { %v6854_v61 = vpack.c.bf16 %v4823_v40, %v4822_v56 }
 0x40b   : > { %6813 = vmatpush3.bf16.msra.mxu1 %v6812_v63  ;;  %v5079_v50 = vpop.f32.mrb[24].mxu1  ;;  %v4824_v63 = vld [vmem:[%s11374_s5 + $0x9e0] sm:$0xff] }
 0x40c   : > { %6893 = vmatpush3.bf16.msra.mxu0 %v6892_v48  ;;  %6815 = vmatprep.subr.bf16.mxu1 %v6814_v43  ;;  %v5117_v14 = vpop.f32.mrb[22].mxu0  ;;  %v5080_v62 = vpop.f32.mrb[25].mxu1  ;;  %v4825_v48 = vld [vmem:[%s11374_s5 + $0x9e8] sm:$0xff]  ;;  %v6856_v43 = vpack.c.bf16 %v4807_v4, %v4806_v8 }
 0x40d   : > { %6895 = vmatprep.subr.bf16.mxu0 %v6894_v52  ;;  %v5081_v49 = vadd.f32 %v5080_v62, %v5079_v50  ;;  %v5118_v47 = vpop.f32.mrb[23].mxu0  ;;  %v6858_v39 = vpack.c.bf16 %v4825_v48, %v4824_v63  ;;  %v4826_v52 = vld [vmem:[%s11374_s5 + $0x9f0] sm:$0xff] }
 0x40e   : > { %v5119_v57 = vadd.f32 %v5118_v47, %v5117_v14  ;;  %v6862_v21 = vpack.c.bf16 %v4827_v53, %v4826_v52  ;;  %v4810_v50 = vld [vmem:[%s11374_s5 + $0x970] sm:$0xff]  ;;  %v4860_v14 = vld [vmem:[%s11374_s5 + $0xb00] sm:$0xff] }
 0x40f   : > { %6817 = vmatpush3.bf16.msra.mxu1 %v6816_v60  ;;  %v5082_v54 = vpop.f32.mrb[26].mxu1  ;;  %v4811_v60 = vld [vmem:[%s11374_s5 + $0x978] sm:$0xff] }
 0x410   : > { %6897 = vmatpush3.bf16.msra.mxu0 %v6896_v19  ;;  %6835 = vmatprep.subr.bf16.mxu1 %v6834_v55  ;;  %v5120_v33 = vpop.f32.mrb[24].mxu0  ;;  %v5083_v46 = vpop.f32.mrb[27].mxu1  ;;  %v11182_v15 = vadd.f32 %v5119_v57, %v5081_v49  ;;  %v4861_v19 = vld [vmem:[%s11374_s5 + $0xb08] sm:$0xff]  ;;  %v6864_v55 = vpack.c.bf16 %v4811_v60, %v4810_v50  ;;  %v4863_v57 = vld [vmem:[%s11374_s5 + $0xb18] sm:$0xff] }
 0x411   : > { %v5084_v11 = vadd.f32 %v5083_v46, %v5082_v54  ;;  %v5121_v1 = vpop.f32.mrb[25].mxu0  ;;  %v6898_v47 = vpack.c.bf16 %v4861_v19, %v4860_v14  ;;  %v6902_v54 = vpack.c.bf16 %v4863_v57, %v4862_v41  ;;  %v4865_v46 = vld [vmem:[%s11374_s5 + $0xb28] sm:$0xff] }
 0x412   : > { %4078 = vmatmul.mubr.f32.vlgmr.msra.gmra.mrb[40].mxu1 %v10363_v12  ;;  %v5122_v26 = vadd.f32 %v5121_v1, %v5120_v33  ;;  %v4866_v1 = vld [vmem:[%s11374_s5 + $0xb30] sm:$0xff] }
 0x413   : > { %4388 = vmatmul.mubr.f32.vlgmr.msra.gmra.mrb[42].mxu0 %v10363_v12  ;;  %4082 = vmatprep.mubr.f32.mxu1 %v10391_v30  ;;  %v4818_v12 = vld [vmem:[%s11374_s5 + $0x9b0] sm:$0xff] }
 0x414   : > { %6837 = vmatpush3.bf16.msra.mxu1 %v6836_v51  ;;  %4392 = vmatprep.mubr.f32.mxu0 %v10391_v30  ;;  %v11200_v34 = vadd.f32 %v5122_v26, %v5084_v11  ;;  %v4819_v30 = vld [vmem:[%s11374_s5 + $0x9b8] sm:$0xff]  ;;  %v4864_v51 = vld [vmem:[%s11374_s5 + $0xb20] sm:$0xff] }
 0x415   : > { %6839 = vmatprep.subr.bf16.mxu1 %v6838_v18  ;;  %v6846_v17 = vpack.c.bf16 %v4819_v30, %v4818_v12  ;;  %v6906_v11 = vpack.c.bf16 %v4865_v46, %v4864_v51  ;;  %v4867_v18 = vld [vmem:[%s11374_s5 + $0xb38] sm:$0xff] }
 0x416   : > { %4083 = vmatmul.mubr.f32.gmra.mrb[42].mxu1 %v10396_v44 }
 0x417   : > { %4393 = vmatmul.mubr.f32.gmra.mrb[44].mxu0 %v10396_v44  ;;  %4312 = vmatprep.mubr.f32.mxu1 %v10357_v2  ;;  %v4821_v2 = vld [vmem:[%s11374_s5 + $0x9c8] sm:$0xff]  ;;  %v6848_v44 = vpack.c.bf16 %v4803_v5, %v4802_v32 }
 0x418   : > { %6841 = vmatpush3.bf16.msra.mxu1 %v6840_v23  ;;  %v6850_v38 = vpack.c.bf16 %v4821_v2, %v4820_v37 }
 0x419   : > { %6843 = vmatprep.subr.bf16.mxu1 %v6842_v16 }
 0x41c   : > { %6845 = vmatpush3.bf16.msra.mxu1 %v6844_v24 }
 0x41d   : > { %6847 = vmatprep.subr.bf16.mxu1 %v6846_v17 }
 0x420   : > { %6849 = vmatpush3.bf16.msra.mxu1 %v6848_v44 }
 0x421   : > { %6851 = vmatprep.subr.bf16.mxu1 %v6850_v38 }
 0x424   : > { %6853 = vmatpush3.bf16.msra.mxu1 %v6852_v10 }
 0x425   : > { %6855 = vmatprep.subr.bf16.mxu1 %v6854_v61  ;;  %v2928_v61 = vld [vmem:[%s11375_s6 + $0x8] sm:$0xff] }
 0x428   : > { %6857 = vmatpush3.bf16.msra.mxu1 %v6856_v43 }
 0x429   : > { %6859 = vmatprep.subr.bf16.mxu1 %v6858_v39 }
 0x42c   : > { %6861 = vmatpush3.bf16.msra.mxu1 %v6860_v0  ;;  %v5165_v62 = vpop.f32.mrb[26].mxu0 }
 0x42d   : > { %6863 = vmatprep.subr.bf16.mxu1 %v6862_v21  ;;  %v5166_v49 = vpop.f32.mrb[27].mxu0 }
 0x42e   : > { %v5167_v13 = vadd.f32 %v5166_v49, %v5165_v62 }
 0x430   : > { %6865 = vmatpush3.bf16.msra.mxu1 %v6864_v55  ;;  %v5168_v28 = vpop.f32.mrb[28].mxu0 }
 0x431   : > { %6899 = vmatprep.subr.bf16.mxu1 %v6898_v47  ;;  %v5169_v42 = vpop.f32.mrb[29].mxu0 }
 0x432   : > { %v5170_v33 = vadd.f32 %v5169_v42, %v5168_v28 }
 0x433   : > { %4313 = vmatmul.mubr.f32.vlgmr.msra.gmra.mrb[44].mxu1 %v10359_v7  ;;  %v6910_v7 = vpack.c.bf16 %v4867_v18, %v4866_v1 }
 0x434   : > { %4317 = vmatprep.mubr.f32.mxu1 %v10386_v27  ;;  %6901 = vmatpush3.bf16.msra.mxu1 %v6898_v47 }
 0x435   : > { %6903 = vmatprep.subr.bf16.mxu1 %v6902_v54 }
 0x437   : > { %4318 = vmatmul.mubr.f32.gmra.mrb[46].mxu1 %v10389_v29 }
 0x438   : > { %6905 = vmatpush3.bf16.msra.mxu1 %v6902_v54  ;;  %5604 = vmatprep.mubr.msk.f32.mxu1 %vm3001_vm7, %v10517_v3 }
 0x439   : > { %6907 = vmatprep.subr.bf16.mxu1 %v6906_v11 }
 0x43c   : > { %6909 = vmatpush3.bf16.msra.mxu1 %v6906_v11 }
 0x43d   : > { %6911 = vmatprep.subr.bf16.mxu1 %v6910_v7 }
 0x440   : > { %6913 = vmatpush3.bf16.msra.mxu1 %v6910_v7 }
 0x443   : > { %5605 = vmatmul.mubr.msk.f32.vlgmr.msra.gmra.mrb[48].mxu1 %vm3001_vm7, %v10550_v25 }
 0x474   : > { %v5530_v27 = vpop.f32.mrb[28].mxu1  ;;  %v5549_v58 = vpop.f32.mrb[30].mxu0 }
 0x475   : > { %v3230_v20 = vadd.f32 %v5530_v27, %v11200_v34  ;;  %v3224_v26 = vpop.f32.mrb[29].mxu1  ;;  %v3533_v22 = vpop.f32.mrb[31].mxu0 }
 0x476   : > { %v3225_v29 = vadd.f32 %v3224_v26, %v11182_v15  ;;  %v2927_v15 = vld [vmem:[%s11375_s6] sm:$0xff] }
 0x477   : > { %v3237_v31 = vrot.slane %v3230_v20, 4 }
 0x478   : > { %v3236_v23 = vrot.slane %v3225_v29, 4 }
 0x47a   : > { %v3238_v3 = vsel %vm3235_vm8, %v3236_v23, %v3237_v31  ;;  %v3241_v37 = vsel %vm3235_vm8, 0.0, %v3236_v23 }
 0x47b   : > { %v3242_v56 = vadd.f32 %v3241_v37, %v2927_v15  ;;  %v3243_v63 = vadd.f32 %v3238_v3, %v2928_v61 }
 0x494   : > { %v5203_v16 = vpop.f32.mrb[30].mxu1  ;;  %v5289_v35 = vpop.f32.mrb[32].mxu0 }
 0x495   : > { %v5204_v9 = vpop.f32.mrb[31].mxu1  ;;  %v5290_v12 = vpop.f32.mrb[33].mxu0 }
 0x496   : > { %v5205_v30 = vadd.f32 %v5204_v9, %v5203_v16  ;;  %v5291_v24 = vadd.f32 %v5290_v12, %v5289_v35 }
 0x498   : > { %v3459_v25 = vadd.f32 %v5205_v30, %v5167_v13  ;;  %v5206_v17 = vpop.f32.mrb[32].mxu1  ;;  %v5292_v32 = vpop.f32.mrb[34].mxu0 }
 0x499   : > { %v5207_v5 = vpop.f32.mrb[33].mxu1  ;;  %v5293_v34 = vpop.f32.mrb[35].mxu0 }
 0x49a   : > { %v3534_v2 = vadd.f32 %v3533_v22, %v3459_v25  ;;  %v5208_v44 = vadd.f32 %v5207_v5, %v5206_v17  ;;  %v5294_v38 = vadd.f32 %v5293_v34, %v5292_v32 }
 0x49c   : > { %v3545_v6 = vrot.slane %v3534_v2, 5  ;;  %v3464_v59 = vadd.f32 %v5208_v44, %v5170_v33 }
 0x49e   : > { %v3539_v40 = vadd.f32 %v5549_v58, %v3464_v59  ;;  %v3550_v10 = vsel %vm3544_vm9, 0.0, %v3545_v6 }
 0x49f   : > { %v3553_v8 = vadd.f32 %v3550_v10, %v3242_v56 }
 0x4a0   : > { %v3546_v4 = vrot.slane %v3539_v40, 5 }
 0x4a2   : > { %v3547_v48 = vsel %vm3544_vm9, %v3545_v6, %v3546_v4 }
 0x4a3   : > { %v3552_v43 = vsel %vm3551_vm10, %v3547_v48, 0.0 }
 0x4a4   : > { %v3554_v39 = vadd.f32 %v3552_v43, %v3243_v63 }
 0x4b4   : > { %v5251_v36 = vpop.f32.mrb[34].mxu1 }
 0x4b5   : > { %v5337_v45 = vpop.f32.mrb[36].mxu0  ;;  %v5252_v52 = vpop.f32.mrb[35].mxu1 }
 0x4b6   : > { %v5253_v53 = vadd.f32 %v5252_v52, %v5251_v36  ;;  %v5338_v0 = vpop.f32.mrb[37].mxu0 }
 0x4b7   : > { %v5339_v21 = vadd.f32 %v5338_v0, %v5337_v45 }
 0x4b8   : > { %v5254_v50 = vpop.f32.mrb[36].mxu1  ;;  %v3770_v60 = vadd.f32 %v5291_v24, %v5253_v53 }
 0x4b9   : > { %v5340_v14 = vpop.f32.mrb[38].mxu0  ;;  %v5255_v19 = vpop.f32.mrb[37].mxu1 }
 0x4ba   : > { %v5256_v62 = vadd.f32 %v5255_v19, %v5254_v50  ;;  %v5341_v55 = vpop.f32.mrb[39].mxu0 }
 0x4bb   : > { %v5342_v49 = vadd.f32 %v5341_v55, %v5340_v14 }
 0x4bc   : > { %v3775_v47 = vadd.f32 %v5294_v38, %v5256_v62 }
 0x4c5   : > { %v5568_v13 = vpop.f32.mrb[38].mxu1 }
 0x4c6   : > { %v3850_v41 = vadd.f32 %v5568_v13, %v3775_v47  ;;  %v5587_v57 = vpop.f32.mrb[40].mxu0  ;;  %v3844_v28 = vpop.f32.mrb[39].mxu1 }
 0x4c7   : > { %v3845_v42 = vadd.f32 %v3844_v28, %v3770_v60  ;;  %v4154_v54 = vpop.f32.mrb[41].mxu0 }
 0x4c8   : > { %v3856_v33 = vrot.slane %v3850_v41, 6 }
 0x4c9   : > { %v3855_v51 = vrot.slane %v3845_v42, 6 }
 0x4cb   : > { %v3857_v46 = vsel %vm287_vm5, %v3855_v51, %v3856_v33  ;;  %v3860_v11 = vsel %vm287_vm5, 0.0, %v3855_v51  ;;  %vm4171_vm5 = vcmask 1044480  }
 0x4cc   : > { %v3862_v1 = vsel %vm3861_vm11, %v3857_v46, 0.0  ;;  %v3863_v18 = vadd.f32 %v3860_v11, %v3553_v8 }
 0x4cd   : > { %v3864_v7 = vadd.f32 %v3862_v1, %v3554_v39 }
 0x4e5   : > { %v5375_v27 = vpop.f32.mrb[40].mxu1 }
 0x4e6   : > { %v5461_v58 = vpop.f32.mrb[42].mxu0  ;;  %v5376_v20 = vpop.f32.mrb[41].mxu1 }
 0x4e7   : > { %v5377_v26 = vadd.f32 %v5376_v20, %v5375_v27  ;;  %v5462_v22 = vpop.f32.mrb[43].mxu0 }
 0x4e8   : > { %v5463_v29 = vadd.f32 %v5462_v22, %v5461_v58 }
 0x4e9   : > { %v4080_v31 = vadd.f32 %v5377_v26, %v5339_v21  ;;  %v5378_v23 = vpop.f32.mrb[42].mxu1 }
 0x4ea   : > { %v5464_v3 = vpop.f32.mrb[44].mxu0  ;;  %v5379_v16 = vpop.f32.mrb[43].mxu1 }
 0x4eb   : > { %v4155_v35 = vadd.f32 %v4154_v54, %v4080_v31  ;;  %v5380_v9 = vadd.f32 %v5379_v16, %v5378_v23  ;;  %v5465_v12 = vpop.f32.mrb[45].mxu0 }
 0x4ec   : > { %v5466_v30 = vadd.f32 %v5465_v12, %v5464_v3 }
 0x4ed   : > { %v4165_v24 = vrot.slane %v4155_v35, 7  ;;  %v4085_v25 = vadd.f32 %v5380_v9, %v5342_v49 }
 0x4ef   : > { %v4160_v17 = vadd.f32 %v5587_v57, %v4085_v25  ;;  %v4170_v32 = vsel %vm300_vm3, 0.0, %v4165_v24 }
 0x4f0   : > { %v4173_v5 = vadd.f32 %v4170_v32, %v3863_v18 }
 0x4f1   : > { %v4166_v34 = vrot.slane %v4160_v17, 7 }
 0x4f3   : > { %v4167_v15 = vsel %vm300_vm3, %v4165_v24, %v4166_v34 }
 0x4f4   : > { %v4172_v37 = vsel %vm4171_vm5, %v4167_v15, 0.0 }
 0x4f5   : > { %v4174_v2 = vadd.f32 %v4172_v37, %v3864_v7 }
 0x506   : > { %v5423_v44 = vpop.f32.mrb[44].mxu1 }
 0x507   : > { %v5424_v38 = vpop.f32.mrb[45].mxu1 }
 0x508   : > { %v5425_v6 = vadd.f32 %v5424_v38, %v5423_v44 }
 0x50a   : > { %v5426_v59 = vpop.f32.mrb[46].mxu1  ;;  %v4390_v56 = vadd.f32 %v5463_v29, %v5425_v6 }
 0x50b   : > { %v5427_v40 = vpop.f32.mrb[47].mxu1 }
 0x50c   : > { %v5428_v10 = vadd.f32 %v5427_v40, %v5426_v59 }
 0x50e   : > { %v4395_v61 = vadd.f32 %v5466_v30, %v5428_v10 }
 0x516   : > { %v5606_v8 = vpop.f32.mrb[48].mxu1 }
 0x517   : > { %v4470_v4 = vadd.f32 %v5606_v8, %v4395_v61  ;;  %v4464_v63 = vpop.f32.mrb[49].mxu1 }
 0x518   : > { %v4465_v48 = vadd.f32 %v4464_v63, %v4390_v56 }
 0x519   : > { %v4473_v43 = vsel %vm3235_vm8, %v4470_v4, 0.0 }
 0x51a   : > { %v4475_v39 = vadd.f32 %v4473_v43, %v4174_v2  ;;  %v4474_v36 = vadd.f32 %v4465_v48, %v4173_v5 }
 0x51c   : > { %4477 = vst.msk [vmem:[%s271_s23 + $0x8] sm:$0xff] %vm278_vm0, %v4475_v39  ;;  %4476 = vst.msk [vmem:[%s271_s23] sm:$0xff] %vm278_vm0, %v4474_v36 }
 0x51d   : > { %7018 = shalt.err (!%p7015_p3)
}
 0x51e   : > { %s7019_s19 = scalar_lea.hbm %s11322_s13, 256  ;;  %s7023_s14 = scalar_lea.hbm %s11376_s7, 512 }
 0x51f   : > { %p7020_p4 = scmp.ne.s32.totalorder %s11322_s13, %s7019_s19  ;;  %p7024_p9 = scmp.lt.u32.totalorder %s11322_s13, %s11376_s7 }
 0x520   : > { %p7025_p10 = scmp.lt.u32.totalorder %s7023_s14, %s7019_s19  ;;  %p7027_p12 = scmp.lt.u32.totalorder %s7019_s19, %s11322_s13 }
 0x521   : > { %p7021_p7 = pnand %p7020_p4, %p7159_p5 }
 0x522   : > { %p7026_p11 = por %p7025_p10, %p7024_p9 }
 0x523   : > { %p7022_p8 = pneg %p7021_p7 }
 0x524   : > { %p7028_p13 = por %p7027_p12, %p7026_p11 }
 0x526   : > { %p7029_p0 = pnand %p7028_p13, %p7022_p8 }
 0x528   : > { %7032 = shalt.err (!%p7029_p0)
}
 0x529   : > { %s7079_s18 = smov 128   ;;  %s7080_s17 = smov 8  }
 0x52a   : > { %6954 = dma.vmem_to_hbm [thread:$0]  (%p7159_p5), %s11324_s9, 256, %s11322_s13, %s11328_s28, %s7079_s18, %s7079_s18, %s7080_s17  }
 0x52b PF: > { %p6960_p1 = scmp.ge.s32.totalorder %s7067_s27, 2  ;;  %s4507_s22 = sand.u32 1, %s7055_s24  }
 0x52c   : > { %s4508_s15 = scalar_lea.sflag [#allocation4], %s4507_s22 }
 0x52d   : > { %p6957_p2 = pnand %p6960_p1, %p7163_p6 }
 0x52f   : > { %7050 = dma.done.wait (!%p6957_p2), %s4508_s15, 256  }
 0x530   : > { %7052 = vsyncadd (!%p6957_p2), %s4508_s15, 4294967040  ;;  %p17_p3 = scmp.ge.s32.totalorder %s7146_s30, 4   ;;  %s11389_s24 = smov %s7059_s25 }
 0x531   : > { %s11390_s25 = smov %s7063_s26  ;;  %s11391_s26 = smov %s7157_s10 }
 0x532   : > { %s11392_s27 = smov %s7146_s30  ;;  %19 = sbr.rel (!%p17_p3) target bundleno = 3 (0x3), region = 87 }
 0x539   :  { %4513 = vsyncpa [#allocation4], 1 }
 0x53a   :  { %4515 = vsyncpa [#allocation4 + $0x1], 1 }

</bundles_post_ra>
